<compile_context>
chip_gen: v5e
topology: v5e:2x2
jax: 0.10.0
libtpu: 0.0.40
codegen_flags: <defaults>
</compile_context>

<pallas_src>
import functools

import jax
import jax.numpy as jnp
from jax.experimental import pallas as pl
from jax.experimental.pallas import tpu as pltpu

LANE = 128      # vreg lane width
SUBLANE = 8     # vreg sublane group


def _round_up(n, m):
    return ((n + m - 1) // m) * m


# ---------------------------------------------------------------------------
# Fused kernel: per grid step (batch block b, time chunk t):
#   phase 1: gx = relu(x_chunk) @ W_ih_p + bias   (one big MXU matmul -> VMEM scratch)
#   phase 2: Tc recurrence steps (only per-gate h @ W_hh in the hot loop)
# ---------------------------------------------------------------------------
def _lstm_fused_kernel(x_ref, wih_ref, whh_ref, b_ref, o_ref,
                       gx_scr, o_scr, h_scr, c_scr, *, n_sub):
    # x_ref  : (BB, Tc, Dp)   bf16  batch-major input block (relu not yet applied)
    # wih_ref: (Dp, 4*Hp)     bf16  transposed, per-gate padded W_ih   (single-buffered)
    # whh_ref: (Hp, 4*Hp)     bf16  transposed, per-gate padded W_hh   (single-buffered)
    # b_ref  : (1, 4*Hp)      f32   combined b_ih + b_hh               (single-buffered)
    # o_ref  : (BB, Tc, Hp)   f32   batch-major output block
    # gx_scr : (Tc, BB, 4*Hp) f32   time-major projection scratch (per chunk)
    # o_scr  : (Tc, BB, Hp)   f32   time-major output scratch (per chunk)
    # h_scr  : (BB, Hp)       f32   persists across time chunks (per batch block)
    # c_scr  : (BB, Hp)       f32
    bb, tc, dp = x_ref.shape
    hp = h_scr.shape[-1]
    sb = bb // n_sub

    @pl.when(pl.program_id(1) == 0)            # first time chunk of this batch block
    def _init():
        h_scr[...] = jnp.zeros_like(h_scr)
        c_scr[...] = jnp.zeros_like(c_scr)

    # ---- fused phase 1: relu + input projection for the whole chunk ----
    # In-VMEM (BB, Tc, .) -> (Tc, BB, .) transpose (XLU; no XLA-side HBM round-trip).
    x = jnp.maximum(x_ref[...].astype(jnp.float32), 0.0)       # relu (f32 VPU, v5e-safe)
    x_tm = jnp.transpose(x, (1, 0, 2)).reshape(tc * bb, dp)
    gx = jnp.dot(x_tm.astype(jnp.bfloat16), wih_ref[...],
                 preferred_element_type=jnp.float32) + b_ref[...]
    gx_scr[...] = gx.reshape(tc, bb, 4 * hp)

    # ---- phase 2: recurrence ----
    # n_sub independent batch sub-blocks per timestep: chain A's MXU work overlaps
    # chain B's EUP/VPU tail when the recurrence is latency-bound.
    hs = [h_scr[s * sb:(s + 1) * sb, :] for s in range(n_sub)]
    cs = [c_scr[s * sb:(s + 1) * sb, :] for s in range(n_sub)]

    for t in range(tc):                         # fully unrolled (Tc is small, static)
        for s in range(n_sub):
            r0, r1 = s * sb, (s + 1) * sb
            h_b = hs[s].astype(jnp.bfloat16)

            # Per-gate (Hp, Hp) matmuls consumed immediately: bounded vreg liveness,
            # and each gate's EUP nonlinearity overlaps the next gate's matmul.
            # Gate slabs are Hp(=k*128)-aligned -> lane-dense slices, no masked ops.
            def pre(g):
                return gx_scr[t, r0:r1, g * hp:(g + 1) * hp] + jnp.dot(
                    h_b, whh_ref[:, g * hp:(g + 1) * hp],
                    preferred_element_type=jnp.float32)

            i_g = jax.nn.sigmoid(pre(0))        # PyTorch gate order: i, f, g, o
            g_g = jnp.tanh(pre(2))
            c_n = i_g * g_g
            f_g = jax.nn.sigmoid(pre(1))
            c_n = f_g * cs[s] + c_n
            o_g = jax.nn.sigmoid(pre(3))
            h_n = o_g * jnp.tanh(c_n)

            cs[s] = c_n
            hs[s] = h_n
            o_scr[t, r0:r1, :] = h_n            # contiguous (sb, Hp) lane-dense store

    for s in range(n_sub):
        h_scr[s * sb:(s + 1) * sb, :] = hs[s]
        c_scr[s * sb:(s + 1) * sb, :] = cs[s]

    # ---- batch-major output block: one bulk in-VMEM transpose + unmasked store ----
    o_ref[...] = jnp.transpose(o_scr[...], (1, 0, 2)).astype(o_ref.dtype)


@jax.jit
def lstm_forward(x, w_ih, w_hh, b_ih, b_hh):
    """relu(x) -> single-layer LSTM (batch_first) -> dropout(eval, identity).

    x: (B, T, D) float32.  Returns (B, T, H) float32.
    """
    B, T, D = x.shape
    H = w_ih.shape[0] // 4
    f32 = jnp.float32

    Hp = _round_up(H, LANE)          # lane-dense hidden
    Dp = _round_up(D, LANE)          # lane-dense input features
    Bp = _round_up(B, SUBLANE)       # full sublane groups

    # ---- per-generation VMEM budget (v7x: 64 MiB/TC, v5e/v6e: 128 MiB) ----
    # Size tiles against ~50% of capacity, set the scoped limit at 75%
    # (v7x -> 32/48 MiB, v5e/v6e -> 64/96 MiB).
    try:
        cap = int(getattr(pltpu.get_tpu_info(), "vmem_capacity_bytes", 0)) or (64 << 20)
    except Exception:
        cap = 64 << 20               # conservative fallback (smallest per-TC VMEM)
    budget = cap // 2
    vmem_limit = (3 * cap) // 4

    # ---- batch block: largest multiple of 8 <= 64 that divides Bp (MXU row fill) ----
    BB = SUBLANE
    for cand in range(min(Bp, 64), SUBLANE - 1, -SUBLANE):
        if Bp % cand == 0:
            BB = cand
            break
    n_sub = 2 if BB >= 16 else 1     # interleave two independent chains when possible

    # ---- time chunk: as large as the VMEM budget allows (amortizes grid overhead) ----
    def usage(bb, tc):
        return (2 * bb * tc * Dp * 2          # x blocks (bf16, double-buffered)
                + 2 * bb * tc * Hp * 4        # out blocks (f32, double-buffered)
                + Dp * 4 * Hp * 2             # W_ih (bf16, single-buffered)
                + Hp * 4 * Hp * 2             # W_hh (bf16, single-buffered)
                + 4 * Hp * 4                  # bias
                + tc * bb * 4 * Hp * 4        # gx scratch
                + tc * bb * Hp * 4            # out scratch
                + 2 * bb * Hp * 4)            # h, c state

    Tc = min(_round_up(T, SUBLANE), 32)
    while Tc > SUBLANE and usage(BB, Tc) > budget:
        Tc -= SUBLANE
    Tp = _round_up(T, Tc)
    n_tc = Tp // Tc

    # ---- per-gate padded, transposed weights (PyTorch gate order i, f, g, o) ----
    wih_p = jnp.zeros((4, Hp, Dp), f32).at[:, :H, :D].set(
        w_ih.reshape(4, H, D).astype(f32))
    wih_t = wih_p.transpose(2, 0, 1).reshape(Dp, 4 * Hp).astype(jnp.bfloat16)

    whh_p = jnp.zeros((4, Hp, Hp), f32).at[:, :H, :H].set(
        w_hh.reshape(4, H, H).astype(f32))
    whh_t = whh_p.transpose(2, 0, 1).reshape(Hp, 4 * Hp).astype(jnp.bfloat16)

    # Padded gate columns stay exactly 0 in W_hh/bias so padded c/h columns remain 0
    # through the recurrence (g=0, c0=0) -- do not change this zero-padding invariant.
    bias = jnp.zeros((4, Hp), f32).at[:, :H].set(
        (b_ih + b_hh).reshape(4, H).astype(f32)).reshape(1, 4 * Hp)

    # ---- pad x, keep batch-major, carry through HBM as bf16 (MXU-only consumer) ----
    x_p = jnp.pad(x.astype(jnp.bfloat16),
                  ((0, Bp - B), (0, Tp - T), (0, Dp - D)))

    out_p = pl.pallas_call(
        functools.partial(_lstm_fused_kernel, n_sub=n_sub),
        out_shape=jax.ShapeDtypeStruct((Bp, Tp, Hp), f32),
        grid_spec=pltpu.PrefetchScalarGridSpec(
            num_scalar_prefetch=0,
            grid=(Bp // BB, n_tc),               # (batch blocks, time chunks)
            in_specs=[
                pl.BlockSpec((BB, Tc, Dp), lambda b, t: (b, t, 0)),
                # Constant-index weight/bias blocks: single-buffered (no wasted
                # second pipeline buffer -- matters on v7x's 64 MiB VMEM).
                pl.BlockSpec((Dp, 4 * Hp), lambda b, t: (0, 0),
                             pipeline_mode=pl.Buffered(1)),
                pl.BlockSpec((Hp, 4 * Hp), lambda b, t: (0, 0),
                             pipeline_mode=pl.Buffered(1)),
                pl.BlockSpec((1, 4 * Hp), lambda b, t: (0, 0),
                             pipeline_mode=pl.Buffered(1)),
            ],
            out_specs=pl.BlockSpec((BB, Tc, Hp), lambda b, t: (b, t, 0)),
            scratch_shapes=[
                pltpu.VMEM((Tc, BB, 4 * Hp), f32),   # gx (time-major, per chunk)
                pltpu.VMEM((Tc, BB, Hp), f32),       # out (time-major, per chunk)
                pltpu.VMEM((BB, Hp), f32),           # h_t
                pltpu.VMEM((BB, Hp), f32),           # c_t
            ],
        ),
        compiler_params=pltpu.CompilerParams(
            # Batch blocks are independent -> megacore sharding on v7x (when >= 2
            # blocks exist); time is the sequential recurrence.
            dimension_semantics=("parallel", "arbitrary"),
            vmem_limit_bytes=vmem_limit,
        ),
    )(x_p, wih_t, whh_t, bias)

    return out_p[:B, :T, :H].astype(x.dtype)


def lstm_reference(x, w_ih, w_hh, b_ih, b_hh):
    """Pure-JAX f32 reference matching PyTorch nn.LSTM (gate order i, f, g, o)."""
    x = jnp.maximum(x, 0.0)
    B, T, D = x.shape
    H = w_hh.shape[1]
    h = jnp.zeros((B, H), jnp.float32)
    c = jnp.zeros((B, H), jnp.float32)

    def step(carry, xt):
        h, c = carry
        gates = xt @ w_ih.T + h @ w_hh.T + b_ih + b_hh
        i = jax.nn.sigmoid(gates[:, 0 * H:1 * H])
        f = jax.nn.sigmoid(gates[:, 1 * H:2 * H])
        g = jnp.tanh(gates[:, 2 * H:3 * H])
        o = jax.nn.sigmoid(gates[:, 3 * H:4 * H])
        c = f * c + i * g
        h = o * jnp.tanh(c)
        return (h, c), h

    _, hs = jax.lax.scan(step, (h, c), jnp.transpose(x, (1, 0, 2)))
    return jnp.transpose(hs, (1, 0, 2))


if __name__ == "__main__":
    # Small shapes consistent with the module: batch=4, seq=8,
    # rnn_dim=32 (input size), hidden_size=32, dropout=0.1 (identity in eval).
    B, T, D, H = 4, 8, 32, 32

    key = jax.random.PRNGKey(0)
    kx, k1, k2, k3, k4 = jax.random.split(key, 5)

    x = jax.random.normal(kx, (B, T, D), dtype=jnp.float32)

    # Deterministic parameter init mimicking PyTorch's uniform(-1/sqrt(H), 1/sqrt(H)).
    bound = 1.0 / jnp.sqrt(jnp.float32(H))
    w_ih = jax.random.uniform(k1, (4 * H, D), jnp.float32, -bound, bound)
    w_hh = jax.random.uniform(k2, (4 * H, H), jnp.float32, -bound, bound)
    b_ih = jax.random.uniform(k3, (4 * H,), jnp.float32, -bound, bound)
    b_hh = jax.random.uniform(k4, (4 * H,), jnp.float32, -bound, bound)

    y = jax.block_until_ready(lstm_forward(x, w_ih, w_hh, b_ih, b_hh))
    y_ref = lstm_reference(x, w_ih, w_hh, b_ih, b_hh)

    assert y.shape == (B, T, H)
    max_err = float(jnp.max(jnp.abs(y - y_ref)))
    # bf16 MXU operands / bf16 x in HBM (f32 accumulation, f32 state) => slightly
    # looser tolerance against the all-f32 reference.
    assert max_err < 5e-2, f"max abs err {max_err}"

    print("KERNEL_OK")
</pallas_src>

<mosaic_0001>
module attributes {stable_mosaic.version = 11 : i64} {
  func.func @_lstm_fused_kernel(%arg0: i32, %arg1: i32, %arg2: memref<8x8x128xbf16, #tpu.memory_space<vmem>>, %arg3: memref<128x512xbf16, #tpu.memory_space<vmem>>, %arg4: memref<128x512xbf16, #tpu.memory_space<vmem>>, %arg5: memref<1x512xf32, #tpu.memory_space<vmem>>, %arg6: memref<8x8x128xf32, #tpu.memory_space<vmem>>, %arg7: memref<8x8x512xf32, #tpu.memory_space<vmem>>, %arg8: memref<8x8x128xf32, #tpu.memory_space<vmem>>, %arg9: memref<8x128xf32, #tpu.memory_space<vmem>>, %arg10: memref<8x128xf32, #tpu.memory_space<vmem>>) attributes {dimension_semantics = [#tpu.dimension_semantics<parallel>, #tpu.dimension_semantics<arbitrary>], iteration_bounds = array<i64: 1, 1>, scalar_prefetch = 0 : i64, scratch_operands = 4 : i64, tpu.core_type = #tpu.core_type<tc>, window_params = [{transform_indices = @transform_0, window_bounds = array<i64: 8, 8, 128>}, {pipeline_mode = #tpu.pipeline_mode<synchronous>, transform_indices = @transform_1, window_bounds = array<i64: 128, 512>}, {pipeline_mode = #tpu.pipeline_mode<synchronous>, transform_indices = @transform_2, window_bounds = array<i64: 128, 512>}, {pipeline_mode = #tpu.pipeline_mode<synchronous>, transform_indices = @transform_3, window_bounds = array<i64: 1, 512>}, {transform_indices = @transform_4, window_bounds = array<i64: 8, 8, 128>}]} {
    %c0_i32 = arith.constant 0 : i32
    %0 = arith.cmpi eq, %arg1, %c0_i32 : i32
    %1 = arith.extui %0 : i1 to i32
    %c0_i32_0 = arith.constant 0 : i32
    %2 = arith.cmpi ne, %1, %c0_i32_0 : i32
    scf.if %2 {
      %cst_255 = arith.constant 0.000000e+00 : f32
      %384 = vector.broadcast %cst_255 : f32 to vector<8x128xf32>
      %c0_256 = arith.constant 0 : index
      %c0_257 = arith.constant 0 : index
      %385 = vector.load %arg9[%c0_256, %c0_257] : memref<8x128xf32, #tpu.memory_space<vmem>>, vector<8x128xf32>
      tpu.vector_store %arg9[%c0_256, %c0_257], %384 {strides = array<i32>} : memref<8x128xf32, #tpu.memory_space<vmem>>, vector<8x128xf32>,
      %cst_258 = arith.constant 0.000000e+00 : f32
      %386 = vector.broadcast %cst_258 : f32 to vector<8x128xf32>
      %c0_259 = arith.constant 0 : index
      %c0_260 = arith.constant 0 : index
      %387 = vector.load %arg10[%c0_259, %c0_260] : memref<8x128xf32, #tpu.memory_space<vmem>>, vector<8x128xf32>
      tpu.vector_store %arg10[%c0_259, %c0_260], %386 {strides = array<i32>} : memref<8x128xf32, #tpu.memory_space<vmem>>, vector<8x128xf32>,
    } else {
    }
    %c0 = arith.constant 0 : index
    %c0_1 = arith.constant 0 : index
    %c0_2 = arith.constant 0 : index
    %3 = vector.load %arg2[%c0, %c0_1, %c0_2] : memref<8x8x128xbf16, #tpu.memory_space<vmem>>, vector<8x8x128xbf16>
    %4 = arith.extf %3 : vector<8x8x128xbf16> to vector<8x8x128xf32>
    %cst = arith.constant 0.000000e+00 : f32
    %5 = vector.broadcast %cst : f32 to vector<8x8x128xf32>
    %6 = arith.maximumf %4, %5 : vector<8x8x128xf32>
    %7 = tpu.transpose %6, [1, 0, 2] : vector<8x8x128xf32> -> vector<8x8x128xf32>
    %8 = vector.shape_cast %7 : vector<8x8x128xf32> to vector<64x128xf32>
    %9 = arith.truncf %8 : vector<64x128xf32> to vector<64x128xbf16>
    %c0_3 = arith.constant 0 : index
    %c0_4 = arith.constant 0 : index
    %10 = vector.load %arg3[%c0_3, %c0_4] : memref<128x512xbf16, #tpu.memory_space<vmem>>, vector<128x512xbf16>
    %cst_5 = arith.constant dense<0.000000e+00> : vector<64x512xf32>
    %11 = tpu.matmul %9, %10, %cst_5 {dimension_numbers = #tpu.dot_dimension_numbers<[1], [0], [0], [1], [0, 0, 1, 1], [], []>} : vector<64x128xbf16>, vector<128x512xbf16>, vector<64x512xf32> -> vector<64x512xf32>
    %c0_6 = arith.constant 0 : index
    %c0_7 = arith.constant 0 : index
    %12 = vector.load %arg5[%c0_6, %c0_7] : memref<1x512xf32, #tpu.memory_space<vmem>>, vector<1x512xf32>
    %13 = vector.broadcast %12 : vector<1x512xf32> to vector<64x512xf32>
    %14 = arith.addf %11, %13 : vector<64x512xf32>
    %15 = vector.shape_cast %14 : vector<64x512xf32> to vector<8x8x512xf32>
    %c0_8 = arith.constant 0 : index
    %c0_9 = arith.constant 0 : index
    %c0_10 = arith.constant 0 : index
    %16 = vector.load %arg7[%c0_8, %c0_9, %c0_10] : memref<8x8x512xf32, #tpu.memory_space<vmem>>, vector<8x8x512xf32>
    tpu.vector_store %arg7[%c0_8, %c0_9, %c0_10], %15 {strides = array<i32>} : memref<8x8x512xf32, #tpu.memory_space<vmem>>, vector<8x8x512xf32>,
    %c0_11 = arith.constant 0 : index
    %c0_12 = arith.constant 0 : index
    %17 = vector.load %arg9[%c0_11, %c0_12] : memref<8x128xf32, #tpu.memory_space<vmem>>, vector<8x128xf32>
    %c0_13 = arith.constant 0 : index
    %c0_14 = arith.constant 0 : index
    %18 = vector.load %arg10[%c0_13, %c0_14] : memref<8x128xf32, #tpu.memory_space<vmem>>, vector<8x128xf32>
    %19 = arith.truncf %17 : vector<8x128xf32> to vector<8x128xbf16>
    %c0_15 = arith.constant 0 : index
    %c0_16 = arith.constant 0 : index
    %c0_17 = arith.constant 0 : index
    %20 = vector.load %arg7[%c0_15, %c0_16, %c0_17] : memref<8x8x512xf32, #tpu.memory_space<vmem>>, vector<1x8x128xf32>
    %21 = vector.shape_cast %20 : vector<1x8x128xf32> to vector<8x128xf32>
    %c0_18 = arith.constant 0 : index
    %c0_19 = arith.constant 0 : index
    %22 = vector.load %arg4[%c0_18, %c0_19] : memref<128x512xbf16, #tpu.memory_space<vmem>>, vector<128x128xbf16>
    %cst_20 = arith.constant dense<0.000000e+00> : vector<8x128xf32>
    %23 = tpu.matmul %19, %22, %cst_20 {dimension_numbers = #tpu.dot_dimension_numbers<[1], [0], [0], [1], [0, 0, 1, 1], [], []>} : vector<8x128xbf16>, vector<128x128xbf16>, vector<8x128xf32> -> vector<8x128xf32>
    %24 = arith.addf %21, %23 : vector<8x128xf32>
    %25 = arith.negf %24 : vector<8x128xf32>
    %26 = math.exp %25 : vector<8x128xf32>
    %cst_21 = arith.constant 1.000000e+00 : f32
    %27 = vector.broadcast %cst_21 : f32 to vector<8x128xf32>
    %28 = arith.addf %27, %26 : vector<8x128xf32>
    %29 = arith.divf %27, %28 : vector<8x128xf32>
    %c0_22 = arith.constant 0 : index
    %c0_23 = arith.constant 0 : index
    %c256 = arith.constant 256 : index
    %30 = vector.load %arg7[%c0_22, %c0_23, %c256] : memref<8x8x512xf32, #tpu.memory_space<vmem>>, vector<1x8x128xf32>
    %31 = vector.shape_cast %30 : vector<1x8x128xf32> to vector<8x128xf32>
    %c0_24 = arith.constant 0 : index
    %c256_25 = arith.constant 256 : index
    %32 = vector.load %arg4[%c0_24, %c256_25] : memref<128x512xbf16, #tpu.memory_space<vmem>>, vector<128x128xbf16>
    %cst_26 = arith.constant dense<0.000000e+00> : vector<8x128xf32>
    %33 = tpu.matmul %19, %32, %cst_26 {dimension_numbers = #tpu.dot_dimension_numbers<[1], [0], [0], [1], [0, 0, 1, 1], [], []>} : vector<8x128xbf16>, vector<128x128xbf16>, vector<8x128xf32> -> vector<8x128xf32>
    %34 = arith.addf %31, %33 : vector<8x128xf32>
    %35 = math.tanh %34 : vector<8x128xf32>
    %36 = arith.mulf %29, %35 : vector<8x128xf32>
    %c0_27 = arith.constant 0 : index
    %c0_28 = arith.constant 0 : index
    %c128 = arith.constant 128 : index
    %37 = vector.load %arg7[%c0_27, %c0_28, %c128] : memref<8x8x512xf32, #tpu.memory_space<vmem>>, vector<1x8x128xf32>
    %38 = vector.shape_cast %37 : vector<1x8x128xf32> to vector<8x128xf32>
    %c0_29 = arith.constant 0 : index
    %c128_30 = arith.constant 128 : index
    %39 = vector.load %arg4[%c0_29, %c128_30] : memref<128x512xbf16, #tpu.memory_space<vmem>>, vector<128x128xbf16>
    %cst_31 = arith.constant dense<0.000000e+00> : vector<8x128xf32>
    %40 = tpu.matmul %19, %39, %cst_31 {dimension_numbers = #tpu.dot_dimension_numbers<[1], [0], [0], [1], [0, 0, 1, 1], [], []>} : vector<8x128xbf16>, vector<128x128xbf16>, vector<8x128xf32> -> vector<8x128xf32>
    %41 = arith.addf %38, %40 : vector<8x128xf32>
    %42 = arith.negf %41 : vector<8x128xf32>
    %43 = math.exp %42 : vector<8x128xf32>
    %cst_32 = arith.constant 1.000000e+00 : f32
    %44 = vector.broadcast %cst_32 : f32 to vector<8x128xf32>
    %45 = arith.addf %44, %43 : vector<8x128xf32>
    %46 = arith.divf %44, %45 : vector<8x128xf32>
    %47 = arith.mulf %46, %18 : vector<8x128xf32>
    %48 = arith.addf %47, %36 : vector<8x128xf32>
    %c0_33 = arith.constant 0 : index
    %c0_34 = arith.constant 0 : index
    %c384 = arith.constant 384 : index
    %49 = vector.load %arg7[%c0_33, %c0_34, %c384] : memref<8x8x512xf32, #tpu.memory_space<vmem>>, vector<1x8x128xf32>
    %50 = vector.shape_cast %49 : vector<1x8x128xf32> to vector<8x128xf32>
    %c0_35 = arith.constant 0 : index
    %c384_36 = arith.constant 384 : index
    %51 = vector.load %arg4[%c0_35, %c384_36] : memref<128x512xbf16, #tpu.memory_space<vmem>>, vector<128x128xbf16>
    %cst_37 = arith.constant dense<0.000000e+00> : vector<8x128xf32>
    %52 = tpu.matmul %19, %51, %cst_37 {dimension_numbers = #tpu.dot_dimension_numbers<[1], [0], [0], [1], [0, 0, 1, 1], [], []>} : vector<8x128xbf16>, vector<128x128xbf16>, vector<8x128xf32> -> vector<8x128xf32>
    %53 = arith.addf %50, %52 : vector<8x128xf32>
    %54 = arith.negf %53 : vector<8x128xf32>
    %55 = math.exp %54 : vector<8x128xf32>
    %cst_38 = arith.constant 1.000000e+00 : f32
    %56 = vector.broadcast %cst_38 : f32 to vector<8x128xf32>
    %57 = arith.addf %56, %55 : vector<8x128xf32>
    %58 = arith.divf %56, %57 : vector<8x128xf32>
    %59 = math.tanh %48 : vector<8x128xf32>
    %60 = arith.mulf %58, %59 : vector<8x128xf32>
    %c0_39 = arith.constant 0 : index
    %c0_40 = arith.constant 0 : index
    %c0_41 = arith.constant 0 : index
    %61 = vector.load %arg8[%c0_39, %c0_40, %c0_41] : memref<8x8x128xf32, #tpu.memory_space<vmem>>, vector<1x8x128xf32>
    %62 = vector.shape_cast %61 : vector<1x8x128xf32> to vector<8x128xf32>
    %63 = vector.shape_cast %60 : vector<8x128xf32> to vector<1x8x128xf32>
    tpu.vector_store %arg8[%c0_39, %c0_40, %c0_41], %63 {strides = array<i32>} : memref<8x8x128xf32, #tpu.memory_space<vmem>>, vector<1x8x128xf32>,
    %64 = arith.truncf %60 : vector<8x128xf32> to vector<8x128xbf16>
    %c1 = arith.constant 1 : index
    %c0_42 = arith.constant 0 : index
    %c0_43 = arith.constant 0 : index
    %65 = vector.load %arg7[%c1, %c0_42, %c0_43] : memref<8x8x512xf32, #tpu.memory_space<vmem>>, vector<1x8x128xf32>
    %66 = vector.shape_cast %65 : vector<1x8x128xf32> to vector<8x128xf32>
    %c0_44 = arith.constant 0 : index
    %c0_45 = arith.constant 0 : index
    %67 = vector.load %arg4[%c0_44, %c0_45] : memref<128x512xbf16, #tpu.memory_space<vmem>>, vector<128x128xbf16>
    %cst_46 = arith.constant dense<0.000000e+00> : vector<8x128xf32>
    %68 = tpu.matmul %64, %67, %cst_46 {dimension_numbers = #tpu.dot_dimension_numbers<[1], [0], [0], [1], [0, 0, 1, 1], [], []>} : vector<8x128xbf16>, vector<128x128xbf16>, vector<8x128xf32> -> vector<8x128xf32>
    %69 = arith.addf %66, %68 : vector<8x128xf32>
    %70 = arith.negf %69 : vector<8x128xf32>
    %71 = math.exp %70 : vector<8x128xf32>
    %cst_47 = arith.constant 1.000000e+00 : f32
    %72 = vector.broadcast %cst_47 : f32 to vector<8x128xf32>
    %73 = arith.addf %72, %71 : vector<8x128xf32>
    %74 = arith.divf %72, %73 : vector<8x128xf32>
    %c1_48 = arith.constant 1 : index
    %c0_49 = arith.constant 0 : index
    %c256_50 = arith.constant 256 : index
    %75 = vector.load %arg7[%c1_48, %c0_49, %c256_50] : memref<8x8x512xf32, #tpu.memory_space<vmem>>, vector<1x8x128xf32>
    %76 = vector.shape_cast %75 : vector<1x8x128xf32> to vector<8x128xf32>
    %c0_51 = arith.constant 0 : index
    %c256_52 = arith.constant 256 : index
    %77 = vector.load %arg4[%c0_51, %c256_52] : memref<128x512xbf16, #tpu.memory_space<vmem>>, vector<128x128xbf16>
    %cst_53 = arith.constant dense<0.000000e+00> : vector<8x128xf32>
    %78 = tpu.matmul %64, %77, %cst_53 {dimension_numbers = #tpu.dot_dimension_numbers<[1], [0], [0], [1], [0, 0, 1, 1], [], []>} : vector<8x128xbf16>, vector<128x128xbf16>, vector<8x128xf32> -> vector<8x128xf32>
    %79 = arith.addf %76, %78 : vector<8x128xf32>
    %80 = math.tanh %79 : vector<8x128xf32>
    %81 = arith.mulf %74, %80 : vector<8x128xf32>
    %c1_54 = arith.constant 1 : index
    %c0_55 = arith.constant 0 : index
    %c128_56 = arith.constant 128 : index
    %82 = vector.load %arg7[%c1_54, %c0_55, %c128_56] : memref<8x8x512xf32, #tpu.memory_space<vmem>>, vector<1x8x128xf32>
    %83 = vector.shape_cast %82 : vector<1x8x128xf32> to vector<8x128xf32>
    %c0_57 = arith.constant 0 : index
    %c128_58 = arith.constant 128 : index
    %84 = vector.load %arg4[%c0_57, %c128_58] : memref<128x512xbf16, #tpu.memory_space<vmem>>, vector<128x128xbf16>
    %cst_59 = arith.constant dense<0.000000e+00> : vector<8x128xf32>
    %85 = tpu.matmul %64, %84, %cst_59 {dimension_numbers = #tpu.dot_dimension_numbers<[1], [0], [0], [1], [0, 0, 1, 1], [], []>} : vector<8x128xbf16>, vector<128x128xbf16>, vector<8x128xf32> -> vector<8x128xf32>
    %86 = arith.addf %83, %85 : vector<8x128xf32>
    %87 = arith.negf %86 : vector<8x128xf32>
    %88 = math.exp %87 : vector<8x128xf32>
    %cst_60 = arith.constant 1.000000e+00 : f32
    %89 = vector.broadcast %cst_60 : f32 to vector<8x128xf32>
    %90 = arith.addf %89, %88 : vector<8x128xf32>
    %91 = arith.divf %89, %90 : vector<8x128xf32>
    %92 = arith.mulf %91, %48 : vector<8x128xf32>
    %93 = arith.addf %92, %81 : vector<8x128xf32>
    %c1_61 = arith.constant 1 : index
    %c0_62 = arith.constant 0 : index
    %c384_63 = arith.constant 384 : index
    %94 = vector.load %arg7[%c1_61, %c0_62, %c384_63] : memref<8x8x512xf32, #tpu.memory_space<vmem>>, vector<1x8x128xf32>
    %95 = vector.shape_cast %94 : vector<1x8x128xf32> to vector<8x128xf32>
    %c0_64 = arith.constant 0 : index
    %c384_65 = arith.constant 384 : index
    %96 = vector.load %arg4[%c0_64, %c384_65] : memref<128x512xbf16, #tpu.memory_space<vmem>>, vector<128x128xbf16>
    %cst_66 = arith.constant dense<0.000000e+00> : vector<8x128xf32>
    %97 = tpu.matmul %64, %96, %cst_66 {dimension_numbers = #tpu.dot_dimension_numbers<[1], [0], [0], [1], [0, 0, 1, 1], [], []>} : vector<8x128xbf16>, vector<128x128xbf16>, vector<8x128xf32> -> vector<8x128xf32>
    %98 = arith.addf %95, %97 : vector<8x128xf32>
    %99 = arith.negf %98 : vector<8x128xf32>
    %100 = math.exp %99 : vector<8x128xf32>
    %cst_67 = arith.constant 1.000000e+00 : f32
    %101 = vector.broadcast %cst_67 : f32 to vector<8x128xf32>
    %102 = arith.addf %101, %100 : vector<8x128xf32>
    %103 = arith.divf %101, %102 : vector<8x128xf32>
    %104 = math.tanh %93 : vector<8x128xf32>
    %105 = arith.mulf %103, %104 : vector<8x128xf32>
    %c1_68 = arith.constant 1 : index
    %c0_69 = arith.constant 0 : index
    %c0_70 = arith.constant 0 : index
    %106 = vector.load %arg8[%c1_68, %c0_69, %c0_70] : memref<8x8x128xf32, #tpu.memory_space<vmem>>, vector<1x8x128xf32>
    %107 = vector.shape_cast %106 : vector<1x8x128xf32> to vector<8x128xf32>
    %108 = vector.shape_cast %105 : vector<8x128xf32> to vector<1x8x128xf32>
    tpu.vector_store %arg8[%c1_68, %c0_69, %c0_70], %108 {strides = array<i32>} : memref<8x8x128xf32, #tpu.memory_space<vmem>>, vector<1x8x128xf32>,
    %109 = arith.truncf %105 : vector<8x128xf32> to vector<8x128xbf16>
    %c2 = arith.constant 2 : index
    %c0_71 = arith.constant 0 : index
    %c0_72 = arith.constant 0 : index
    %110 = vector.load %arg7[%c2, %c0_71, %c0_72] : memref<8x8x512xf32, #tpu.memory_space<vmem>>, vector<1x8x128xf32>
    %111 = vector.shape_cast %110 : vector<1x8x128xf32> to vector<8x128xf32>
    %c0_73 = arith.constant 0 : index
    %c0_74 = arith.constant 0 : index
    %112 = vector.load %arg4[%c0_73, %c0_74] : memref<128x512xbf16, #tpu.memory_space<vmem>>, vector<128x128xbf16>
    %cst_75 = arith.constant dense<0.000000e+00> : vector<8x128xf32>
    %113 = tpu.matmul %109, %112, %cst_75 {dimension_numbers = #tpu.dot_dimension_numbers<[1], [0], [0], [1], [0, 0, 1, 1], [], []>} : vector<8x128xbf16>, vector<128x128xbf16>, vector<8x128xf32> -> vector<8x128xf32>
    %114 = arith.addf %111, %113 : vector<8x128xf32>
    %115 = arith.negf %114 : vector<8x128xf32>
    %116 = math.exp %115 : vector<8x128xf32>
    %cst_76 = arith.constant 1.000000e+00 : f32
    %117 = vector.broadcast %cst_76 : f32 to vector<8x128xf32>
    %118 = arith.addf %117, %116 : vector<8x128xf32>
    %119 = arith.divf %117, %118 : vector<8x128xf32>
    %c2_77 = arith.constant 2 : index
    %c0_78 = arith.constant 0 : index
    %c256_79 = arith.constant 256 : index
    %120 = vector.load %arg7[%c2_77, %c0_78, %c256_79] : memref<8x8x512xf32, #tpu.memory_space<vmem>>, vector<1x8x128xf32>
    %121 = vector.shape_cast %120 : vector<1x8x128xf32> to vector<8x128xf32>
    %c0_80 = arith.constant 0 : index
    %c256_81 = arith.constant 256 : index
    %122 = vector.load %arg4[%c0_80, %c256_81] : memref<128x512xbf16, #tpu.memory_space<vmem>>, vector<128x128xbf16>
    %cst_82 = arith.constant dense<0.000000e+00> : vector<8x128xf32>
    %123 = tpu.matmul %109, %122, %cst_82 {dimension_numbers = #tpu.dot_dimension_numbers<[1], [0], [0], [1], [0, 0, 1, 1], [], []>} : vector<8x128xbf16>, vector<128x128xbf16>, vector<8x128xf32> -> vector<8x128xf32>
    %124 = arith.addf %121, %123 : vector<8x128xf32>
    %125 = math.tanh %124 : vector<8x128xf32>
    %126 = arith.mulf %119, %125 : vector<8x128xf32>
    %c2_83 = arith.constant 2 : index
    %c0_84 = arith.constant 0 : index
    %c128_85 = arith.constant 128 : index
    %127 = vector.load %arg7[%c2_83, %c0_84, %c128_85] : memref<8x8x512xf32, #tpu.memory_space<vmem>>, vector<1x8x128xf32>
    %128 = vector.shape_cast %127 : vector<1x8x128xf32> to vector<8x128xf32>
    %c0_86 = arith.constant 0 : index
    %c128_87 = arith.constant 128 : index
    %129 = vector.load %arg4[%c0_86, %c128_87] : memref<128x512xbf16, #tpu.memory_space<vmem>>, vector<128x128xbf16>
    %cst_88 = arith.constant dense<0.000000e+00> : vector<8x128xf32>
    %130 = tpu.matmul %109, %129, %cst_88 {dimension_numbers = #tpu.dot_dimension_numbers<[1], [0], [0], [1], [0, 0, 1, 1], [], []>} : vector<8x128xbf16>, vector<128x128xbf16>, vector<8x128xf32> -> vector<8x128xf32>
    %131 = arith.addf %128, %130 : vector<8x128xf32>
    %132 = arith.negf %131 : vector<8x128xf32>
    %133 = math.exp %132 : vector<8x128xf32>
    %cst_89 = arith.constant 1.000000e+00 : f32
    %134 = vector.broadcast %cst_89 : f32 to vector<8x128xf32>
    %135 = arith.addf %134, %133 : vector<8x128xf32>
    %136 = arith.divf %134, %135 : vector<8x128xf32>
    %137 = arith.mulf %136, %93 : vector<8x128xf32>
    %138 = arith.addf %137, %126 : vector<8x128xf32>
    %c2_90 = arith.constant 2 : index
    %c0_91 = arith.constant 0 : index
    %c384_92 = arith.constant 384 : index
    %139 = vector.load %arg7[%c2_90, %c0_91, %c384_92] : memref<8x8x512xf32, #tpu.memory_space<vmem>>, vector<1x8x128xf32>
    %140 = vector.shape_cast %139 : vector<1x8x128xf32> to vector<8x128xf32>
    %c0_93 = arith.constant 0 : index
    %c384_94 = arith.constant 384 : index
    %141 = vector.load %arg4[%c0_93, %c384_94] : memref<128x512xbf16, #tpu.memory_space<vmem>>, vector<128x128xbf16>
    %cst_95 = arith.constant dense<0.000000e+00> : vector<8x128xf32>
    %142 = tpu.matmul %109, %141, %cst_95 {dimension_numbers = #tpu.dot_dimension_numbers<[1], [0], [0], [1], [0, 0, 1, 1], [], []>} : vector<8x128xbf16>, vector<128x128xbf16>, vector<8x128xf32> -> vector<8x128xf32>
    %143 = arith.addf %140, %142 : vector<8x128xf32>
    %144 = arith.negf %143 : vector<8x128xf32>
    %145 = math.exp %144 : vector<8x128xf32>
    %cst_96 = arith.constant 1.000000e+00 : f32
    %146 = vector.broadcast %cst_96 : f32 to vector<8x128xf32>
    %147 = arith.addf %146, %145 : vector<8x128xf32>
    %148 = arith.divf %146, %147 : vector<8x128xf32>
    %149 = math.tanh %138 : vector<8x128xf32>
    %150 = arith.mulf %148, %149 : vector<8x128xf32>
    %c2_97 = arith.constant 2 : index
    %c0_98 = arith.constant 0 : index
    %c0_99 = arith.constant 0 : index
    %151 = vector.load %arg8[%c2_97, %c0_98, %c0_99] : memref<8x8x128xf32, #tpu.memory_space<vmem>>, vector<1x8x128xf32>
    %152 = vector.shape_cast %151 : vector<1x8x128xf32> to vector<8x128xf32>
    %153 = vector.shape_cast %150 : vector<8x128xf32> to vector<1x8x128xf32>
    tpu.vector_store %arg8[%c2_97, %c0_98, %c0_99], %153 {strides = array<i32>} : memref<8x8x128xf32, #tpu.memory_space<vmem>>, vector<1x8x128xf32>,
    %154 = arith.truncf %150 : vector<8x128xf32> to vector<8x128xbf16>
    %c3 = arith.constant 3 : index
    %c0_100 = arith.constant 0 : index
    %c0_101 = arith.constant 0 : index
    %155 = vector.load %arg7[%c3, %c0_100, %c0_101] : memref<8x8x512xf32, #tpu.memory_space<vmem>>, vector<1x8x128xf32>
    %156 = vector.shape_cast %155 : vector<1x8x128xf32> to vector<8x128xf32>
    %c0_102 = arith.constant 0 : index
    %c0_103 = arith.constant 0 : index
    %157 = vector.load %arg4[%c0_102, %c0_103] : memref<128x512xbf16, #tpu.memory_space<vmem>>, vector<128x128xbf16>
    %cst_104 = arith.constant dense<0.000000e+00> : vector<8x128xf32>
    %158 = tpu.matmul %154, %157, %cst_104 {dimension_numbers = #tpu.dot_dimension_numbers<[1], [0], [0], [1], [0, 0, 1, 1], [], []>} : vector<8x128xbf16>, vector<128x128xbf16>, vector<8x128xf32> -> vector<8x128xf32>
    %159 = arith.addf %156, %158 : vector<8x128xf32>
    %160 = arith.negf %159 : vector<8x128xf32>
    %161 = math.exp %160 : vector<8x128xf32>
    %cst_105 = arith.constant 1.000000e+00 : f32
    %162 = vector.broadcast %cst_105 : f32 to vector<8x128xf32>
    %163 = arith.addf %162, %161 : vector<8x128xf32>
    %164 = arith.divf %162, %163 : vector<8x128xf32>
    %c3_106 = arith.constant 3 : index
    %c0_107 = arith.constant 0 : index
    %c256_108 = arith.constant 256 : index
    %165 = vector.load %arg7[%c3_106, %c0_107, %c256_108] : memref<8x8x512xf32, #tpu.memory_space<vmem>>, vector<1x8x128xf32>
    %166 = vector.shape_cast %165 : vector<1x8x128xf32> to vector<8x128xf32>
    %c0_109 = arith.constant 0 : index
    %c256_110 = arith.constant 256 : index
    %167 = vector.load %arg4[%c0_109, %c256_110] : memref<128x512xbf16, #tpu.memory_space<vmem>>, vector<128x128xbf16>
    %cst_111 = arith.constant dense<0.000000e+00> : vector<8x128xf32>
    %168 = tpu.matmul %154, %167, %cst_111 {dimension_numbers = #tpu.dot_dimension_numbers<[1], [0], [0], [1], [0, 0, 1, 1], [], []>} : vector<8x128xbf16>, vector<128x128xbf16>, vector<8x128xf32> -> vector<8x128xf32>
    %169 = arith.addf %166, %168 : vector<8x128xf32>
    %170 = math.tanh %169 : vector<8x128xf32>
    %171 = arith.mulf %164, %170 : vector<8x128xf32>
    %c3_112 = arith.constant 3 : index
    %c0_113 = arith.constant 0 : index
    %c128_114 = arith.constant 128 : index
    %172 = vector.load %arg7[%c3_112, %c0_113, %c128_114] : memref<8x8x512xf32, #tpu.memory_space<vmem>>, vector<1x8x128xf32>
    %173 = vector.shape_cast %172 : vector<1x8x128xf32> to vector<8x128xf32>
    %c0_115 = arith.constant 0 : index
    %c128_116 = arith.constant 128 : index
    %174 = vector.load %arg4[%c0_115, %c128_116] : memref<128x512xbf16, #tpu.memory_space<vmem>>, vector<128x128xbf16>
    %cst_117 = arith.constant dense<0.000000e+00> : vector<8x128xf32>
    %175 = tpu.matmul %154, %174, %cst_117 {dimension_numbers = #tpu.dot_dimension_numbers<[1], [0], [0], [1], [0, 0, 1, 1], [], []>} : vector<8x128xbf16>, vector<128x128xbf16>, vector<8x128xf32> -> vector<8x128xf32>
    %176 = arith.addf %173, %175 : vector<8x128xf32>
    %177 = arith.negf %176 : vector<8x128xf32>
    %178 = math.exp %177 : vector<8x128xf32>
    %cst_118 = arith.constant 1.000000e+00 : f32
    %179 = vector.broadcast %cst_118 : f32 to vector<8x128xf32>
    %180 = arith.addf %179, %178 : vector<8x128xf32>
    %181 = arith.divf %179, %180 : vector<8x128xf32>
    %182 = arith.mulf %181, %138 : vector<8x128xf32>
    %183 = arith.addf %182, %171 : vector<8x128xf32>
    %c3_119 = arith.constant 3 : index
    %c0_120 = arith.constant 0 : index
    %c384_121 = arith.constant 384 : index
    %184 = vector.load %arg7[%c3_119, %c0_120, %c384_121] : memref<8x8x512xf32, #tpu.memory_space<vmem>>, vector<1x8x128xf32>
    %185 = vector.shape_cast %184 : vector<1x8x128xf32> to vector<8x128xf32>
    %c0_122 = arith.constant 0 : index
    %c384_123 = arith.constant 384 : index
    %186 = vector.load %arg4[%c0_122, %c384_123] : memref<128x512xbf16, #tpu.memory_space<vmem>>, vector<128x128xbf16>
    %cst_124 = arith.constant dense<0.000000e+00> : vector<8x128xf32>
    %187 = tpu.matmul %154, %186, %cst_124 {dimension_numbers = #tpu.dot_dimension_numbers<[1], [0], [0], [1], [0, 0, 1, 1], [], []>} : vector<8x128xbf16>, vector<128x128xbf16>, vector<8x128xf32> -> vector<8x128xf32>
    %188 = arith.addf %185, %187 : vector<8x128xf32>
    %189 = arith.negf %188 : vector<8x128xf32>
    %190 = math.exp %189 : vector<8x128xf32>
    %cst_125 = arith.constant 1.000000e+00 : f32
    %191 = vector.broadcast %cst_125 : f32 to vector<8x128xf32>
    %192 = arith.addf %191, %190 : vector<8x128xf32>
    %193 = arith.divf %191, %192 : vector<8x128xf32>
    %194 = math.tanh %183 : vector<8x128xf32>
    %195 = arith.mulf %193, %194 : vector<8x128xf32>
    %c3_126 = arith.constant 3 : index
    %c0_127 = arith.constant 0 : index
    %c0_128 = arith.constant 0 : index
    %196 = vector.load %arg8[%c3_126, %c0_127, %c0_128] : memref<8x8x128xf32, #tpu.memory_space<vmem>>, vector<1x8x128xf32>
    %197 = vector.shape_cast %196 : vector<1x8x128xf32> to vector<8x128xf32>
    %198 = vector.shape_cast %195 : vector<8x128xf32> to vector<1x8x128xf32>
    tpu.vector_store %arg8[%c3_126, %c0_127, %c0_128], %198 {strides = array<i32>} : memref<8x8x128xf32, #tpu.memory_space<vmem>>, vector<1x8x128xf32>,
    %199 = arith.truncf %195 : vector<8x128xf32> to vector<8x128xbf16>
    %c4 = arith.constant 4 : index
    %c0_129 = arith.constant 0 : index
    %c0_130 = arith.constant 0 : index
    %200 = vector.load %arg7[%c4, %c0_129, %c0_130] : memref<8x8x512xf32, #tpu.memory_space<vmem>>, vector<1x8x128xf32>
    %201 = vector.shape_cast %200 : vector<1x8x128xf32> to vector<8x128xf32>
    %c0_131 = arith.constant 0 : index
    %c0_132 = arith.constant 0 : index
    %202 = vector.load %arg4[%c0_131, %c0_132] : memref<128x512xbf16, #tpu.memory_space<vmem>>, vector<128x128xbf16>
    %cst_133 = arith.constant dense<0.000000e+00> : vector<8x128xf32>
    %203 = tpu.matmul %199, %202, %cst_133 {dimension_numbers = #tpu.dot_dimension_numbers<[1], [0], [0], [1], [0, 0, 1, 1], [], []>} : vector<8x128xbf16>, vector<128x128xbf16>, vector<8x128xf32> -> vector<8x128xf32>
    %204 = arith.addf %201, %203 : vector<8x128xf32>
    %205 = arith.negf %204 : vector<8x128xf32>
    %206 = math.exp %205 : vector<8x128xf32>
    %cst_134 = arith.constant 1.000000e+00 : f32
    %207 = vector.broadcast %cst_134 : f32 to vector<8x128xf32>
    %208 = arith.addf %207, %206 : vector<8x128xf32>
    %209 = arith.divf %207, %208 : vector<8x128xf32>
    %c4_135 = arith.constant 4 : index
    %c0_136 = arith.constant 0 : index
    %c256_137 = arith.constant 256 : index
    %210 = vector.load %arg7[%c4_135, %c0_136, %c256_137] : memref<8x8x512xf32, #tpu.memory_space<vmem>>, vector<1x8x128xf32>
    %211 = vector.shape_cast %210 : vector<1x8x128xf32> to vector<8x128xf32>
    %c0_138 = arith.constant 0 : index
    %c256_139 = arith.constant 256 : index
    %212 = vector.load %arg4[%c0_138, %c256_139] : memref<128x512xbf16, #tpu.memory_space<vmem>>, vector<128x128xbf16>
    %cst_140 = arith.constant dense<0.000000e+00> : vector<8x128xf32>
    %213 = tpu.matmul %199, %212, %cst_140 {dimension_numbers = #tpu.dot_dimension_numbers<[1], [0], [0], [1], [0, 0, 1, 1], [], []>} : vector<8x128xbf16>, vector<128x128xbf16>, vector<8x128xf32> -> vector<8x128xf32>
    %214 = arith.addf %211, %213 : vector<8x128xf32>
    %215 = math.tanh %214 : vector<8x128xf32>
    %216 = arith.mulf %209, %215 : vector<8x128xf32>
    %c4_141 = arith.constant 4 : index
    %c0_142 = arith.constant 0 : index
    %c128_143 = arith.constant 128 : index
    %217 = vector.load %arg7[%c4_141, %c0_142, %c128_143] : memref<8x8x512xf32, #tpu.memory_space<vmem>>, vector<1x8x128xf32>
    %218 = vector.shape_cast %217 : vector<1x8x128xf32> to vector<8x128xf32>
    %c0_144 = arith.constant 0 : index
    %c128_145 = arith.constant 128 : index
    %219 = vector.load %arg4[%c0_144, %c128_145] : memref<128x512xbf16, #tpu.memory_space<vmem>>, vector<128x128xbf16>
    %cst_146 = arith.constant dense<0.000000e+00> : vector<8x128xf32>
    %220 = tpu.matmul %199, %219, %cst_146 {dimension_numbers = #tpu.dot_dimension_numbers<[1], [0], [0], [1], [0, 0, 1, 1], [], []>} : vector<8x128xbf16>, vector<128x128xbf16>, vector<8x128xf32> -> vector<8x128xf32>
    %221 = arith.addf %218, %220 : vector<8x128xf32>
    %222 = arith.negf %221 : vector<8x128xf32>
    %223 = math.exp %222 : vector<8x128xf32>
    %cst_147 = arith.constant 1.000000e+00 : f32
    %224 = vector.broadcast %cst_147 : f32 to vector<8x128xf32>
    %225 = arith.addf %224, %223 : vector<8x128xf32>
    %226 = arith.divf %224, %225 : vector<8x128xf32>
    %227 = arith.mulf %226, %183 : vector<8x128xf32>
    %228 = arith.addf %227, %216 : vector<8x128xf32>
    %c4_148 = arith.constant 4 : index
    %c0_149 = arith.constant 0 : index
    %c384_150 = arith.constant 384 : index
    %229 = vector.load %arg7[%c4_148, %c0_149, %c384_150] : memref<8x8x512xf32, #tpu.memory_space<vmem>>, vector<1x8x128xf32>
    %230 = vector.shape_cast %229 : vector<1x8x128xf32> to vector<8x128xf32>
    %c0_151 = arith.constant 0 : index
    %c384_152 = arith.constant 384 : index
    %231 = vector.load %arg4[%c0_151, %c384_152] : memref<128x512xbf16, #tpu.memory_space<vmem>>, vector<128x128xbf16>
    %cst_153 = arith.constant dense<0.000000e+00> : vector<8x128xf32>
    %232 = tpu.matmul %199, %231, %cst_153 {dimension_numbers = #tpu.dot_dimension_numbers<[1], [0], [0], [1], [0, 0, 1, 1], [], []>} : vector<8x128xbf16>, vector<128x128xbf16>, vector<8x128xf32> -> vector<8x128xf32>
    %233 = arith.addf %230, %232 : vector<8x128xf32>
    %234 = arith.negf %233 : vector<8x128xf32>
    %235 = math.exp %234 : vector<8x128xf32>
    %cst_154 = arith.constant 1.000000e+00 : f32
    %236 = vector.broadcast %cst_154 : f32 to vector<8x128xf32>
    %237 = arith.addf %236, %235 : vector<8x128xf32>
    %238 = arith.divf %236, %237 : vector<8x128xf32>
    %239 = math.tanh %228 : vector<8x128xf32>
    %240 = arith.mulf %238, %239 : vector<8x128xf32>
    %c4_155 = arith.constant 4 : index
    %c0_156 = arith.constant 0 : index
    %c0_157 = arith.constant 0 : index
    %241 = vector.load %arg8[%c4_155, %c0_156, %c0_157] : memref<8x8x128xf32, #tpu.memory_space<vmem>>, vector<1x8x128xf32>
    %242 = vector.shape_cast %241 : vector<1x8x128xf32> to vector<8x128xf32>
    %243 = vector.shape_cast %240 : vector<8x128xf32> to vector<1x8x128xf32>
    tpu.vector_store %arg8[%c4_155, %c0_156, %c0_157], %243 {strides = array<i32>} : memref<8x8x128xf32, #tpu.memory_space<vmem>>, vector<1x8x128xf32>,
    %244 = arith.truncf %240 : vector<8x128xf32> to vector<8x128xbf16>
    %c5 = arith.constant 5 : index
    %c0_158 = arith.constant 0 : index
    %c0_159 = arith.constant 0 : index
    %245 = vector.load %arg7[%c5, %c0_158, %c0_159] : memref<8x8x512xf32, #tpu.memory_space<vmem>>, vector<1x8x128xf32>
    %246 = vector.shape_cast %245 : vector<1x8x128xf32> to vector<8x128xf32>
    %c0_160 = arith.constant 0 : index
    %c0_161 = arith.constant 0 : index
    %247 = vector.load %arg4[%c0_160, %c0_161] : memref<128x512xbf16, #tpu.memory_space<vmem>>, vector<128x128xbf16>
    %cst_162 = arith.constant dense<0.000000e+00> : vector<8x128xf32>
    %248 = tpu.matmul %244, %247, %cst_162 {dimension_numbers = #tpu.dot_dimension_numbers<[1], [0], [0], [1], [0, 0, 1, 1], [], []>} : vector<8x128xbf16>, vector<128x128xbf16>, vector<8x128xf32> -> vector<8x128xf32>
    %249 = arith.addf %246, %248 : vector<8x128xf32>
    %250 = arith.negf %249 : vector<8x128xf32>
    %251 = math.exp %250 : vector<8x128xf32>
    %cst_163 = arith.constant 1.000000e+00 : f32
    %252 = vector.broadcast %cst_163 : f32 to vector<8x128xf32>
    %253 = arith.addf %252, %251 : vector<8x128xf32>
    %254 = arith.divf %252, %253 : vector<8x128xf32>
    %c5_164 = arith.constant 5 : index
    %c0_165 = arith.constant 0 : index
    %c256_166 = arith.constant 256 : index
    %255 = vector.load %arg7[%c5_164, %c0_165, %c256_166] : memref<8x8x512xf32, #tpu.memory_space<vmem>>, vector<1x8x128xf32>
    %256 = vector.shape_cast %255 : vector<1x8x128xf32> to vector<8x128xf32>
    %c0_167 = arith.constant 0 : index
    %c256_168 = arith.constant 256 : index
    %257 = vector.load %arg4[%c0_167, %c256_168] : memref<128x512xbf16, #tpu.memory_space<vmem>>, vector<128x128xbf16>
    %cst_169 = arith.constant dense<0.000000e+00> : vector<8x128xf32>
    %258 = tpu.matmul %244, %257, %cst_169 {dimension_numbers = #tpu.dot_dimension_numbers<[1], [0], [0], [1], [0, 0, 1, 1], [], []>} : vector<8x128xbf16>, vector<128x128xbf16>, vector<8x128xf32> -> vector<8x128xf32>
    %259 = arith.addf %256, %258 : vector<8x128xf32>
    %260 = math.tanh %259 : vector<8x128xf32>
    %261 = arith.mulf %254, %260 : vector<8x128xf32>
    %c5_170 = arith.constant 5 : index
    %c0_171 = arith.constant 0 : index
    %c128_172 = arith.constant 128 : index
    %262 = vector.load %arg7[%c5_170, %c0_171, %c128_172] : memref<8x8x512xf32, #tpu.memory_space<vmem>>, vector<1x8x128xf32>
    %263 = vector.shape_cast %262 : vector<1x8x128xf32> to vector<8x128xf32>
    %c0_173 = arith.constant 0 : index
    %c128_174 = arith.constant 128 : index
    %264 = vector.load %arg4[%c0_173, %c128_174] : memref<128x512xbf16, #tpu.memory_space<vmem>>, vector<128x128xbf16>
    %cst_175 = arith.constant dense<0.000000e+00> : vector<8x128xf32>
    %265 = tpu.matmul %244, %264, %cst_175 {dimension_numbers = #tpu.dot_dimension_numbers<[1], [0], [0], [1], [0, 0, 1, 1], [], []>} : vector<8x128xbf16>, vector<128x128xbf16>, vector<8x128xf32> -> vector<8x128xf32>
    %266 = arith.addf %263, %265 : vector<8x128xf32>
    %267 = arith.negf %266 : vector<8x128xf32>
    %268 = math.exp %267 : vector<8x128xf32>
    %cst_176 = arith.constant 1.000000e+00 : f32
    %269 = vector.broadcast %cst_176 : f32 to vector<8x128xf32>
    %270 = arith.addf %269, %268 : vector<8x128xf32>
    %271 = arith.divf %269, %270 : vector<8x128xf32>
    %272 = arith.mulf %271, %228 : vector<8x128xf32>
    %273 = arith.addf %272, %261 : vector<8x128xf32>
    %c5_177 = arith.constant 5 : index
    %c0_178 = arith.constant 0 : index
    %c384_179 = arith.constant 384 : index
    %274 = vector.load %arg7[%c5_177, %c0_178, %c384_179] : memref<8x8x512xf32, #tpu.memory_space<vmem>>, vector<1x8x128xf32>
    %275 = vector.shape_cast %274 : vector<1x8x128xf32> to vector<8x128xf32>
    %c0_180 = arith.constant 0 : index
    %c384_181 = arith.constant 384 : index
    %276 = vector.load %arg4[%c0_180, %c384_181] : memref<128x512xbf16, #tpu.memory_space<vmem>>, vector<128x128xbf16>
    %cst_182 = arith.constant dense<0.000000e+00> : vector<8x128xf32>
    %277 = tpu.matmul %244, %276, %cst_182 {dimension_numbers = #tpu.dot_dimension_numbers<[1], [0], [0], [1], [0, 0, 1, 1], [], []>} : vector<8x128xbf16>, vector<128x128xbf16>, vector<8x128xf32> -> vector<8x128xf32>
    %278 = arith.addf %275, %277 : vector<8x128xf32>
    %279 = arith.negf %278 : vector<8x128xf32>
    %280 = math.exp %279 : vector<8x128xf32>
    %cst_183 = arith.constant 1.000000e+00 : f32
    %281 = vector.broadcast %cst_183 : f32 to vector<8x128xf32>
    %282 = arith.addf %281, %280 : vector<8x128xf32>
    %283 = arith.divf %281, %282 : vector<8x128xf32>
    %284 = math.tanh %273 : vector<8x128xf32>
    %285 = arith.mulf %283, %284 : vector<8x128xf32>
    %c5_184 = arith.constant 5 : index
    %c0_185 = arith.constant 0 : index
    %c0_186 = arith.constant 0 : index
    %286 = vector.load %arg8[%c5_184, %c0_185, %c0_186] : memref<8x8x128xf32, #tpu.memory_space<vmem>>, vector<1x8x128xf32>
    %287 = vector.shape_cast %286 : vector<1x8x128xf32> to vector<8x128xf32>
    %288 = vector.shape_cast %285 : vector<8x128xf32> to vector<1x8x128xf32>
    tpu.vector_store %arg8[%c5_184, %c0_185, %c0_186], %288 {strides = array<i32>} : memref<8x8x128xf32, #tpu.memory_space<vmem>>, vector<1x8x128xf32>,
    %289 = arith.truncf %285 : vector<8x128xf32> to vector<8x128xbf16>
    %c6 = arith.constant 6 : index
    %c0_187 = arith.constant 0 : index
    %c0_188 = arith.constant 0 : index
    %290 = vector.load %arg7[%c6, %c0_187, %c0_188] : memref<8x8x512xf32, #tpu.memory_space<vmem>>, vector<1x8x128xf32>
    %291 = vector.shape_cast %290 : vector<1x8x128xf32> to vector<8x128xf32>
    %c0_189 = arith.constant 0 : index
    %c0_190 = arith.constant 0 : index
    %292 = vector.load %arg4[%c0_189, %c0_190] : memref<128x512xbf16, #tpu.memory_space<vmem>>, vector<128x128xbf16>
    %cst_191 = arith.constant dense<0.000000e+00> : vector<8x128xf32>
    %293 = tpu.matmul %289, %292, %cst_191 {dimension_numbers = #tpu.dot_dimension_numbers<[1], [0], [0], [1], [0, 0, 1, 1], [], []>} : vector<8x128xbf16>, vector<128x128xbf16>, vector<8x128xf32> -> vector<8x128xf32>
    %294 = arith.addf %291, %293 : vector<8x128xf32>
    %295 = arith.negf %294 : vector<8x128xf32>
    %296 = math.exp %295 : vector<8x128xf32>
    %cst_192 = arith.constant 1.000000e+00 : f32
    %297 = vector.broadcast %cst_192 : f32 to vector<8x128xf32>
    %298 = arith.addf %297, %296 : vector<8x128xf32>
    %299 = arith.divf %297, %298 : vector<8x128xf32>
    %c6_193 = arith.constant 6 : index
    %c0_194 = arith.constant 0 : index
    %c256_195 = arith.constant 256 : index
    %300 = vector.load %arg7[%c6_193, %c0_194, %c256_195] : memref<8x8x512xf32, #tpu.memory_space<vmem>>, vector<1x8x128xf32>
    %301 = vector.shape_cast %300 : vector<1x8x128xf32> to vector<8x128xf32>
    %c0_196 = arith.constant 0 : index
    %c256_197 = arith.constant 256 : index
    %302 = vector.load %arg4[%c0_196, %c256_197] : memref<128x512xbf16, #tpu.memory_space<vmem>>, vector<128x128xbf16>
    %cst_198 = arith.constant dense<0.000000e+00> : vector<8x128xf32>
    %303 = tpu.matmul %289, %302, %cst_198 {dimension_numbers = #tpu.dot_dimension_numbers<[1], [0], [0], [1], [0, 0, 1, 1], [], []>} : vector<8x128xbf16>, vector<128x128xbf16>, vector<8x128xf32> -> vector<8x128xf32>
    %304 = arith.addf %301, %303 : vector<8x128xf32>
    %305 = math.tanh %304 : vector<8x128xf32>
    %306 = arith.mulf %299, %305 : vector<8x128xf32>
    %c6_199 = arith.constant 6 : index
    %c0_200 = arith.constant 0 : index
    %c128_201 = arith.constant 128 : index
    %307 = vector.load %arg7[%c6_199, %c0_200, %c128_201] : memref<8x8x512xf32, #tpu.memory_space<vmem>>, vector<1x8x128xf32>
    %308 = vector.shape_cast %307 : vector<1x8x128xf32> to vector<8x128xf32>
    %c0_202 = arith.constant 0 : index
    %c128_203 = arith.constant 128 : index
    %309 = vector.load %arg4[%c0_202, %c128_203] : memref<128x512xbf16, #tpu.memory_space<vmem>>, vector<128x128xbf16>
    %cst_204 = arith.constant dense<0.000000e+00> : vector<8x128xf32>
    %310 = tpu.matmul %289, %309, %cst_204 {dimension_numbers = #tpu.dot_dimension_numbers<[1], [0], [0], [1], [0, 0, 1, 1], [], []>} : vector<8x128xbf16>, vector<128x128xbf16>, vector<8x128xf32> -> vector<8x128xf32>
    %311 = arith.addf %308, %310 : vector<8x128xf32>
    %312 = arith.negf %311 : vector<8x128xf32>
    %313 = math.exp %312 : vector<8x128xf32>
    %cst_205 = arith.constant 1.000000e+00 : f32
    %314 = vector.broadcast %cst_205 : f32 to vector<8x128xf32>
    %315 = arith.addf %314, %313 : vector<8x128xf32>
    %316 = arith.divf %314, %315 : vector<8x128xf32>
    %317 = arith.mulf %316, %273 : vector<8x128xf32>
    %318 = arith.addf %317, %306 : vector<8x128xf32>
    %c6_206 = arith.constant 6 : index
    %c0_207 = arith.constant 0 : index
    %c384_208 = arith.constant 384 : index
    %319 = vector.load %arg7[%c6_206, %c0_207, %c384_208] : memref<8x8x512xf32, #tpu.memory_space<vmem>>, vector<1x8x128xf32>
    %320 = vector.shape_cast %319 : vector<1x8x128xf32> to vector<8x128xf32>
    %c0_209 = arith.constant 0 : index
    %c384_210 = arith.constant 384 : index
    %321 = vector.load %arg4[%c0_209, %c384_210] : memref<128x512xbf16, #tpu.memory_space<vmem>>, vector<128x128xbf16>
    %cst_211 = arith.constant dense<0.000000e+00> : vector<8x128xf32>
    %322 = tpu.matmul %289, %321, %cst_211 {dimension_numbers = #tpu.dot_dimension_numbers<[1], [0], [0], [1], [0, 0, 1, 1], [], []>} : vector<8x128xbf16>, vector<128x128xbf16>, vector<8x128xf32> -> vector<8x128xf32>
    %323 = arith.addf %320, %322 : vector<8x128xf32>
    %324 = arith.negf %323 : vector<8x128xf32>
    %325 = math.exp %324 : vector<8x128xf32>
    %cst_212 = arith.constant 1.000000e+00 : f32
    %326 = vector.broadcast %cst_212 : f32 to vector<8x128xf32>
    %327 = arith.addf %326, %325 : vector<8x128xf32>
    %328 = arith.divf %326, %327 : vector<8x128xf32>
    %329 = math.tanh %318 : vector<8x128xf32>
    %330 = arith.mulf %328, %329 : vector<8x128xf32>
    %c6_213 = arith.constant 6 : index
    %c0_214 = arith.constant 0 : index
    %c0_215 = arith.constant 0 : index
    %331 = vector.load %arg8[%c6_213, %c0_214, %c0_215] : memref<8x8x128xf32, #tpu.memory_space<vmem>>, vector<1x8x128xf32>
    %332 = vector.shape_cast %331 : vector<1x8x128xf32> to vector<8x128xf32>
    %333 = vector.shape_cast %330 : vector<8x128xf32> to vector<1x8x128xf32>
    tpu.vector_store %arg8[%c6_213, %c0_214, %c0_215], %333 {strides = array<i32>} : memref<8x8x128xf32, #tpu.memory_space<vmem>>, vector<1x8x128xf32>,
    %334 = arith.truncf %330 : vector<8x128xf32> to vector<8x128xbf16>
    %c7 = arith.constant 7 : index
    %c0_216 = arith.constant 0 : index
    %c0_217 = arith.constant 0 : index
    %335 = vector.load %arg7[%c7, %c0_216, %c0_217] : memref<8x8x512xf32, #tpu.memory_space<vmem>>, vector<1x8x128xf32>
    %336 = vector.shape_cast %335 : vector<1x8x128xf32> to vector<8x128xf32>
    %c0_218 = arith.constant 0 : index
    %c0_219 = arith.constant 0 : index
    %337 = vector.load %arg4[%c0_218, %c0_219] : memref<128x512xbf16, #tpu.memory_space<vmem>>, vector<128x128xbf16>
    %cst_220 = arith.constant dense<0.000000e+00> : vector<8x128xf32>
    %338 = tpu.matmul %334, %337, %cst_220 {dimension_numbers = #tpu.dot_dimension_numbers<[1], [0], [0], [1], [0, 0, 1, 1], [], []>} : vector<8x128xbf16>, vector<128x128xbf16>, vector<8x128xf32> -> vector<8x128xf32>
    %339 = arith.addf %336, %338 : vector<8x128xf32>
    %340 = arith.negf %339 : vector<8x128xf32>
    %341 = math.exp %340 : vector<8x128xf32>
    %cst_221 = arith.constant 1.000000e+00 : f32
    %342 = vector.broadcast %cst_221 : f32 to vector<8x128xf32>
    %343 = arith.addf %342, %341 : vector<8x128xf32>
    %344 = arith.divf %342, %343 : vector<8x128xf32>
    %c7_222 = arith.constant 7 : index
    %c0_223 = arith.constant 0 : index
    %c256_224 = arith.constant 256 : index
    %345 = vector.load %arg7[%c7_222, %c0_223, %c256_224] : memref<8x8x512xf32, #tpu.memory_space<vmem>>, vector<1x8x128xf32>
    %346 = vector.shape_cast %345 : vector<1x8x128xf32> to vector<8x128xf32>
    %c0_225 = arith.constant 0 : index
    %c256_226 = arith.constant 256 : index
    %347 = vector.load %arg4[%c0_225, %c256_226] : memref<128x512xbf16, #tpu.memory_space<vmem>>, vector<128x128xbf16>
    %cst_227 = arith.constant dense<0.000000e+00> : vector<8x128xf32>
    %348 = tpu.matmul %334, %347, %cst_227 {dimension_numbers = #tpu.dot_dimension_numbers<[1], [0], [0], [1], [0, 0, 1, 1], [], []>} : vector<8x128xbf16>, vector<128x128xbf16>, vector<8x128xf32> -> vector<8x128xf32>
    %349 = arith.addf %346, %348 : vector<8x128xf32>
    %350 = math.tanh %349 : vector<8x128xf32>
    %351 = arith.mulf %344, %350 : vector<8x128xf32>
    %c7_228 = arith.constant 7 : index
    %c0_229 = arith.constant 0 : index
    %c128_230 = arith.constant 128 : index
    %352 = vector.load %arg7[%c7_228, %c0_229, %c128_230] : memref<8x8x512xf32, #tpu.memory_space<vmem>>, vector<1x8x128xf32>
    %353 = vector.shape_cast %352 : vector<1x8x128xf32> to vector<8x128xf32>
    %c0_231 = arith.constant 0 : index
    %c128_232 = arith.constant 128 : index
    %354 = vector.load %arg4[%c0_231, %c128_232] : memref<128x512xbf16, #tpu.memory_space<vmem>>, vector<128x128xbf16>
    %cst_233 = arith.constant dense<0.000000e+00> : vector<8x128xf32>
    %355 = tpu.matmul %334, %354, %cst_233 {dimension_numbers = #tpu.dot_dimension_numbers<[1], [0], [0], [1], [0, 0, 1, 1], [], []>} : vector<8x128xbf16>, vector<128x128xbf16>, vector<8x128xf32> -> vector<8x128xf32>
    %356 = arith.addf %353, %355 : vector<8x128xf32>
    %357 = arith.negf %356 : vector<8x128xf32>
    %358 = math.exp %357 : vector<8x128xf32>
    %cst_234 = arith.constant 1.000000e+00 : f32
    %359 = vector.broadcast %cst_234 : f32 to vector<8x128xf32>
    %360 = arith.addf %359, %358 : vector<8x128xf32>
    %361 = arith.divf %359, %360 : vector<8x128xf32>
    %362 = arith.mulf %361, %318 : vector<8x128xf32>
    %363 = arith.addf %362, %351 : vector<8x128xf32>
    %c7_235 = arith.constant 7 : index
    %c0_236 = arith.constant 0 : index
    %c384_237 = arith.constant 384 : index
    %364 = vector.load %arg7[%c7_235, %c0_236, %c384_237] : memref<8x8x512xf32, #tpu.memory_space<vmem>>, vector<1x8x128xf32>
    %365 = vector.shape_cast %364 : vector<1x8x128xf32> to vector<8x128xf32>
    %c0_238 = arith.constant 0 : index
    %c384_239 = arith.constant 384 : index
    %366 = vector.load %arg4[%c0_238, %c384_239] : memref<128x512xbf16, #tpu.memory_space<vmem>>, vector<128x128xbf16>
    %cst_240 = arith.constant dense<0.000000e+00> : vector<8x128xf32>
    %367 = tpu.matmul %334, %366, %cst_240 {dimension_numbers = #tpu.dot_dimension_numbers<[1], [0], [0], [1], [0, 0, 1, 1], [], []>} : vector<8x128xbf16>, vector<128x128xbf16>, vector<8x128xf32> -> vector<8x128xf32>
    %368 = arith.addf %365, %367 : vector<8x128xf32>
    %369 = arith.negf %368 : vector<8x128xf32>
    %370 = math.exp %369 : vector<8x128xf32>
    %cst_241 = arith.constant 1.000000e+00 : f32
    %371 = vector.broadcast %cst_241 : f32 to vector<8x128xf32>
    %372 = arith.addf %371, %370 : vector<8x128xf32>
    %373 = arith.divf %371, %372 : vector<8x128xf32>
    %374 = math.tanh %363 : vector<8x128xf32>
    %375 = arith.mulf %373, %374 : vector<8x128xf32>
    %c7_242 = arith.constant 7 : index
    %c0_243 = arith.constant 0 : index
    %c0_244 = arith.constant 0 : index
    %376 = vector.load %arg8[%c7_242, %c0_243, %c0_244] : memref<8x8x128xf32, #tpu.memory_space<vmem>>, vector<1x8x128xf32>
    %377 = vector.shape_cast %376 : vector<1x8x128xf32> to vector<8x128xf32>
    %378 = vector.shape_cast %375 : vector<8x128xf32> to vector<1x8x128xf32>
    tpu.vector_store %arg8[%c7_242, %c0_243, %c0_244], %378 {strides = array<i32>} : memref<8x8x128xf32, #tpu.memory_space<vmem>>, vector<1x8x128xf32>,
    %c0_245 = arith.constant 0 : index
    %c0_246 = arith.constant 0 : index
    %379 = vector.load %arg9[%c0_245, %c0_246] : memref<8x128xf32, #tpu.memory_space<vmem>>, vector<8x128xf32>
    tpu.vector_store %arg9[%c0_245, %c0_246], %375 {strides = array<i32>} : memref<8x128xf32, #tpu.memory_space<vmem>>, vector<8x128xf32>,
    %c0_247 = arith.constant 0 : index
    %c0_248 = arith.constant 0 : index
    %380 = vector.load %arg10[%c0_247, %c0_248] : memref<8x128xf32, #tpu.memory_space<vmem>>, vector<8x128xf32>
    tpu.vector_store %arg10[%c0_247, %c0_248], %363 {strides = array<i32>} : memref<8x128xf32, #tpu.memory_space<vmem>>, vector<8x128xf32>,
    %c0_249 = arith.constant 0 : index
    %c0_250 = arith.constant 0 : index
    %c0_251 = arith.constant 0 : index
    %381 = vector.load %arg8[%c0_249, %c0_250, %c0_251] : memref<8x8x128xf32, #tpu.memory_space<vmem>>, vector<8x8x128xf32>
    %382 = tpu.transpose %381, [1, 0, 2] : vector<8x8x128xf32> -> vector<8x8x128xf32>
    %c0_252 = arith.constant 0 : index
    %c0_253 = arith.constant 0 : index
    %c0_254 = arith.constant 0 : index
    %383 = vector.load %arg6[%c0_252, %c0_253, %c0_254] : memref<8x8x128xf32, #tpu.memory_space<vmem>>, vector<8x8x128xf32>
    tpu.vector_store %arg6[%c0_252, %c0_253, %c0_254], %382 {strides = array<i32>} : memref<8x8x128xf32, #tpu.memory_space<vmem>>, vector<8x8x128xf32>,
    return
  }
  func.func @transform_0(%arg0: i32, %arg1: i32) -> (i32, i32, i32) {
    %c0_i32 = arith.constant 0 : i32
    %c0_i32_0 = arith.constant 0 : i32
    return %arg0, %arg1, %c0_i32 : i32, i32, i32
  }
  func.func @transform_1(%arg0: i32, %arg1: i32) -> (i32, i32) {
    %c0_i32 = arith.constant 0 : i32
    %c0_i32_0 = arith.constant 0 : i32
    %c0_i32_1 = arith.constant 0 : i32
    return %c0_i32, %c0_i32_0 : i32, i32
  }
  func.func @transform_2(%arg0: i32, %arg1: i32) -> (i32, i32) {
    %c0_i32 = arith.constant 0 : i32
    %c0_i32_0 = arith.constant 0 : i32
    %c0_i32_1 = arith.constant 0 : i32
    return %c0_i32, %c0_i32_0 : i32, i32
  }
  func.func @transform_3(%arg0: i32, %arg1: i32) -> (i32, i32) {
    %c0_i32 = arith.constant 0 : i32
    %c0_i32_0 = arith.constant 0 : i32
    %c0_i32_1 = arith.constant 0 : i32
    return %c0_i32, %c0_i32_0 : i32, i32
  }
  func.func @transform_4(%arg0: i32, %arg1: i32) -> (i32, i32, i32) {
    %c0_i32 = arith.constant 0 : i32
    %c0_i32_0 = arith.constant 0 : i32
    return %arg0, %arg1, %c0_i32 : i32, i32, i32
  }
}

</mosaic_0001>

<bundles_post_ra>
// kernel: lstm_forward.1
= control target key start
LH: loop header
LB: loop body
LE: loop exit
PB: predicated region body
PF: predicated region fallthrough
CT: control target
= control target key end

     0   :  { %vm48_vm0 = vcmask 1047556   ;;  %s7574_s1 = inlined_call_operand.vmem [shape: bf16[128,512], index: 1, kind: input, shape index: {}]   ;;  %s7575_s0 = inlined_call_operand.vmem [shape: bf16[8,8,128], index: 0, kind: input, shape index: {}]   ;;  %s7576_s2 = inlined_call_operand.vmem [shape: bf16[128,512], index: 2, kind: input, shape index: {}]   ;;  %s7577_s3 = inlined_call_operand.vmem [shape: f32[1,512], index: 3, kind: input, shape index: {}]   ;;  %s7578_s4 = inlined_call_operand.vmem [shape: f32[8,8,128], index: 4, kind: output, shape index: {}]  }
   0x1   :  { %v3826_v0 = vld [vmem:[%s7574_s1 + $0xe0] sm:$0xf]  ;;  %v4918_v1 = vld [vmem:[%s7574_s1 + $0xec] sm:$0xf0]  ;;  %v4916_v2 = vld [vmem:[%s7574_s1 + $0xe4] sm:$0xf] }
   0x2   :  { %v3827_v3 = vor.u32 %v4918_v1, %v3826_v0  ;;  %v3828_v4 = vld [vmem:[%s7574_s1 + $0xf0] sm:$0xf0]  ;;  %v3834_v5 = vld [vmem:[%s7574_s1 + $0xe8] sm:$0xf]  ;;  %v4919_v6 = vld [vmem:[%s7574_s1 + $0xf4] sm:$0xf0] }
   0x3   :  { %v3831_v7 = vor.u32 %v4916_v2, %v3828_v4  ;;  %v3835_v8 = vor.u32 %v4919_v6, %v3834_v5  ;;  %v4917_v9 = vld [vmem:[%s7574_s1 + $0xec] sm:$0xf]  ;;  %v3836_v10 = vld [vmem:[%s7574_s1 + $0xf8] sm:$0xf0]  ;;  %v3810_v11 = vld [vmem:[%s7574_s1 + $0xc0] sm:$0xf] }
   0x4   :  { %366 = vmatpush.bf16.msra.mxu0 %v3827_v3  ;;  %v3839_v12 = vor.u32 %v4917_v9, %v3836_v10  ;;  %v4914_v13 = vld [vmem:[%s7574_s1 + $0xcc] sm:$0xf0]  ;;  %v4912_v14 = vld [vmem:[%s7574_s1 + $0xc4] sm:$0xf]  ;;  %v3812_v15 = vld [vmem:[%s7574_s1 + $0xd0] sm:$0xf0] }
   0x5   :  { %395 = vmatpush.bf16.msra.mxu1 %v3831_v7  ;;  %424 = vmatpush.bf16.msra.mxu2 %v3835_v8  ;;  %v3811_v16 = vor.u32 %v4914_v13, %v3810_v11  ;;  %v3815_v17 = vor.u32 %v4912_v14, %v3812_v15  ;;  %v3818_v18 = vld [vmem:[%s7574_s1 + $0xc8] sm:$0xf]  ;;  %v4915_v19 = vld [vmem:[%s7574_s1 + $0xd4] sm:$0xf0]  ;;  %v4913_v20 = vld [vmem:[%s7574_s1 + $0xcc] sm:$0xf] }
   0x6   :  { %453 = vmatpush.bf16.msra.mxu3 %v3839_v12  ;;  %v3819_v21 = vor.u32 %v4915_v19, %v3818_v18  ;;  %v3820_v22 = vld [vmem:[%s7574_s1 + $0xd8] sm:$0xf0]  ;;  %v3794_v23 = vld [vmem:[%s7574_s1 + $0xa0] sm:$0xf]  ;;  %v4910_v24 = vld [vmem:[%s7574_s1 + $0xac] sm:$0xf0] }
   0x7   :  { %v3823_v25 = vor.u32 %v4913_v20, %v3820_v22  ;;  %v4908_v26 = vld [vmem:[%s7574_s1 + $0xa4] sm:$0xf]  ;;  %v3796_v27 = vld [vmem:[%s7574_s1 + $0xb0] sm:$0xf0]  ;;  %v3802_v28 = vld [vmem:[%s7574_s1 + $0xa8] sm:$0xf]  ;;  %v3795_v29 = vor.u32 %v4910_v24, %v3794_v23 }
   0x8   :  { %367 = vmatpush.bf16.msra.mxu0 %v3811_v16  ;;  %v4911_v30 = vld [vmem:[%s7574_s1 + $0xb4] sm:$0xf0]  ;;  %v4909_v31 = vld [vmem:[%s7574_s1 + $0xac] sm:$0xf]  ;;  %v3804_v32 = vld [vmem:[%s7574_s1 + $0xb8] sm:$0xf0]  ;;  %v3799_v33 = vor.u32 %v4908_v26, %v3796_v27 }
   0x9   :  { %396 = vmatpush.bf16.msra.mxu1 %v3815_v17  ;;  %425 = vmatpush.bf16.msra.mxu2 %v3819_v21  ;;  %v3803_v34 = vor.u32 %v4911_v30, %v3802_v28  ;;  %v3778_v35 = vld [vmem:[%s7574_s1 + $0x80] sm:$0xf]  ;;  %v4906_v36 = vld [vmem:[%s7574_s1 + $0x8c] sm:$0xf0]  ;;  %v4904_v37 = vld [vmem:[%s7574_s1 + $0x84] sm:$0xf]  ;;  %v3807_v38 = vor.u32 %v4909_v31, %v3804_v32 }
   0xa   :  { %454 = vmatpush.bf16.msra.mxu3 %v3823_v25  ;;  %v3780_v39 = vld [vmem:[%s7574_s1 + $0x90] sm:$0xf0]  ;;  %v3786_v40 = vld [vmem:[%s7574_s1 + $0x88] sm:$0xf]  ;;  %v4907_v41 = vld [vmem:[%s7574_s1 + $0x94] sm:$0xf0]  ;;  %v3779_v44 = vor.u32 %v4906_v36, %v3778_v35 }
   0xb   :  { %v4905_v42 = vld [vmem:[%s7574_s1 + $0x8c] sm:$0xf]  ;;  %v3788_v43 = vld [vmem:[%s7574_s1 + $0x98] sm:$0xf0]  ;;  %v3783_v45 = vor.u32 %v4904_v37, %v3780_v39  ;;  %v3787_v46 = vor.u32 %v4907_v41, %v3786_v40  ;;  %v3762_v47 = vld [vmem:[%s7574_s1 + $0x60] sm:$0xf] }
   0xc   :  { %368 = vmatpush.bf16.msra.mxu0 %v3795_v29  ;;  %v4902_v48 = vld [vmem:[%s7574_s1 + $0x6c] sm:$0xf0]  ;;  %v4900_v49 = vld [vmem:[%s7574_s1 + $0x64] sm:$0xf]  ;;  %v3791_v50 = vor.u32 %v4905_v42, %v3788_v43  ;;  %v3764_v51 = vld [vmem:[%s7574_s1 + $0x70] sm:$0xf0] }
   0xd   :  { %397 = vmatpush.bf16.msra.mxu1 %v3799_v33  ;;  %426 = vmatpush.bf16.msra.mxu2 %v3803_v34  ;;  %v3770_v52 = vld [vmem:[%s7574_s1 + $0x68] sm:$0xf]  ;;  %v4903_v53 = vld [vmem:[%s7574_s1 + $0x74] sm:$0xf0]  ;;  %v4901_v54 = vld [vmem:[%s7574_s1 + $0x6c] sm:$0xf]  ;;  %v3763_v56 = vor.u32 %v4902_v48, %v3762_v47  ;;  %v3767_v60 = vor.u32 %v4900_v49, %v3764_v51 }
   0xe   :  { %455 = vmatpush.bf16.msra.mxu3 %v3807_v38  ;;  %v3772_v55 = vld [vmem:[%s7574_s1 + $0x78] sm:$0xf0]  ;;  %v3746_v57 = vld [vmem:[%s7574_s1 + $0x40] sm:$0xf]  ;;  %v4898_v58 = vld [vmem:[%s7574_s1 + $0x4c] sm:$0xf0]  ;;  %v3771_v61 = vor.u32 %v4903_v53, %v3770_v52 }
   0xf   :  { %v4896_v59 = vld [vmem:[%s7574_s1 + $0x44] sm:$0xf]  ;;  %v3748_v62 = vld [vmem:[%s7574_s1 + $0x50] sm:$0xf0]  ;;  %v3754_v63 = vld [vmem:[%s7574_s1 + $0x48] sm:$0xf]  ;;  %v3775_v1 = vor.u32 %v4901_v54, %v3772_v55  ;;  %v3747_v8 = vor.u32 %v4898_v58, %v3746_v57 }
  0x10   :  { %369 = vmatpush.bf16.msra.mxu0 %v3779_v44  ;;  %v4899_v0 = vld [vmem:[%s7574_s1 + $0x54] sm:$0xf0]  ;;  %v4897_v2 = vld [vmem:[%s7574_s1 + $0x4c] sm:$0xf]  ;;  %v3756_v3 = vld [vmem:[%s7574_s1 + $0x58] sm:$0xf0]  ;;  %v3751_v11 = vor.u32 %v4896_v59, %v3748_v62 }
  0x11   :  { %398 = vmatpush.bf16.msra.mxu1 %v3783_v45  ;;  %427 = vmatpush.bf16.msra.mxu2 %v3787_v46  ;;  %v5501_v4 = vld [vmem:[%s7574_s1 + $0x20] sm:$0xf]  ;;  %v5506_v5 = vld [vmem:[%s7574_s1 + $0x2c] sm:$0xf0]  ;;  %v5511_v6 = vld [vmem:[%s7574_s1 + $0x24] sm:$0xf]  ;;  %v3755_v12 = vor.u32 %v4899_v0, %v3754_v63  ;;  %v3759_v16 = vor.u32 %v4897_v2, %v3756_v3 }
  0x12   :  { %456 = vmatpush.bf16.msra.mxu3 %v3791_v50  ;;  %v5516_v7 = vld [vmem:[%s7574_s1 + $0x30] sm:$0xf0]  ;;  %v5521_v9 = vld [vmem:[%s7574_s1 + $0x28] sm:$0xf]  ;;  %v5526_v10 = vld [vmem:[%s7574_s1 + $0x34] sm:$0xf0]  ;;  %v3731_v17 = vor.u32 %v5506_v5, %v5501_v4 }
  0x13   :  { %v5531_v13 = vld [vmem:[%s7574_s1 + $0x2c] sm:$0xf]  ;;  %v5326_v14 = vmov 1983009808   ;;  %v3735_v18 = vor.u32 %v5511_v6, %v5516_v7  ;;  %v3740_v19 = vld [vmem:[%s7574_s1 + $0x38] sm:$0xf0]  ;;  %v3739_v24 = vor.u32 %v5526_v10, %v5521_v9 }
  0x14   :  { %370 = vmatpush.bf16.msra.mxu0 %v3763_v56  ;;  %v53_v15 = vunpack.c.l.s4 %v5326_v14  ;;  %v5177_v20 = vld [vmem:[%s7575_s0] sm:$0xff]   ;;  %v5192_v21 = vld [vmem:[%s7575_s0 + $0x8] sm:$0xff]   ;;  %v5327_v22 = vmov 1934713408   ;;  %v5558_v26 = vld [vmem:[%s7574_s1 + $0xc] sm:$0xf0]  ;;  %v3743_v42 = vor.u32 %v5531_v13, %v3740_v19 }
  0x15   :  { %399 = vmatpush.bf16.msra.mxu1 %v3767_v60  ;;  %428 = vmatpush.bf16.msra.mxu2 %v3771_v61  ;;  %v5546_v23 = vunpack.c.l.s4 %v5327_v22  ;;  %v5553_v25 = vld [vmem:[%s7574_s1] sm:$0xf]  ;;  %v5563_v27 = vld [vmem:[%s7574_s1 + $0x4] sm:$0xf]  ;;  %v5568_v28 = vld [vmem:[%s7574_s1 + $0x10] sm:$0xf0]  ;;  %v5178_v29 = vunpack.c.l.bf16 %v5177_v20  ;;  %v5179_v30 = vunpack.c.h.bf16 %v5177_v20  ;;  %v5182_v31 = vunpack.c.l.bf16 %v5192_v21 }
  0x16   :  { %457 = vmatpush.bf16.msra.mxu3 %v3775_v1  ;;  %v5193_v32 = vld [vmem:[%s7575_s0 + $0x10] sm:$0xff]   ;;  %v5194_v33 = vld [vmem:[%s7575_s0 + $0x18] sm:$0xff]   ;;  %v3722_v34 = vld [vmem:[%s7574_s1 + $0x8] sm:$0xf]  ;;  %v5183_v38 = vunpack.c.h.bf16 %v5192_v21  ;;  %v5617_v56 = vunpack.c.0.s8 %v53_v15  ;;  %v3715_v58 = vor.u32 %v5558_v26, %v5553_v25  ;;  %v3719_v59 = vor.u32 %v5563_v27, %v5568_v28 }
  0x17   :  { %v4891_v35 = vld [vmem:[%s7574_s1 + $0x14] sm:$0xf0]  ;;  %v5585_v36 = vld [vmem:[%s7574_s1 + $0xc] sm:$0xf]  ;;  %v3724_v37 = vld [vmem:[%s7574_s1 + $0x18] sm:$0xf0]  ;;  %v5186_v39 = vunpack.c.l.bf16 %v5193_v32  ;;  %v5187_v40 = vunpack.c.h.bf16 %v5193_v32  ;;  %v5190_v41 = vunpack.c.l.bf16 %v5194_v33  ;;  %v5191_v43 = vunpack.c.h.bf16 %v5194_v33 }
  0x18   :  { %371 = vmatpush.bf16.msra.mxu0 %v3747_v8  ;;  %v5591_v44 = vmax.f32 %v5178_v29, 0.0  ;;  %v5593_v45 = vmax.f32 %v5182_v31, 0.0  ;;  %v3935_v46 = vld [vmem:[%s7576_s2 + $0xe4] sm:$0xf]  ;;  %v4943_v47 = vld [vmem:[%s7576_s2 + $0xf0] sm:$0xf0]  ;;  %v3723_v0 = vor.u32 %v4891_v35, %v3722_v34  ;;  %v3727_v1 = vor.u32 %v5585_v36, %v3724_v37 }
  0x19   :  { %400 = vmatpush.bf16.msra.mxu1 %v3751_v11  ;;  %429 = vmatpush.bf16.msra.mxu2 %v3755_v12  ;;  %v5601_v48 = vmax.f32 %v5179_v30, 0.0  ;;  %v5603_v49 = vmax.f32 %v5183_v38, 0.0  ;;  %v5605_v50 = vmax.f32 %v5186_v39, 0.0  ;;  %v5607_v51 = vmax.f32 %v5190_v41, 0.0  ;;  %v3870_v52 = vld [vmem:[%s7576_s2 + $0xe0] sm:$0xf] }
  0x1a   :  { %458 = vmatpush.bf16.msra.mxu3 %v3759_v16  ;;  %v5612_v53 = vmax.f32 %v5187_v40, 0.0  ;;  %v5614_v54 = vmax.f32 %v5191_v43, 0.0  ;;  %v47_v55 = vrot.slane %v5593_v45, 4  ;;  %v4927_v57 = vld [vmem:[%s7576_s2 + $0xec] sm:$0xf0]  ;;  %v3936_v6 = vor.u32 %v4943_v47, %v3935_v46 }
  0x1b   :  { %v60_v60 = vrot.slane %v5603_v49, 4  ;;  %v72_v61 = vrot.slane %v5607_v51, 4  ;;  %v3968_v62 = vld [vmem:[%s7576_s2 + $0xec] sm:$0xf]  ;;  %v4951_v63 = vld [vmem:[%s7576_s2 + $0xf8] sm:$0xf0]  ;;  %v3871_v7 = vor.u32 %v4927_v57, %v3870_v52  ;;  %v5664_v19 = vunpack.c.0.s8 %v5546_v23 }
  0x1c   :  { %372 = vmatpush.bf16.msra.mxu0 %v3731_v17  ;;  %v49_v2 = vsel %vm48_vm0, %v47_v55, %v5591_v44  ;;  %v84_v3 = vrot.slane %v5614_v54, 4  ;;  %v3931_v8 = vld [vmem:[%s7576_s2 + $0xc4] sm:$0xf]  ;;  %v4942_v9 = vld [vmem:[%s7576_s2 + $0xd0] sm:$0xf0]  ;;  %v3969_v13 = vor.u32 %v4951_v63, %v3968_v62  ;;  %v62_v41 = vrot.slane %v5601_v48, 4 }
  0x1d   :  { %401 = vmatpush.bf16.msra.mxu1 %v3735_v18  ;;  %430 = vmatpush.bf16.msra.mxu2 %v3739_v24  ;;  %v61_v4 = vsel %vm48_vm0, %v60_v60, %v5601_v48  ;;  %v73_v5 = vsel %vm48_vm0, %v72_v61, %v5605_v50  ;;  %v55_v10 = vperm.slane %v49_v2, %v5617_v56  ;;  %v3866_v14 = vld [vmem:[%s7576_s2 + $0xc0] sm:$0xf]  ;;  %v4926_v15 = vld [vmem:[%s7576_s2 + $0xcc] sm:$0xf0]  ;;  %v3964_v16 = vld [vmem:[%s7576_s2 + $0xcc] sm:$0xf] }
  0x1e   :  { %459 = vmatpush.bf16.msra.mxu3 %v3743_v42  ;;  %v67_v11 = vperm.slane %v61_v4, %v5617_v56  ;;  %v85_v12 = vsel %vm48_vm0, %v84_v3, %v5612_v53  ;;  %v79_v17 = vperm.slane %v73_v5, %v5617_v56  ;;  %v4950_v20 = vld [vmem:[%s7576_s2 + $0xd8] sm:$0xf0]  ;;  %v3903_v21 = vld [vmem:[%s7576_s2 + $0xe8] sm:$0xf]  ;;  %v4935_v22 = vld [vmem:[%s7576_s2 + $0xf4] sm:$0xf0]  ;;  %v3932_v23 = vor.u32 %v4942_v9, %v3931_v8 }
  0x1f   :  { %v91_v18 = vperm.slane %v85_v12, %v5617_v56  ;;  %v3904_v25 = vor.u32 %v4935_v22, %v3903_v21  ;;  %v3867_v27 = vor.u32 %v4926_v15, %v3866_v14  ;;  %v3927_v28 = vld [vmem:[%s7576_s2 + $0xa4] sm:$0xf]  ;;  %v4941_v29 = vld [vmem:[%s7576_s2 + $0xb0] sm:$0xf0]  ;;  %v98_v31 = vrot.slane %v55_v10, 4 }
  0x20   :  { %373 = vmatpush.bf16.msra.mxu0 %v3715_v58  ;;  %v96_v24 = vrot.slane %v67_v11, 4  ;;  %v122_v32 = vrot.slane %v79_v17, 4  ;;  %v3965_v33 = vor.u32 %v4950_v20, %v3964_v16  ;;  %v3862_v34 = vld [vmem:[%s7576_s2 + $0xa0] sm:$0xf]  ;;  %v4925_v35 = vld [vmem:[%s7576_s2 + $0xac] sm:$0xf0]  ;;  %v3928_v43 = vor.u32 %v4941_v29, %v3927_v28 }
  0x21   :  { %402 = vmatpush.bf16.msra.mxu1 %v3719_v59  ;;  %431 = vmatpush.bf16.msra.mxu2 %v3723_v0  ;;  %v120_v26 = vrot.slane %v91_v18, 4  ;;  %v3960_v38 = vld [vmem:[%s7576_s2 + $0xac] sm:$0xf]  ;;  %v4949_v39 = vld [vmem:[%s7576_s2 + $0xb8] sm:$0xf0]  ;;  %v3863_v46 = vor.u32 %v4925_v35, %v3862_v34  ;;  %v86_v55 = vrot.slane %v5612_v53, 4  ;;  %v99_v58 = vsel %vm48_vm0, %v67_v11, %v98_v31 }
  0x22   :  { %460 = vmatpush.bf16.msra.mxu3 %v3727_v1  ;;  %v97_v30 = vsel %vm48_vm0, %v96_v24, %v55_v10  ;;  %v3923_v47 = vld [vmem:[%s7576_s2 + $0x84] sm:$0xf]  ;;  %v4940_v52 = vld [vmem:[%s7576_s2 + $0x90] sm:$0xf0]  ;;  %v123_v48 = vsel %vm48_vm0, %v91_v18, %v122_v32  ;;  %v3961_v59 = vor.u32 %v4949_v39, %v3960_v38  ;;  %v3858_v61 = vld [vmem:[%s7576_s2 + $0x80] sm:$0xf]  ;;  %v63_v1 = vsel %vm48_vm0, %v5603_v49, %v62_v41 }
  0x23   :  { %v103_v36 = vperm.slane %v97_v30, %v5664_v19  ;;  %v121_v37 = vsel %vm48_vm0, %v120_v26, %v79_v17  ;;  %v4924_v62 = vld [vmem:[%s7576_s2 + $0x8c] sm:$0xf0]  ;;  %v50_v53 = vrot.slane %v5591_v44, 4  ;;  %v3924_v0 = vor.u32 %v4940_v52, %v3923_v47  ;;  %v4939_v8 = vld [vmem:[%s7576_s2 + $0x70] sm:$0xf0] }
  0x24   :  { %582 = vmatpush.bf16.msrb.mxu0 %v3871_v7  ;;  %v127_v40 = vperm.slane %v121_v37, %v5664_v19  ;;  %v87_v2 = vsel %vm48_vm0, %v5614_v54, %v86_v55  ;;  %v107_v4 = vperm.slane %v99_v58, %v5664_v19  ;;  %v131_v5 = vperm.slane %v123_v48, %v5664_v19  ;;  %v3899_v9 = vld [vmem:[%s7576_s2 + $0xc8] sm:$0xf]  ;;  %v3956_v14 = vld [vmem:[%s7576_s2 + $0x8c] sm:$0xf]  ;;  %v4948_v16 = vld [vmem:[%s7576_s2 + $0x98] sm:$0xf0] }
  0x25   :  { %761 = vmatpush.bf16.msrb.mxu2 %v3936_v6  ;;  %680 = vmatpush.bf16.msrb.mxu1 %v3904_v25  ;;  %v146_v42 = vrot.slane %v103_v36, 4  ;;  %v74_v6 = vrot.slane %v5605_v50, 4  ;;  %v3859_v44 = vor.u32 %v4924_v62, %v3858_v61  ;;  %v5724_v7 = vperm.slane %v63_v1, %v5617_v56  ;;  %v3919_v50 = vld [vmem:[%s7576_s2 + $0x64] sm:$0xf]  ;;  %v3854_v17 = vld [vmem:[%s7576_s2 + $0x60] sm:$0xf] }
  0x26   :  { %861 = vmatpush.bf16.msrb.mxu3 %v3969_v13  ;;  %v144_v57 = vrot.slane %v127_v40, 4  ;;  %v5727_v49 = vperm.slane %v87_v2, %v5617_v56  ;;  %v51_v54 = vsel %vm48_vm0, %v5593_v45, %v50_v53  ;;  %v148_v10 = vrot.slane %v131_v5, 4  ;;  %v4934_v45 = vld [vmem:[%s7576_s2 + $0xd4] sm:$0xf0]  ;;  %v3915_v24 = vld [vmem:[%s7576_s2 + $0x44] sm:$0xf] }
  0x27   :  { %v147_v60 = vsel %vm48_vm0, %v127_v40, %v146_v42  ;;  %v150_v11 = vrot.slane %v107_v4, 4  ;;  %v75_v12 = vsel %vm48_vm0, %v5607_v51, %v74_v6  ;;  %v3920_v13 = vor.u32 %v4939_v8, %v3919_v50  ;;  %v4923_v51 = vld [vmem:[%s7576_s2 + $0x6c] sm:$0xf0]  ;;  %v4938_v25 = vld [vmem:[%s7576_s2 + $0x50] sm:$0xf0] }
  0x28   :  { %583 = vmatpush.bf16.msrb.mxu0 %v3867_v27  ;;  %v145_v63 = vsel %vm48_vm0, %v144_v57, %v103_v36  ;;  %v3900_v15 = vor.u32 %v4934_v45, %v3899_v9  ;;  %v108_v18 = vrot.slane %v5724_v7, 4  ;;  %v132_v20 = vrot.slane %v5727_v49, 4  ;;  %v3895_v27 = vld [vmem:[%s7576_s2 + $0xa8] sm:$0xf]  ;;  %v4933_v28 = vld [vmem:[%s7576_s2 + $0xb4] sm:$0xf0] }
  0x29   :  { %762 = vmatpush.bf16.msrb.mxu2 %v3932_v23  ;;  %v160_v3 = vpack.c.bf16 %v147_v60, %v145_v63  ;;  %v3957_v21 = vor.u32 %v4948_v16, %v3956_v14  ;;  %v3855_v22 = vor.u32 %v4923_v51, %v3854_v17  ;;  %v5766_v26 = vperm.slane %v51_v54, %v5617_v56  ;;  %v3952_v29 = vld [vmem:[%s7576_s2 + $0x6c] sm:$0xf]  ;;  %v4947_v32 = vld [vmem:[%s7576_s2 + $0x78] sm:$0xf0]  ;;  %v4932_v34 = vld [vmem:[%s7576_s2 + $0x94] sm:$0xf0] }
  0x2a   :  { %862 = vmatpush.bf16.msrb.mxu3 %v3965_v33  ;;  %v5769_v23 = vperm.slane %v75_v12, %v5617_v56  ;;  %681 = vmatpush.bf16.msrb.mxu1 %v3900_v15  ;;  %v3916_v30 = vor.u32 %v4938_v25, %v3915_v24  ;;  %v3896_v31 = vor.u32 %v4933_v28, %v3895_v27  ;;  %v3891_v33 = vld [vmem:[%s7576_s2 + $0x88] sm:$0xf]  ;;  %v3850_v36 = vld [vmem:[%s7576_s2 + $0x40] sm:$0xf]  ;;  %v4922_v37 = vld [vmem:[%s7576_s2 + $0x4c] sm:$0xf0] }
  0x2b   :  { %374 = vmatmul.bf16.vlgmr.msra.gmra.mxu0 %v160_v3  ;;  %403 = vmatmul.bf16.vlgmr.msra.gmra.mxu1 %v160_v3  ;;  %v3953_v35 = vor.u32 %v4947_v32, %v3952_v29  ;;  %v151_v38 = vsel %vm48_vm0, %v131_v5, %v150_v11  ;;  %v3851_v39 = vor.u32 %v4922_v37, %v3850_v36  ;;  %v3887_v55 = vld [vmem:[%s7576_s2 + $0x68] sm:$0xf]  ;;  %v4931_v57 = vld [vmem:[%s7576_s2 + $0x74] sm:$0xf0]  ;;  %v3911_v60 = vld [vmem:[%s7576_s2 + $0x24] sm:$0xf] }
  0x2c   :  { %584 = vmatpush.bf16.msrb.mxu0 %v3863_v46  ;;  %432 = vmatmul.bf16.vlgmr.msra.gmra.mxu2 %v160_v3  ;;  %v149_v40 = vsel %vm48_vm0, %v148_v10, %v107_v4  ;;  %v109_v41 = vsel %vm48_vm0, %v108_v18, %v5766_v26  ;;  %v133_v42 = vsel %vm48_vm0, %v132_v20, %v5769_v23  ;;  %v4937_v61 = vld [vmem:[%s7576_s2 + $0x30] sm:$0xf0]  ;;  %v3948_v62 = vld [vmem:[%s7576_s2 + $0x4c] sm:$0xf]  ;;  %v4946_v63 = vld [vmem:[%s7576_s2 + $0x58] sm:$0xf0] }
  0x2d   :  { %763 = vmatpush.bf16.msrb.mxu2 %v3928_v43  ;;  %461 = vmatmul.bf16.vlgmr.msra.gmra.mxu3 %v160_v3  ;;  %v3892_v43 = vor.u32 %v4932_v34, %v3891_v33  ;;  %v161_v46 = vpack.c.bf16 %v151_v38, %v149_v40  ;;  %v115_v47 = vperm.slane %v109_v41, %v5664_v19  ;;  %v4930_v1 = vld [vmem:[%s7576_s2 + $0x54] sm:$0xf0]  ;;  %v3846_v4 = vld [vmem:[%s7576_s2 + $0x20] sm:$0xf]  ;;  %v4921_v5 = vld [vmem:[%s7576_s2 + $0x2c] sm:$0xf0] }
  0x2e   :  { %863 = vmatpush.bf16.msrb.mxu3 %v3961_v59  ;;  %682 = vmatpush.bf16.msrb.mxu1 %v3896_v31  ;;  %v139_v52 = vperm.slane %v133_v42, %v5664_v19  ;;  %v3888_v59 = vor.u32 %v4931_v57, %v3887_v55  ;;  %v3912_v53 = vor.u32 %v4937_v61, %v3911_v60  ;;  %v3907_v6 = vld [vmem:[%s7576_s2 + $0x4] sm:$0xf]  ;;  %v4936_v54 = vld [vmem:[%s7576_s2 + $0x10] sm:$0xf0]  ;;  %v3879_v50 = vld [vmem:[%s7576_s2 + $0x28] sm:$0xf] }
  0x2f   :  { %v154_v48 = vrot.slane %v115_v47, 4  ;;  %v3949_v2 = vor.u32 %v4946_v63, %v3948_v62  ;;  %v4929_v8 = vld [vmem:[%s7576_s2 + $0x34] sm:$0xf0]  ;;  %v3908_v9 = vor.u32 %v4936_v54, %v3907_v6  ;;  %v3944_v10 = vld [vmem:[%s7576_s2 + $0x2c] sm:$0xf]  ;;  %v110_v24 = vrot.slane %v5766_v26, 4 }
  0x30   :  { %585 = vmatpush.bf16.msrb.mxu0 %v3859_v44  ;;  %v152_v58 = vrot.slane %v139_v52, 4  ;;  %v3847_v44 = vor.u32 %v4921_v5, %v3846_v4  ;;  %v4945_v11 = vld [vmem:[%s7576_s2 + $0x38] sm:$0xf0]  ;;  %v3842_v12 = vld [vmem:[%s7576_s2] sm:$0xf]  ;;  %v134_v25 = vrot.slane %v5769_v23, 4 }
  0x31   :  { %764 = vmatpush.bf16.msrb.mxu2 %v3924_v0  ;;  %v3883_v0 = vld [vmem:[%s7576_s2 + $0x48] sm:$0xf]  ;;  %v3945_v45 = vor.u32 %v4945_v11, %v3944_v10  ;;  %v4920_v14 = vld [vmem:[%s7576_s2 + $0xc] sm:$0xf0]  ;;  %v4928_v17 = vld [vmem:[%s7576_s2 + $0x14] sm:$0xf0]  ;;  %v111_v29 = vsel %vm48_vm0, %v5724_v7, %v110_v24 }
  0x32   :  { %864 = vmatpush.bf16.msrb.mxu3 %v3957_v21  ;;  %683 = vmatpush.bf16.msrb.mxu1 %v3892_v43  ;;  %v3884_v3 = vor.u32 %v4930_v1, %v3883_v0  ;;  %v3875_v15 = vld [vmem:[%s7576_s2 + $0x8] sm:$0xf]  ;;  %v3843_v16 = vor.u32 %v4920_v14, %v3842_v12  ;;  %v3940_v51 = vld [vmem:[%s7576_s2 + $0xc] sm:$0xf]  ;;  %v4944_v18 = vld [vmem:[%s7576_s2 + $0x18] sm:$0xf0]  ;;  %v153_v20 = vsel %vm48_vm0, %v152_v58, %v115_v47 }
  0x33   :  { %v155_v21 = vsel %vm48_vm0, %v139_v52, %v154_v48  ;;  %v3876_v27 = vor.u32 %v4928_v17, %v3875_v15  ;;  %v119_v26 = vperm.slane %v111_v29, %v5664_v19  ;;  %v5328_v7 = vmov 0.0|0.0   ;;  %v196_v37 = vld [vmem:[%s7577_s3] sm:$0xf] }
  0x34   :  { %586 = vmatpush.bf16.msrb.mxu0 %v3855_v22  ;;  %v3941_v22 = vor.u32 %v4944_v18, %v3940_v51  ;;  %v162_v28 = vpack.c.bf16 %v155_v21, %v153_v20  ;;  %v5888_v38 = vperm.slane %v196_v37, 1  ;;  %v5902_v52 = vperm.slane %v196_v37, 3 }
  0x35   :  { %765 = vmatpush.bf16.msrb.mxu2 %v3920_v13  ;;  %v3880_v13 = vor.u32 %v4929_v8, %v3879_v50  ;;  %v158_v32 = vrot.slane %v119_v26, 4  ;;  %v5904_v55 = vperm.slane %v196_v37, 2 }
  0x36   :  { %865 = vmatpush.bf16.msrb.mxu3 %v3953_v35  ;;  %684 = vmatpush.bf16.msrb.mxu1 %v3888_v59 }
  0x38   :  { %587 = vmatpush.bf16.msrb.mxu0 %v3851_v39  ;;  %v5890_v39 = vperm.slane %v196_v37, 0 }
  0x39   :  { %766 = vmatpush.bf16.msrb.mxu2 %v3916_v30  ;;  %v135_v30 = vsel %vm48_vm0, %v5727_v49, %v134_v25 }
  0x3a   :  { %866 = vmatpush.bf16.msrb.mxu3 %v3949_v2  ;;  %685 = vmatpush.bf16.msrb.mxu1 %v3884_v3  ;;  %v143_v23 = vperm.slane %v135_v30, %v5664_v19  ;;  %v4001_v30 = vld [vmem:[%s7576_s2 + $0xe0] sm:$0xf] }
  0x3b   :  { %379 = vmatmul.bf16.gmra.mxu0 %v161_v46  ;;  %408 = vmatmul.bf16.gmra.mxu1 %v161_v46 }
  0x3c   :  { %437 = vmatmul.bf16.gmra.mxu2 %v161_v46  ;;  %588 = vmatpush.bf16.msrb.mxu0 %v3847_v44  ;;  %v156_v31 = vrot.slane %v143_v23, 4  ;;  %v159_v34 = vsel %vm48_vm0, %v143_v23, %v158_v32  ;;  %v4034_v23 = vld [vmem:[%s7576_s2 + $0xe8] sm:$0xf]  ;;  %v4967_v32 = vld [vmem:[%s7576_s2 + $0xf4] sm:$0xf0] }
  0x3d   :  { %466 = vmatmul.bf16.gmra.mxu3 %v161_v46  ;;  %767 = vmatpush.bf16.msrb.mxu2 %v3912_v53  ;;  %v4035_v37 = vor.u32 %v4967_v32, %v4034_v23  ;;  %v4026_v23 = vld [vmem:[%s7576_s2 + $0xa8] sm:$0xf]  ;;  %v4965_v32 = vld [vmem:[%s7576_s2 + $0xb4] sm:$0xf0] }
  0x3e   :  { %867 = vmatpush.bf16.msrb.mxu3 %v3945_v45  ;;  %686 = vmatpush.bf16.msrb.mxu1 %v3880_v13  ;;  %v157_v33 = vsel %vm48_vm0, %v156_v31, %v119_v26  ;;  %v4959_v26 = vld [vmem:[%s7576_s2 + $0xec] sm:$0xf0] }
  0x3f   :  { %v163_v35 = vpack.c.bf16 %v159_v34, %v157_v33  ;;  %v4002_v31 = vor.u32 %v4959_v26, %v4001_v30  ;;  %v4066_v33 = vld [vmem:[%s7576_s2 + $0xe4] sm:$0xf]  ;;  %v4975_v34 = vld [vmem:[%s7576_s2 + $0xf0] sm:$0xf0]  ;;  %v3993_v30 = vld [vmem:[%s7576_s2 + $0xa0] sm:$0xf] }
  0x40   :  { %589 = vmatpush.bf16.msrb.mxu0 %v3843_v16  ;;  %v4957_v26 = vld [vmem:[%s7576_s2 + $0xac] sm:$0xf0] }
  0x41   :  { %768 = vmatpush.bf16.msrb.mxu2 %v3908_v9 }
  0x42   :  { %868 = vmatpush.bf16.msrb.mxu3 %v3941_v22  ;;  %687 = vmatpush.bf16.msrb.mxu1 %v3876_v27 }
  0x44   :  { %964 = vmatpush.bf16.msra.mxu0 %v4002_v31  ;;  %v3994_v31 = vor.u32 %v4957_v26, %v3993_v30  ;;  %v4087_v30 = vld [vmem:[%s7576_s2 + $0x8c] sm:$0xf]  ;;  %v4980_v26 = vld [vmem:[%s7576_s2 + $0x98] sm:$0xf0] }
  0x46   :  { %1062 = vmatpush.bf16.msra.mxu1 %v4035_v37 }
  0x4b   :  { %384 = vmatmul.bf16.gmra.mxu0 %v162_v28  ;;  %413 = vmatmul.bf16.gmra.mxu1 %v162_v28 }
  0x4c   :  { %442 = vmatmul.bf16.gmra.mxu2 %v162_v28 }
  0x4d   :  { %471 = vmatmul.bf16.gmra.mxu3 %v162_v28 }
  0x5b   :  { %389 = vmatmul.bf16.gmra.mxu0 %v163_v35  ;;  %418 = vmatmul.bf16.gmra.mxu1 %v163_v35 }
  0x5c   :  { %447 = vmatmul.bf16.gmra.mxu2 %v163_v35 }
  0x5d   :  { %476 = vmatmul.bf16.gmra.mxu3 %v163_v35 }
  0x6b   :  { %590 = vmatmul.bf16.vlgmr.msrb.gmra.mxu0 %v5328_v7  ;;  %688 = vmatmul.bf16.vlgmr.msrb.gmra.mxu1 %v5328_v7 }
  0x6c   :  { %769 = vmatmul.bf16.vlgmr.msrb.gmra.mxu2 %v5328_v7 }
  0x6d   :  { %869 = vmatmul.bf16.vlgmr.msrb.gmra.mxu3 %v5328_v7 }
  0xa8   :  { %v5881_v49 = vpop.f32.mrf.mxu0  ;;  %v5883_v36 = vpop.f32.mrf.mxu1 }
  0xaf   :  { %v5892_v40 = vpop.f32.mrf.mxu2 }
  0xb0   :  { %v5894_v41 = vpop.f32.mrf.mxu3  ;;  %v377_v42 = vpop.f32.mrf.mxu0 }
  0xb1   :  { %v406_v43 = vpop.f32.mrf.mxu1  ;;  %v5897_v46 = vadd.f32 %v377_v42, %v5890_v39  ;;  %v4067_v42 = vor.u32 %v4975_v34, %v4066_v33  ;;  %v4058_v33 = vld [vmem:[%s7576_s2 + $0xa4] sm:$0xf]  ;;  %v4973_v34 = vld [vmem:[%s7576_s2 + $0xb0] sm:$0xf0] }
  0xb2   :  { %v5900_v47 = vadd.f32 %v406_v43, %v5888_v38  ;;  %v4099_v43 = vld [vmem:[%s7576_s2 + $0xec] sm:$0xf] }
  0xb3   :  { %1143 = vmatpush.bf16.msra.mxu2 %v4067_v42  ;;  %v4027_v42 = vor.u32 %v4965_v32, %v4026_v23  ;;  %v4088_v23 = vor.u32 %v4980_v26, %v4087_v30  ;;  %v4955_v32 = vld [vmem:[%s7576_s2 + $0x6c] sm:$0xf0] }
  0xb7   :  { %v435_v57 = vpop.f32.mrf.mxu2 }
  0xb8   :  { %v464_v58 = vpop.f32.mrf.mxu3  ;;  %v5907_v48 = vadd.f32 %v435_v57, %v5904_v55  ;;  %v380_v60 = vpop.f32.mrf.mxu0  ;;  %v4983_v57 = vld [vmem:[%s7576_s2 + $0xf8] sm:$0xf0] }
  0xb9   :  { %v5910_v59 = vadd.f32 %v464_v58, %v5902_v52  ;;  %v409_v61 = vpop.f32.mrf.mxu1  ;;  %v5913_v62 = vadd.f32 %v380_v60, %v5890_v39 }
  0xba   :  { %v5916_v53 = vadd.f32 %v409_v61, %v5888_v38 }
  0xbf   :  { %v438_v63 = vpop.f32.mrf.mxu2 }
  0xc0   :  { %v467_v0 = vpop.f32.mrf.mxu3  ;;  %v5919_v1 = vadd.f32 %v438_v63, %v5904_v55  ;;  %v382_v3 = vpop.f32.mrf.mxu0 }
  0xc1   :  { %v5922_v2 = vadd.f32 %v467_v0, %v5902_v52  ;;  %v411_v4 = vpop.f32.mrf.mxu1  ;;  %v5925_v5 = vadd.f32 %v382_v3, %v5890_v39  ;;  %v4100_v0 = vor.u32 %v4983_v57, %v4099_v43  ;;  %v4059_v43 = vor.u32 %v4973_v34, %v4058_v33  ;;  %v4091_v57 = vld [vmem:[%s7576_s2 + $0xac] sm:$0xf]  ;;  %v4018_v33 = vld [vmem:[%s7576_s2 + $0x68] sm:$0xf] }
  0xc2   :  { %v5928_v6 = vadd.f32 %v411_v4, %v5888_v38  ;;  %v405_v34 = vadd.f32 %v5883_v36, %v5888_v38 }
  0xc3   :  { %1243 = vmatpush.bf16.msra.mxu3 %v4100_v0 }
  0xc7   :  { %v440_v44 = vpop.f32.mrf.mxu2 }
  0xc8   :  { %v469_v54 = vpop.f32.mrf.mxu3  ;;  %v5931_v50 = vadd.f32 %v440_v44, %v5904_v55  ;;  %v385_v9 = vpop.f32.mrf.mxu0  ;;  %v3997_v44 = vld [vmem:[%s7576_s2 + $0xc0] sm:$0xf] }
  0xc9   :  { %v5934_v8 = vadd.f32 %v469_v54, %v5902_v52  ;;  %v414_v10 = vpop.f32.mrf.mxu1  ;;  %v5937_v11 = vadd.f32 %v385_v9, %v5890_v39  ;;  %v4958_v54 = vld [vmem:[%s7576_s2 + $0xcc] sm:$0xf0]  ;;  %v4030_v9 = vld [vmem:[%s7576_s2 + $0xc8] sm:$0xf] }
  0xca   :  { %v5940_v12 = vadd.f32 %v414_v10, %v5888_v38  ;;  %v3998_v10 = vor.u32 %v4958_v54, %v3997_v44 }
  0xcc   :  { %965 = vmatpush.bf16.msra.mxu0 %v3998_v10  ;;  %v4956_v10 = vld [vmem:[%s7576_s2 + $0x8c] sm:$0xf0] }
  0xcf   :  { %v443_v13 = vpop.f32.mrf.mxu2 }
  0xd0   :  { %v472_v45 = vpop.f32.mrf.mxu3  ;;  %v5943_v14 = vadd.f32 %v443_v13, %v5904_v55  ;;  %v387_v16 = vpop.f32.mrf.mxu0  ;;  %v4966_v13 = vld [vmem:[%s7576_s2 + $0xd4] sm:$0xf0]  ;;  %966 = vmatpush.bf16.msra.mxu0 %v3994_v31  ;;  %v3985_v31 = vld [vmem:[%s7576_s2 + $0x60] sm:$0xf] }
  0xd1   :  { %v5946_v15 = vadd.f32 %v472_v45, %v5902_v52  ;;  %v416_v17 = vpop.f32.mrf.mxu1  ;;  %v5949_v51 = vadd.f32 %v387_v16, %v5890_v39  ;;  %v4062_v45 = vld [vmem:[%s7576_s2 + $0xc4] sm:$0xf]  ;;  %v4974_v16 = vld [vmem:[%s7576_s2 + $0xd0] sm:$0xf0] }
  0xd2   :  { %v5952_v18 = vadd.f32 %v416_v17, %v5888_v38  ;;  %v4031_v17 = vor.u32 %v4966_v13, %v4030_v9  ;;  %v3989_v9 = vld [vmem:[%s7576_s2 + $0x80] sm:$0xf]  ;;  %v4022_v13 = vld [vmem:[%s7576_s2 + $0x88] sm:$0xf] }
  0xd4   :  { %1063 = vmatpush.bf16.msra.mxu1 %v4031_v17  ;;  %v4054_v17 = vld [vmem:[%s7576_s2 + $0x84] sm:$0xf] }
  0xd7   :  { %v445_v20 = vpop.f32.mrf.mxu2 }
  0xd8   :  { %v474_v21 = vpop.f32.mrf.mxu3  ;;  %v5955_v22 = vadd.f32 %v445_v20, %v5904_v55  ;;  %v390_v25 = vpop.f32.mrf.mxu0  ;;  %v4063_v20 = vor.u32 %v4974_v16, %v4062_v45  ;;  %1064 = vmatpush.bf16.msra.mxu1 %v4027_v42  ;;  %v3990_v45 = vor.u32 %v4956_v10, %v3989_v9  ;;  %v4964_v16 = vld [vmem:[%s7576_s2 + $0x94] sm:$0xf0]  ;;  %v4050_v42 = vld [vmem:[%s7576_s2 + $0x64] sm:$0xf] }
  0xd9   :  { %v5958_v24 = vadd.f32 %v474_v21, %v5902_v52  ;;  %v419_v27 = vpop.f32.mrf.mxu1  ;;  %v5961_v28 = vadd.f32 %v390_v25, %v5890_v39  ;;  %v4095_v21 = vld [vmem:[%s7576_s2 + $0xcc] sm:$0xf]  ;;  %v4982_v25 = vld [vmem:[%s7576_s2 + $0xd8] sm:$0xf0] }
  0xda   :  { %v5964_v29 = vadd.f32 %v419_v27, %v5888_v38  ;;  %v4096_v27 = vor.u32 %v4982_v25, %v4095_v21  ;;  %1144 = vmatpush.bf16.msra.mxu2 %v4063_v20  ;;  %v4972_v20 = vld [vmem:[%s7576_s2 + $0x90] sm:$0xf0]  ;;  %v4023_v25 = vor.u32 %v4964_v16, %v4022_v13  ;;  %967 = vmatpush.bf16.msra.mxu0 %v3990_v45  ;;  %v3981_v13 = vld [vmem:[%s7576_s2 + $0x40] sm:$0xf]  ;;  %v4954_v45 = vld [vmem:[%s7576_s2 + $0x4c] sm:$0xf0] }
  0xdb   :  { %v4014_v16 = vld [vmem:[%s7576_s2 + $0x48] sm:$0xf] }
  0xdc   :  { %1244 = vmatpush.bf16.msra.mxu3 %v4096_v27  ;;  %v4055_v27 = vor.u32 %v4972_v20, %v4054_v17  ;;  %1065 = vmatpush.bf16.msra.mxu1 %v4023_v25  ;;  %v3982_v17 = vor.u32 %v4954_v45, %v3981_v13  ;;  %v4962_v20 = vld [vmem:[%s7576_s2 + $0x54] sm:$0xf0]  ;;  %v4970_v25 = vld [vmem:[%s7576_s2 + $0x50] sm:$0xf0]  ;;  %v4952_v13 = vld [vmem:[%s7576_s2 + $0xc] sm:$0xf0] }
  0xdd   :  { %v4015_v26 = vor.u32 %v4962_v20, %v4014_v16  ;;  %v4006_v45 = vld [vmem:[%s7576_s2 + $0x8] sm:$0xf]  ;;  %v4038_v20 = vld [vmem:[%s7576_s2 + $0x4] sm:$0xf] }
  0xde   :  { %1145 = vmatpush.bf16.msra.mxu2 %v4059_v43  ;;  %v4971_v43 = vld [vmem:[%s7576_s2 + $0x70] sm:$0xf0] }
  0xdf   :  { %v448_v35 = vpop.f32.mrf.mxu2 }
  0xe0   :  { %v477_v7 = vpop.f32.mrf.mxu3  ;;  %v5991_v58 = vadd.f32 %v448_v35, %v5904_v55  ;;  %v392_v61 = vpop.f32.mrf.mxu0  ;;  %v376_v35 = vadd.f32 %v5881_v49, %v5890_v39 }
  0xe1   :  { %v5994_v60 = vadd.f32 %v477_v7, %v5902_v52  ;;  %v421_v63 = vpop.f32.mrf.mxu1  ;;  %v5997_v3 = vadd.f32 %v392_v61, %v5890_v39  ;;  %v4981_v61 = vld [vmem:[%s7576_s2 + $0xb8] sm:$0xf0] }
  0xe2   :  { %v6000_v4 = vadd.f32 %v421_v63, %v5888_v38  ;;  %v4092_v39 = vor.u32 %v4981_v61, %v4091_v57  ;;  %1146 = vmatpush.bf16.msra.mxu2 %v4055_v27  ;;  %v4051_v38 = vor.u32 %v4971_v43, %v4050_v42  ;;  %v4010_v43 = vld [vmem:[%s7576_s2 + $0x28] sm:$0xf] }
  0xe4   :  { %1245 = vmatpush.bf16.msra.mxu3 %v4092_v39 }
  0xe6   :  { %1147 = vmatpush.bf16.msra.mxu2 %v4051_v38  ;;  %v4969_v38 = vld [vmem:[%s7576_s2 + $0x30] sm:$0xf0] }
  0xe7   :  { %v450_v7 = vpop.f32.mrf.mxu2 }
  0xe8   :  { %v479_v37 = vpop.f32.mrf.mxu3  ;;  %v6053_v63 = vadd.f32 %v450_v7, %v5904_v55  ;;  %v591_v44 = vpop.f32.mrf.mxu0  ;;  %1246 = vmatpush.bf16.msra.mxu3 %v4088_v23  ;;  %v3986_v7 = vor.u32 %v4955_v32, %v3985_v31  ;;  %v4079_v31 = vld [vmem:[%s7576_s2 + $0x4c] sm:$0xf] }
  0xe9   :  { %v6056_v0 = vadd.f32 %v479_v37, %v5902_v52  ;;  %v6058_v49 = vpop.f32.mrf.mxu1  ;;  %v595_v54 = vadd.f32 %v591_v44, %v376_v35  ;;  %v463_v35 = vadd.f32 %v5894_v41, %v5902_v52  ;;  %v4963_v37 = vld [vmem:[%s7576_s2 + $0x74] sm:$0xf0]  ;;  %v4083_v41 = vld [vmem:[%s7576_s2 + $0x6c] sm:$0xf]  ;;  %v4979_v52 = vld [vmem:[%s7576_s2 + $0x78] sm:$0xf0] }
  0xea   :  { %v4019_v36 = vor.u32 %v4963_v37, %v4018_v33  ;;  %968 = vmatpush.bf16.msra.mxu0 %v3986_v7  ;;  %v4084_v10 = vor.u32 %v4979_v52, %v4083_v41  ;;  %v4978_v33 = vld [vmem:[%s7576_s2 + $0x58] sm:$0xf0]  ;;  %v4075_v41 = vld [vmem:[%s7576_s2 + $0x2c] sm:$0xf] }
  0xeb   :  { %v3872_v21 = vmul.f32 -1.442695, %v595_v54  ;;  %v4080_v37 = vor.u32 %v4978_v33, %v4079_v31  ;;  %v4977_v52 = vld [vmem:[%s7576_s2 + $0x38] sm:$0xf0] }
  0xec   :  { %1066 = vmatpush.bf16.msra.mxu1 %v4019_v36  ;;  %1247 = vmatpush.bf16.msra.mxu3 %v4084_v10  ;;  %v4042_v36 = vld [vmem:[%s7576_s2 + $0x24] sm:$0xf]  ;;  %v3973_v10 = vld [vmem:[%s7576_s2] sm:$0xf] }
  0xed   :  { %5198 = vpow2.f32 %v3872_v21  ;;  %v4046_v21 = vld [vmem:[%s7576_s2 + $0x44] sm:$0xf]  ;;  %v3974_v16 = vor.u32 %v4952_v13, %v3973_v10 }
  0xee   :  { %v4047_v23 = vor.u32 %v4970_v25, %v4046_v21  ;;  %969 = vmatpush.bf16.msra.mxu0 %v3982_v17  ;;  %v4960_v17 = vld [vmem:[%s7576_s2 + $0x14] sm:$0xf0]  ;;  %v4968_v25 = vld [vmem:[%s7576_s2 + $0x10] sm:$0xf0] }
  0xef   :  { %v770_v57 = vpop.f32.mrf.mxu2  ;;  %v4007_v21 = vor.u32 %v4960_v17, %v4006_v45  ;;  %v4039_v31 = vor.u32 %v4968_v25, %v4038_v20 }
  0xf0   :  { %v870_v61 = vpop.f32.mrf.mxu3  ;;  %v774_v44 = vadd.f32 %v770_v57, %v405_v34  ;;  %v593_v54 = vpop.f32.mrf.mxu0  ;;  %v3977_v34 = vld [vmem:[%s7576_s2 + $0x20] sm:$0xf]  ;;  %v4961_v57 = vld [vmem:[%s7576_s2 + $0x34] sm:$0xf0]  ;;  %1067 = vmatpush.bf16.msra.mxu1 %v4015_v26  ;;  %1148 = vmatpush.bf16.msra.mxu2 %v4047_v23  ;;  %v434_v23 = vadd.f32 %v5892_v40, %v5904_v55 }
  0xf1   :  { %v874_v39 = vadd.f32 %v870_v61, %v463_v35  ;;  %v691_v9 = vpop.f32.mrf.mxu1  ;;  %v4953_v35 = vld [vmem:[%s7576_s2 + $0x2c] sm:$0xf0]  ;;  %v4011_v61 = vor.u32 %v4961_v57, %v4010_v43  ;;  %1248 = vmatpush.bf16.msra.mxu3 %v4080_v37  ;;  %v4043_v54 = vor.u32 %v4969_v38, %v4042_v36 }
  0xf2   :  { %v3937_v27 = vmul.f32 -1.442695, %v774_v44  ;;  %v3978_v42 = vor.u32 %v4953_v35, %v3977_v34  ;;  %v4076_v9 = vor.u32 %v4977_v52, %v4075_v41  ;;  %v693_v37 = vadd.f32 %v6058_v49, %v434_v23 }
  0xf3   :  { %v3970_v30 = vmul.f32 -1.442695, %v874_v39  ;;  %v5199_v32 = vpop.eup %5198 }
  0xf4   :  { %v6142_v7 = vadd.f32 1.0, %v5199_v32  ;;  %5200 = vpow2.f32 %v3937_v27  ;;  %970 = vmatpush.bf16.msra.mxu0 %v3978_v42  ;;  %1068 = vmatpush.bf16.msra.mxu1 %v4011_v61  ;;  %v4071_v27 = vld [vmem:[%s7576_s2 + $0xc] sm:$0xf] }
  0xf5   :  { %5202 = vpow2.f32 %v3970_v30  ;;  %1149 = vmatpush.bf16.msra.mxu2 %v4043_v54  ;;  %v4976_v30 = vld [vmem:[%s7576_s2 + $0x18] sm:$0xf0]  ;;  %1249 = vmatpush.bf16.msra.mxu3 %v4076_v9 }
  0xf6   :  { %5204 = vrcp.f32 %v6142_v7  ;;  %v4072_v32 = vor.u32 %v4976_v30, %v4071_v27  ;;  %v611_v40 = vand.u32 2147483648, %v6142_v7  ;;  %v609_v61 = vand.u32 2147483647, %v6142_v7 }
  0xf7   :  { %v772_v44 = vpop.f32.mrf.mxu2  ;;  %vm605_vm2 = vweird.f32 %v6142_v7 }
  0xf8   :  { %v872_v39 = vpop.f32.mrf.mxu3  ;;  %971 = vmatpush.bf16.msra.mxu0 %v3974_v16  ;;  %1069 = vmatpush.bf16.msra.mxu1 %v4007_v21  ;;  %v612_v41 = vor.u32 1.1754944e-38, %v611_v40  ;;  %vm610_vm4 = vcmp.eq.f32.partialorder %v609_v61, 8.507059e+37  ;;  %v4165_v61 = vld [vmem:[%s7576_s2 + $0xe8] sm:$0xf] }
  0xf9   :  { %1150 = vmatpush.bf16.msra.mxu2 %v4039_v31  ;;  %1250 = vmatpush.bf16.msra.mxu3 %v4072_v32 }
  0xfa   :  { %v5201_v26 = vpop.eup %5200 }
  0xfb   :  { %v5203_v33 = vpop.eup %5202  ;;  %v778_v34 = vadd.f32 1.0, %v5201_v26 }
  0xfc   :  { %v5205_v35 = vpop.eup %5204  ;;  %v878_v42 = vadd.f32 1.0, %v5203_v33 }
  0xfd   :  { %v601_v43 = vmul.f32 %v5205_v35, %v6142_v7  ;;  %5206 = vrcp.f32 %v778_v34  ;;  %vm606_vm1 = vweird.f32 %v5205_v35  ;;  %v790_v45 = vand.u32 2147483648, %v778_v34 }
  0xfe   :  { %5208 = vrcp.f32 %v878_v42  ;;  %vm607_vm3 = vmor %vm605_vm2, %vm606_vm1  ;;  %v788_v17 = vand.u32 2147483647, %v778_v34  ;;  %vm784_vm6 = vweird.f32 %v778_v34  ;;  %v890_v32 = vand.u32 2147483648, %v878_v42 }
  0xff   :  { %v602_v57 = vsub.f32 1.0, %v601_v43  ;;  %5210 = vtanh.f32 %v693_v37  ;;  %v791_v7 = vor.u32 1.1754944e-38, %v790_v45  ;;  %vm884_vm10 = vweird.f32 %v878_v42  ;;  %v4161_v45 = vld [vmem:[%s7576_s2 + $0xc8] sm:$0xf] }
 0x100   :  { %vm789_vm8 = vcmp.eq.f32.partialorder %v788_v17, 8.507059e+37  ;;  %v888_v33 = vand.u32 2147483647, %v878_v42  ;;  %v891_v37 = vor.u32 1.1754944e-38, %v890_v32  ;;  %v4998_v17 = vld [vmem:[%s7576_s2 + $0xd4] sm:$0xf0] }
 0x101   :  { %v603_v55 = vmul.f32 %v5205_v35, %v602_v57  ;;  %v4989_v32 = vld [vmem:[%s7576_s2 + $0xac] sm:$0xf0] }
 0x102   :  { %vm889_vm12 = vcmp.eq.f32.partialorder %v888_v33, 8.507059e+37  ;;  %v4157_v33 = vld [vmem:[%s7576_s2 + $0xa8] sm:$0xf] }
 0x103   :  { %v5207_v36 = vpop.eup %5206  ;;  %v604_v38 = vadd.f32 %v5205_v35, %v603_v55  ;;  %v4132_v55 = vld [vmem:[%s7576_s2 + $0xe0] sm:$0xf] }
 0x104   :  { %v5209_v49 = vpop.eup %5208  ;;  %v780_v52 = vmul.f32 %v5207_v36, %v778_v34  ;;  %vm785_vm5 = vweird.f32 %v5207_v36 }
 0x105   :  { %v608_v44 = vsel %vm607_vm3, %v5205_v35, %v604_v38  ;;  %v880_v39 = vmul.f32 %v5209_v49, %v878_v42  ;;  %v5211_v54 = vpop.eup %5210  ;;  %vm786_vm7 = vmor %vm784_vm6, %vm785_vm5  ;;  %vm885_vm9 = vweird.f32 %v5209_v49  ;;  %v4991_v42 = vld [vmem:[%s7576_s2 + $0xec] sm:$0xf0]  ;;  %v4999_v38 = vld [vmem:[%s7576_s2 + $0xf4] sm:$0xf0] }
 0x106   :  { %v613_v9 = vsel %vm610_vm4, %v612_v41, %v608_v44  ;;  %v781_v10 = vsub.f32 1.0, %v780_v52  ;;  %vm886_vm11 = vmor %vm884_vm10, %vm885_vm9  ;;  %v5007_v41 = vld [vmem:[%s7576_s2 + $0xf0] sm:$0xf0]  ;;  %v4166_v52 = vor.u32 %v4999_v38, %v4165_v61  ;;  %v5013_v61 = vld [vmem:[%s7576_s2 + $0xb8] sm:$0xf0] }
 0x107   :  { %v695_v13 = vmul.f32 %v5211_v54, %v613_v9  ;;  %v881_v20 = vsub.f32 1.0, %v880_v39  ;;  %v4230_v39 = vld [vmem:[%s7576_s2 + $0xec] sm:$0xf]  ;;  %v5015_v54 = vld [vmem:[%s7576_s2 + $0xf8] sm:$0xf0] }
 0x108   :  { %v782_v16 = vmul.f32 %v5207_v36, %v781_v10  ;;  %v4231_v9 = vor.u32 %v5015_v54, %v4230_v39  ;;  %1445 = vmatpush.bf16.msrb.mxu1 %v4166_v52  ;;  %v4128_v10 = vld [vmem:[%s7576_s2 + $0xc0] sm:$0xf]  ;;  %v4153_v39 = vld [vmem:[%s7576_s2 + $0x88] sm:$0xf] }
 0x109   :  { %v882_v30 = vmul.f32 %v5209_v49, %v881_v20  ;;  %v4193_v20 = vld [vmem:[%s7576_s2 + $0xc4] sm:$0xf]  ;;  %v4120_v52 = vld [vmem:[%s7576_s2 + $0x80] sm:$0xf] }
 0x10a   :  { %v783_v21 = vadd.f32 %v5207_v36, %v782_v16  ;;  %1626 = vmatpush.bf16.msrb.mxu3 %v4231_v9  ;;  %v4185_v9 = vld [vmem:[%s7576_s2 + $0x84] sm:$0xf] }
 0x10b   :  { %v883_v31 = vadd.f32 %v5209_v49, %v882_v30  ;;  %v5014_v30 = vld [vmem:[%s7576_s2 + $0xd8] sm:$0xf0] }
 0x10c   :  { %v787_v25 = vsel %vm786_vm7, %v5207_v36, %v783_v21  ;;  %v4133_v36 = vor.u32 %v4991_v42, %v4132_v55  ;;  %v5006_v21 = vld [vmem:[%s7576_s2 + $0xd0] sm:$0xf0]  ;;  %v4222_v42 = vld [vmem:[%s7576_s2 + $0xac] sm:$0xf] }
 0x10d   :  { %v792_v27 = vsel %vm789_vm8, %v791_v7, %v787_v25  ;;  %v887_v35 = vsel %vm886_vm11, %v5209_v49, %v883_v31  ;;  %v4197_v49 = vld [vmem:[%s7576_s2 + $0xe4] sm:$0xf]  ;;  %v4162_v7 = vor.u32 %v4998_v17, %v4161_v45  ;;  %v4194_v25 = vor.u32 %v5006_v21, %v4193_v20  ;;  %v4124_v31 = vld [vmem:[%s7576_s2 + $0xa0] sm:$0xf]  ;;  %v4218_v17 = vld [vmem:[%s7576_s2 + $0x8c] sm:$0xf] }
 0x10e   :  { %v794_v26 = vmul.f32 0.0, %v792_v27  ;;  %v892_v43 = vsel %vm889_vm12, %v891_v37, %v887_v35  ;;  %v4198_v44 = vor.u32 %v5007_v41, %v4197_v49  ;;  %1347 = vmatpush.bf16.msrb.mxu0 %v4133_v36  ;;  %v4226_v27 = vld [vmem:[%s7576_s2 + $0xcc] sm:$0xf]  ;;  %v4125_v35 = vor.u32 %v4989_v32, %v4124_v31  ;;  %v4997_v37 = vld [vmem:[%s7576_s2 + $0xb4] sm:$0xf0] }
 0x10f   :  { %1446 = vmatpush.bf16.msrb.mxu1 %v4162_v7  ;;  %v4223_v49 = vor.u32 %v5013_v61, %v4222_v42  ;;  %v5012_v20 = vld [vmem:[%s7576_s2 + $0x98] sm:$0xf0]  ;;  %v4116_v7 = vld [vmem:[%s7576_s2 + $0x60] sm:$0xf]  ;;  %v4181_v31 = vld [vmem:[%s7576_s2 + $0x64] sm:$0xf] }
 0x110   :  { %v6194_v23 = vadd.f32 %v794_v26, %v695_v13  ;;  %1526 = vmatpush.bf16.msrb.mxu2 %v4198_v44  ;;  %v4990_v13 = vld [vmem:[%s7576_s2 + $0xcc] sm:$0xf0]  ;;  %v4227_v26 = vor.u32 %v5014_v30, %v4226_v27  ;;  %v4219_v21 = vor.u32 %v5012_v20, %v4218_v17  ;;  %v4149_v27 = vld [vmem:[%s7576_s2 + $0x68] sm:$0xf]  ;;  %v5003_v32 = vld [vmem:[%s7576_s2 + $0x70] sm:$0xf0] }
 0x111   :  { %v4129_v16 = vor.u32 %v4990_v13, %v4128_v10  ;;  %v4988_v44 = vld [vmem:[%s7576_s2 + $0x8c] sm:$0xf0]  ;;  %v5004_v10 = vld [vmem:[%s7576_s2 + $0x90] sm:$0xf0] }
 0x112   :  { %5212 = vtanh.f32 %v6194_v23  ;;  %1627 = vmatpush.bf16.msrb.mxu3 %v4227_v26  ;;  %v4121_v54 = vor.u32 %v4988_v44, %v4120_v52  ;;  %v4995_v26 = vld [vmem:[%s7576_s2 + $0x74] sm:$0xf0]  ;;  %v4986_v52 = vld [vmem:[%s7576_s2 + $0x4c] sm:$0xf0]  ;;  %v4145_v44 = vld [vmem:[%s7576_s2 + $0x48] sm:$0xf] }
 0x113   :  { %1348 = vmatpush.bf16.msrb.mxu0 %v4129_v16  ;;  %v4186_v16 = vor.u32 %v5004_v10, %v4185_v9  ;;  %v4210_v9 = vld [vmem:[%s7576_s2 + $0x4c] sm:$0xf] }
 0x114   :  { %1527 = vmatpush.bf16.msrb.mxu2 %v4194_v25  ;;  %v4987_v25 = vld [vmem:[%s7576_s2 + $0x6c] sm:$0xf0] }
 0x115   :  { %v4117_v30 = vor.u32 %v4987_v25, %v4116_v7  ;;  %v4985_v7 = vld [vmem:[%s7576_s2 + $0x2c] sm:$0xf0]  ;;  %v4141_v25 = vld [vmem:[%s7576_s2 + $0x28] sm:$0xf] }
 0x116   :  { %1628 = vmatpush.bf16.msrb.mxu3 %v4223_v49 }
 0x117   :  { %1349 = vmatpush.bf16.msrb.mxu0 %v4125_v35 }
 0x118   :  { %v5213_v34 = vpop.eup %5212 }
 0x119   :  { %v6197_v57 = vmul.f32 %v5213_v34, %v892_v43  ;;  %v4189_v34 = vld [vmem:[%s7576_s2 + $0xa4] sm:$0xf]  ;;  %v5005_v43 = vld [vmem:[%s7576_s2 + $0xb0] sm:$0xf0] }
 0x11a   :  { %v4190_v55 = vor.u32 %v5005_v43, %v4189_v34  ;;  %1629 = vmatpush.bf16.msrb.mxu3 %v4219_v21  ;;  %v4182_v34 = vor.u32 %v5003_v32, %v4181_v31  ;;  %v4214_v43 = vld [vmem:[%s7576_s2 + $0x6c] sm:$0xf]  ;;  %v4108_v21 = vld [vmem:[%s7576_s2 + $0x20] sm:$0xf]  ;;  %v4173_v31 = vld [vmem:[%s7576_s2 + $0x24] sm:$0xf] }
 0x11b   :  { %v897_v40 = vpack.c.bf16 %v6197_v57, %v6197_v57  ;;  %1350 = vmatpush.bf16.msrb.mxu0 %v4121_v54  ;;  %v4177_v54 = vld [vmem:[%s7576_s2 + $0x44] sm:$0xf] }
 0x11c   :  { %1528 = vmatpush.bf16.msrb.mxu2 %v4190_v55  ;;  %v4112_v55 = vld [vmem:[%s7576_s2 + $0x40] sm:$0xf] }
 0x11d   :  { %972 = vmatmul.bf16.vlgmr.msra.gmra.mxu0 %v897_v40  ;;  %1070 = vmatmul.bf16.vlgmr.msra.gmra.mxu1 %v897_v40 }
 0x11e   :  { %1151 = vmatmul.bf16.vlgmr.msra.gmra.mxu2 %v897_v40  ;;  %1251 = vmatmul.bf16.vlgmr.msra.gmra.mxu3 %v897_v40  ;;  %v4158_v40 = vor.u32 %v4997_v37, %v4157_v33  ;;  %v4150_v37 = vor.u32 %v4995_v26, %v4149_v27  ;;  %v4993_v26 = vld [vmem:[%s7576_s2 + $0x34] sm:$0xf0] }
 0x11f   :  { %1351 = vmatpush.bf16.msrb.mxu0 %v4117_v30  ;;  %v4109_v30 = vor.u32 %v4985_v7, %v4108_v21  ;;  %v4142_v32 = vor.u32 %v4993_v26, %v4141_v25 }
 0x120   :  { %1447 = vmatpush.bf16.msrb.mxu1 %v4158_v40  ;;  %1529 = vmatpush.bf16.msrb.mxu2 %v4186_v16  ;;  %v5011_v40 = vld [vmem:[%s7576_s2 + $0x78] sm:$0xf0] }
 0x121   :  { %v5010_v16 = vld [vmem:[%s7576_s2 + $0x58] sm:$0xf0] }
 0x122   :  { %v4211_v20 = vor.u32 %v5010_v16, %v4210_v9 }
 0x124   :  { %1530 = vmatpush.bf16.msrb.mxu2 %v4182_v34  ;;  %v4104_v34 = vld [vmem:[%s7576_s2] sm:$0xf] }
 0x19a   :  { %v973_v36 = vpop.f32.mrf.mxu0  ;;  %v6273_v38 = vpop.f32.mrf.mxu1 }
 0x19b   :  { %v977_v41 = vadd.f32 %v973_v36, %v5897_v46  ;;  %v4996_v46 = vld [vmem:[%s7576_s2 + $0x94] sm:$0xf0]  ;;  %v1075_v16 = vadd.f32 %v6273_v38, %v5907_v48 }
 0x19c   :  { %v4154_v45 = vor.u32 %v4996_v46, %v4153_v39  ;;  %v4994_v39 = vld [vmem:[%s7576_s2 + $0x54] sm:$0xf0]  ;;  %v5002_v46 = vld [vmem:[%s7576_s2 + $0x50] sm:$0xf0] }
 0x19d   :  { %v4003_v13 = vmul.f32 -1.442695, %v977_v41  ;;  %v4215_v41 = vor.u32 %v5011_v40, %v4214_v43 }
 0x19e   :  { %1448 = vmatpush.bf16.msrb.mxu1 %v4154_v45  ;;  %v4178_v45 = vor.u32 %v5002_v46, %v4177_v54  ;;  %v5008_v54 = vld [vmem:[%s7576_s2 + $0x18] sm:$0xf0] }
 0x19f   :  { %5214 = vpow2.f32 %v4003_v13  ;;  %1630 = vmatpush.bf16.msrb.mxu3 %v4215_v41 }
 0x1a0   :  { %1531 = vmatpush.bf16.msrb.mxu2 %v4178_v45 }
 0x1a1   :  { %v1152_v33 = vpop.f32.mrf.mxu2  ;;  %v1252_v35 = vpop.f32.mrf.mxu3 }
 0x1a2   :  { %v1156_v42 = vadd.f32 %v1152_v33, %v5900_v47  ;;  %v1256_v61 = vadd.f32 %v1252_v35, %v5910_v59  ;;  %v975_v36 = vpop.f32.mrf.mxu0  ;;  %v1073_v49 = vpop.f32.mrf.mxu1  ;;  %1449 = vmatpush.bf16.msrb.mxu1 %v4150_v37  ;;  %v4113_v47 = vor.u32 %v4986_v52, %v4112_v55  ;;  %v4146_v59 = vor.u32 %v4994_v39, %v4145_v44  ;;  %v5001_v33 = vld [vmem:[%s7576_s2 + $0x30] sm:$0xf0]  ;;  %v4206_v35 = vld [vmem:[%s7576_s2 + $0x2c] sm:$0xf]  ;;  %v5009_v37 = vld [vmem:[%s7576_s2 + $0x38] sm:$0xf0] }
 0x1a3   :  { %1631 = vmatpush.bf16.msrb.mxu3 %v4211_v20  ;;  %v4174_v55 = vor.u32 %v5001_v33, %v4173_v31  ;;  %v4137_v36 = vld [vmem:[%s7576_s2 + $0x8] sm:$0xf]  ;;  %v4992_v49 = vld [vmem:[%s7576_s2 + $0x14] sm:$0xf0]  ;;  %v4169_v52 = vld [vmem:[%s7576_s2 + $0x4] sm:$0xf] }
 0x1a4   :  { %v4068_v10 = vmul.f32 -1.442695, %v1156_v42  ;;  %v4101_v13 = vmul.f32 -1.442695, %v1256_v61  ;;  %1352 = vmatpush.bf16.msrb.mxu0 %v4113_v47  ;;  %v4207_v42 = vor.u32 %v5009_v37, %v4206_v35  ;;  %v4984_v61 = vld [vmem:[%s7576_s2 + $0xc] sm:$0xf0]  ;;  %v4138_v39 = vor.u32 %v4992_v49, %v4137_v36 }
 0x1a5   :  { %v5215_v17 = vpop.eup %5214  ;;  %v4105_v41 = vor.u32 %v4984_v61, %v4104_v34  ;;  %v5000_v44 = vld [vmem:[%s7576_s2 + $0x10] sm:$0xf0]  ;;  %1532 = vmatpush.bf16.msrb.mxu2 %v4174_v55 }
 0x1a6   :  { %v6359_v27 = vadd.f32 1.0, %v5215_v17  ;;  %5216 = vpow2.f32 %v4068_v10  ;;  %1450 = vmatpush.bf16.msrb.mxu1 %v4146_v59  ;;  %v4170_v47 = vor.u32 %v5000_v44, %v4169_v52  ;;  %v4202_v59 = vld [vmem:[%s7576_s2 + $0xc] sm:$0xf] }
 0x1a7   :  { %5218 = vpow2.f32 %v4101_v13  ;;  %1632 = vmatpush.bf16.msrb.mxu3 %v4207_v42  ;;  %v4203_v9 = vor.u32 %v5008_v54, %v4202_v59 }
 0x1a8   :  { %5220 = vrcp.f32 %v6359_v27  ;;  %1353 = vmatpush.bf16.msrb.mxu0 %v4109_v30  ;;  %v993_v7 = vand.u32 2147483648, %v6359_v27  ;;  %v991_v30 = vand.u32 2147483647, %v6359_v27  ;;  %vm987_vm14 = vweird.f32 %v6359_v27 }
 0x1a9   :  { %v1154_v43 = vpop.f32.mrf.mxu2  ;;  %v1254_v40 = vpop.f32.mrf.mxu3  ;;  %1533 = vmatpush.bf16.msrb.mxu2 %v4170_v47 }
 0x1aa   :  { %1451 = vmatpush.bf16.msrb.mxu1 %v4142_v32  ;;  %v994_v38 = vor.u32 1.1754944e-38, %v993_v7  ;;  %vm992_vm1 = vcmp.eq.f32.partialorder %v991_v30, 8.507059e+37  ;;  %v4328_v30 = vld [vmem:[%s7576_s2 + $0xe4] sm:$0xf] }
 0x1ab   :  { %1633 = vmatpush.bf16.msrb.mxu3 %v4203_v9 }
 0x1ac   :  { %v5217_v46 = vpop.eup %5216  ;;  %1354 = vmatpush.bf16.msrb.mxu0 %v4105_v41 }
 0x1ad   :  { %v5219_v10 = vpop.eup %5218  ;;  %v1160_v13 = vadd.f32 1.0, %v5217_v46 }
 0x1ae   :  { %v5221_v45 = vpop.eup %5220  ;;  %v1260_v17 = vadd.f32 1.0, %v5219_v10  ;;  %1452 = vmatpush.bf16.msrb.mxu1 %v4138_v39 }
 0x1af   :  { %v983_v20 = vmul.f32 %v5221_v45, %v6359_v27  ;;  %5222 = vrcp.f32 %v1160_v13  ;;  %vm988_vm13 = vweird.f32 %v5221_v45  ;;  %v1172_v55 = vand.u32 2147483648, %v1160_v13 }
 0x1b0   :  { %5224 = vrcp.f32 %v1260_v17  ;;  %vm989_vm15 = vmor %vm987_vm14, %vm988_vm13  ;;  %v1170_v61 = vand.u32 2147483647, %v1160_v13  ;;  %vm1166_vm3 = vweird.f32 %v1160_v13  ;;  %v1272_v54 = vand.u32 2147483648, %v1260_v17 }
 0x1b1   :  { %v984_v21 = vsub.f32 1.0, %v983_v20  ;;  %5226 = vtanh.f32 %v1075_v16  ;;  %v1173_v27 = vor.u32 1.1754944e-38, %v1172_v55  ;;  %vm1266_vm7 = vweird.f32 %v1260_v17  ;;  %v4263_v20 = vld [vmem:[%s7576_s2 + $0xe0] sm:$0xf]  ;;  %v4324_v55 = vld [vmem:[%s7576_s2 + $0xc4] sm:$0xf] }
 0x1b2   :  { %vm1171_vm5 = vcmp.eq.f32.partialorder %v1170_v61, 8.507059e+37  ;;  %v1270_v46 = vand.u32 2147483647, %v1260_v17  ;;  %v1273_v10 = vor.u32 1.1754944e-38, %v1272_v54  ;;  %v5029_v54 = vld [vmem:[%s7576_s2 + $0xb4] sm:$0xf0] }
 0x1b3   :  { %v985_v25 = vmul.f32 %v5221_v45, %v984_v21  ;;  %v4296_v21 = vld [vmem:[%s7576_s2 + $0xe8] sm:$0xf] }
 0x1b4   :  { %vm1271_vm9 = vcmp.eq.f32.partialorder %v1270_v46, 8.507059e+37  ;;  %v4320_v46 = vld [vmem:[%s7576_s2 + $0xa4] sm:$0xf] }
 0x1b5   :  { %v5223_v26 = vpop.eup %5222  ;;  %v986_v31 = vadd.f32 %v5221_v45, %v985_v25  ;;  %v5031_v25 = vld [vmem:[%s7576_s2 + $0xf4] sm:$0xf0] }
 0x1b6   :  { %v5225_v48 = vpop.eup %5224  ;;  %v1162_v32 = vmul.f32 %v5223_v26, %v1160_v13  ;;  %vm1167_vm2 = vweird.f32 %v5223_v26 }
 0x1b7   :  { %v990_v33 = vsel %vm989_vm15, %v5221_v45, %v986_v31  ;;  %v1262_v35 = vmul.f32 %v5225_v48, %v1260_v17  ;;  %v5227_v37 = vpop.eup %5226  ;;  %vm1168_vm4 = vmor %vm1166_vm3, %vm1167_vm2  ;;  %vm1267_vm6 = vweird.f32 %v5225_v48  ;;  %v5023_v17 = vld [vmem:[%s7576_s2 + $0xec] sm:$0xf0]  ;;  %v4297_v31 = vor.u32 %v5031_v25, %v4296_v21  ;;  %v4251_v25 = vld [vmem:[%s7576_s2 + $0x80] sm:$0xf] }
 0x1b8   :  { %v995_v34 = vsel %vm992_vm1, %v994_v38, %v990_v33  ;;  %v1163_v43 = vsub.f32 1.0, %v1162_v32  ;;  %vm1268_vm8 = vmor %vm1266_vm7, %vm1267_vm6  ;;  %v4264_v7 = vor.u32 %v5023_v17, %v4263_v20  ;;  %v4361_v38 = vld [vmem:[%s7576_s2 + $0xec] sm:$0xf]  ;;  %v5047_v32 = vld [vmem:[%s7576_s2 + $0xf8] sm:$0xf0] }
 0x1b9   :  { %v1077_v40 = vmul.f32 %v5227_v37, %v995_v34  ;;  %v1263_v36 = vsub.f32 1.0, %v1262_v35  ;;  %v4362_v33 = vor.u32 %v5047_v32, %v4361_v38  ;;  %1828 = vmatpush.bf16.msra.mxu1 %v4297_v31  ;;  %v4259_v35 = vld [vmem:[%s7576_s2 + $0xc0] sm:$0xf]  ;;  %v5022_v37 = vld [vmem:[%s7576_s2 + $0xcc] sm:$0xf0] }
 0x1ba   :  { %v1164_v42 = vmul.f32 %v5223_v26, %v1163_v43  ;;  %1730 = vmatpush.bf16.msra.mxu0 %v4264_v7  ;;  %v4292_v34 = vld [vmem:[%s7576_s2 + $0xc8] sm:$0xf]  ;;  %v4260_v43 = vor.u32 %v5022_v37, %v4259_v35  ;;  %v5036_v38 = vld [vmem:[%s7576_s2 + $0x90] sm:$0xf0]  ;;  %v4349_v37 = vld [vmem:[%s7576_s2 + $0x8c] sm:$0xf] }
 0x1bb   :  { %v1264_v44 = vmul.f32 %v5225_v48, %v1263_v36  ;;  %2009 = vmatpush.bf16.msra.mxu3 %v4362_v33 }
 0x1bc   :  { %v1165_v49 = vadd.f32 %v5223_v26, %v1164_v42  ;;  %v5038_v42 = vld [vmem:[%s7576_s2 + $0xd0] sm:$0xf0] }
 0x1bd   :  { %v1265_v59 = vadd.f32 %v5225_v48, %v1264_v44  ;;  %v4325_v36 = vor.u32 %v5038_v42, %v4324_v55  ;;  %v5021_v44 = vld [vmem:[%s7576_s2 + $0xac] sm:$0xf0]  ;;  %v4280_v42 = vld [vmem:[%s7576_s2 + $0x68] sm:$0xf] }
 0x1be   :  { %v1169_v41 = vsel %vm1168_vm4, %v5223_v26, %v1165_v49  ;;  %v5039_v26 = vld [vmem:[%s7576_s2 + $0xf0] sm:$0xf0]  ;;  %v4357_v49 = vld [vmem:[%s7576_s2 + $0xcc] sm:$0xf]  ;;  %1731 = vmatpush.bf16.msra.mxu0 %v4260_v43  ;;  %v5019_v55 = vld [vmem:[%s7576_s2 + $0x6c] sm:$0xf0] }
 0x1bf   :  { %v1174_v52 = vsel %vm1171_vm5, %v1173_v27, %v1169_v41  ;;  %v1269_v9 = vsel %vm1268_vm8, %v5225_v48, %v1265_v59  ;;  %v4329_v48 = vor.u32 %v5039_v26, %v4328_v30  ;;  %v5046_v27 = vld [vmem:[%s7576_s2 + $0xd8] sm:$0xf0]  ;;  %v5020_v30 = vld [vmem:[%s7576_s2 + $0x8c] sm:$0xf0]  ;;  %v4284_v26 = vld [vmem:[%s7576_s2 + $0x88] sm:$0xf] }
 0x1c0   :  { %v1176_v39 = vmul.f32 %v1174_v52, %v6194_v23  ;;  %v1274_v45 = vsel %vm1271_vm9, %v1273_v10, %v1269_v9  ;;  %v4358_v41 = vor.u32 %v5046_v27, %v4357_v49  ;;  %v4255_v52 = vld [vmem:[%s7576_s2 + $0xa0] sm:$0xf]  ;;  %v5037_v9 = vld [vmem:[%s7576_s2 + $0xb0] sm:$0xf0]  ;;  %v4252_v31 = vor.u32 %v5020_v30, %v4251_v25  ;;  %v4312_v49 = vld [vmem:[%s7576_s2 + $0x64] sm:$0xf] }
 0x1c1   :  { %1909 = vmatpush.bf16.msra.mxu2 %v4329_v48  ;;  %v4256_v59 = vor.u32 %v5021_v44, %v4255_v52  ;;  %v4316_v48 = vld [vmem:[%s7576_s2 + $0x84] sm:$0xf]  ;;  %v5035_v27 = vld [vmem:[%s7576_s2 + $0x70] sm:$0xf0] }
 0x1c2   :  { %v6408_v47 = vadd.f32 %v1176_v39, %v1077_v40  ;;  %v5030_v40 = vld [vmem:[%s7576_s2 + $0xd4] sm:$0xf0]  ;;  %v4288_v39 = vld [vmem:[%s7576_s2 + $0xa8] sm:$0xf]  ;;  %2010 = vmatpush.bf16.msra.mxu3 %v4358_v41  ;;  %v4317_v35 = vor.u32 %v5036_v38, %v4316_v48  ;;  %v4308_v25 = vld [vmem:[%s7576_s2 + $0x44] sm:$0xf] }
 0x1c3   :  { %v4293_v61 = vor.u32 %v5030_v40, %v4292_v34  ;;  %v4289_v10 = vor.u32 %v5029_v54, %v4288_v39  ;;  %1732 = vmatpush.bf16.msra.mxu0 %v4256_v59  ;;  %v5044_v34 = vld [vmem:[%s7576_s2 + $0x98] sm:$0xf0]  ;;  %v4247_v40 = vld [vmem:[%s7576_s2 + $0x60] sm:$0xf]  ;;  %v4313_v39 = vor.u32 %v5035_v27, %v4312_v49  ;;  %v4345_v59 = vld [vmem:[%s7576_s2 + $0x6c] sm:$0xf] }
 0x1c4   :  { %5228 = vtanh.f32 %v6408_v47  ;;  %v4350_v43 = vor.u32 %v5044_v34, %v4349_v37  ;;  %v5043_v54 = vld [vmem:[%s7576_s2 + $0x78] sm:$0xf0]  ;;  %v5034_v30 = vld [vmem:[%s7576_s2 + $0x50] sm:$0xf0]  ;;  %v5017_v37 = vld [vmem:[%s7576_s2 + $0x2c] sm:$0xf0] }
 0x1c5   :  { %1829 = vmatpush.bf16.msra.mxu1 %v4293_v61  ;;  %1910 = vmatpush.bf16.msra.mxu2 %v4325_v36  ;;  %v4248_v61 = vor.u32 %v5019_v55, %v4247_v40  ;;  %v5027_v36 = vld [vmem:[%s7576_s2 + $0x74] sm:$0xf0]  ;;  %v4309_v48 = vor.u32 %v5034_v30, %v4308_v25  ;;  %v5042_v38 = vld [vmem:[%s7576_s2 + $0x58] sm:$0xf0]  ;;  %v4272_v34 = vld [vmem:[%s7576_s2 + $0x28] sm:$0xf] }
 0x1c6   :  { %v4281_v44 = vor.u32 %v5027_v36, %v4280_v42  ;;  %v5025_v55 = vld [vmem:[%s7576_s2 + $0x34] sm:$0xf0]  ;;  %v4304_v42 = vld [vmem:[%s7576_s2 + $0x24] sm:$0xf]  ;;  %v5033_v36 = vld [vmem:[%s7576_s2 + $0x30] sm:$0xf0] }
 0x1c7   :  { %1733 = vmatpush.bf16.msra.mxu0 %v4252_v31  ;;  %v4337_v49 = vld [vmem:[%s7576_s2 + $0x2c] sm:$0xf]  ;;  %v5041_v27 = vld [vmem:[%s7576_s2 + $0x38] sm:$0xf0] }
 0x1c9   :  { %1830 = vmatpush.bf16.msra.mxu1 %v4289_v10 }
 0x1ca   :  { %v5229_v13 = vpop.eup %5228 }
 0x1cb   :  { %v6411_v16 = vmul.f32 %v5229_v13, %v1274_v45  ;;  %v4321_v13 = vor.u32 %v5037_v9, %v4320_v46  ;;  %v4353_v45 = vld [vmem:[%s7576_s2 + $0xac] sm:$0xf]  ;;  %v4243_v46 = vld [vmem:[%s7576_s2 + $0x40] sm:$0xf]  ;;  %1734 = vmatpush.bf16.msra.mxu0 %v4248_v61  ;;  %v4273_v61 = vor.u32 %v5025_v55, %v4272_v34 }
 0x1cd   :  { %v1280_v23 = vpack.c.bf16 %v6411_v16, %v6411_v16  ;;  %1911 = vmatpush.bf16.msra.mxu2 %v4321_v13 }
 0x1cf   :  { %1355 = vmatmul.bf16.vlgmr.msrb.gmra.mxu0 %v1280_v23  ;;  %1453 = vmatmul.bf16.vlgmr.msrb.gmra.mxu1 %v1280_v23 }
 0x1d0   :  { %1534 = vmatmul.bf16.vlgmr.msrb.gmra.mxu2 %v1280_v23  ;;  %1634 = vmatmul.bf16.vlgmr.msrb.gmra.mxu3 %v1280_v23  ;;  %v5045_v23 = vld [vmem:[%s7576_s2 + $0xb8] sm:$0xf0] }
 0x1d1   :  { %v4354_v21 = vor.u32 %v5045_v23, %v4353_v45  ;;  %1912 = vmatpush.bf16.msra.mxu2 %v4317_v35  ;;  %v4346_v23 = vor.u32 %v5043_v54, %v4345_v59  ;;  %v4239_v35 = vld [vmem:[%s7576_s2 + $0x20] sm:$0xf]  ;;  %v4338_v59 = vor.u32 %v5041_v27, %v4337_v49  ;;  %v5016_v54 = vld [vmem:[%s7576_s2 + $0xc] sm:$0xf0] }
 0x1d2   :  { %v4240_v40 = vor.u32 %v5017_v37, %v4239_v35 }
 0x1d3   :  { %2011 = vmatpush.bf16.msra.mxu3 %v4354_v21  ;;  %v4276_v21 = vld [vmem:[%s7576_s2 + $0x48] sm:$0xf] }
 0x1d5   :  { %1913 = vmatpush.bf16.msra.mxu2 %v4313_v39  ;;  %v4305_v39 = vor.u32 %v5033_v36, %v4304_v42 }
 0x1d7   :  { %2012 = vmatpush.bf16.msra.mxu3 %v4350_v43 }
 0x1d9   :  { %1914 = vmatpush.bf16.msra.mxu2 %v4309_v48 }
 0x1db   :  { %2013 = vmatpush.bf16.msra.mxu3 %v4346_v23 }
 0x1dd   :  { %1915 = vmatpush.bf16.msra.mxu2 %v4305_v39 }
 0x24c   :  { %v1356_v20 = vpop.f32.mrf.mxu0  ;;  %v6487_v17 = vpop.f32.mrf.mxu1 }
 0x24d   :  { %v1360_v7 = vadd.f32 %v1356_v20, %v5913_v62  ;;  %v5028_v62 = vld [vmem:[%s7576_s2 + $0x94] sm:$0xf0]  ;;  %v5018_v20 = vld [vmem:[%s7576_s2 + $0x4c] sm:$0xf0] }
 0x24e   :  { %v4285_v33 = vor.u32 %v5028_v62, %v4284_v26  ;;  %v4341_v26 = vld [vmem:[%s7576_s2 + $0x4c] sm:$0xf] }
 0x24f   :  { %v4134_v32 = vmul.f32 -1.442695, %v1360_v7  ;;  %v5026_v7 = vld [vmem:[%s7576_s2 + $0x54] sm:$0xf0] }
 0x250   :  { %1831 = vmatpush.bf16.msra.mxu1 %v4285_v33  ;;  %v4342_v33 = vor.u32 %v5042_v38, %v4341_v26 }
 0x251   :  { %5230 = vpow2.f32 %v4134_v32 }
 0x252   :  { %2014 = vmatpush.bf16.msra.mxu3 %v4342_v33 }
 0x253   :  { %v1535_v41 = vpop.f32.mrf.mxu2  ;;  %v1635_v52 = vpop.f32.mrf.mxu3 }
 0x254   :  { %v1539_v9 = vadd.f32 %v1535_v41, %v5916_v53  ;;  %v1639_v10 = vadd.f32 %v1635_v52, %v5922_v2  ;;  %v1358_v13 = vpop.f32.mrf.mxu0  ;;  %v1456_v45 = vpop.f32.mrf.mxu1  ;;  %1832 = vmatpush.bf16.msra.mxu1 %v4281_v44  ;;  %v4244_v53 = vor.u32 %v5018_v20, %v4243_v46  ;;  %v4277_v2 = vor.u32 %v5026_v7, %v4276_v21  ;;  %v4235_v41 = vld [vmem:[%s7576_s2] sm:$0xf]  ;;  %v4268_v46 = vld [vmem:[%s7576_s2 + $0x8] sm:$0xf]  ;;  %v4333_v21 = vld [vmem:[%s7576_s2 + $0xc] sm:$0xf] }
 0x255   :  { %v4300_v13 = vld [vmem:[%s7576_s2 + $0x4] sm:$0xf]  ;;  %v5032_v45 = vld [vmem:[%s7576_s2 + $0x10] sm:$0xf0]  ;;  %v5040_v7 = vld [vmem:[%s7576_s2 + $0x18] sm:$0xf0] }
 0x256   :  { %v4199_v31 = vmul.f32 -1.442695, %v1539_v9  ;;  %v4232_v62 = vmul.f32 -1.442695, %v1639_v10  ;;  %1735 = vmatpush.bf16.msra.mxu0 %v4244_v53  ;;  %v5024_v9 = vld [vmem:[%s7576_s2 + $0x14] sm:$0xf0]  ;;  %v4236_v10 = vor.u32 %v5016_v54, %v4235_v41  ;;  %v4301_v20 = vor.u32 %v5032_v45, %v4300_v13  ;;  %2015 = vmatpush.bf16.msra.mxu3 %v4338_v59 }
 0x257   :  { %v5231_v32 = vpop.eup %5230  ;;  %v4269_v23 = vor.u32 %v5024_v9, %v4268_v46 }
 0x258   :  { %v6573_v43 = vadd.f32 1.0, %v5231_v32  ;;  %5232 = vpow2.f32 %v4199_v31  ;;  %1833 = vmatpush.bf16.msra.mxu1 %v4277_v2  ;;  %v4334_v2 = vor.u32 %v5040_v7, %v4333_v21  ;;  %v1458_v31 = vadd.f32 %v6487_v17, %v5919_v1  ;;  %1916 = vmatpush.bf16.msra.mxu2 %v4301_v20 }
 0x259   :  { %5234 = vpow2.f32 %v4232_v62 }
 0x25a   :  { %5236 = vrcp.f32 %v6573_v43  ;;  %1736 = vmatpush.bf16.msra.mxu0 %v4240_v40  ;;  %2016 = vmatpush.bf16.msra.mxu3 %v4334_v2  ;;  %v1376_v32 = vand.u32 2147483648, %v6573_v43  ;;  %v1374_v35 = vand.u32 2147483647, %v6573_v43  ;;  %vm1370_vm11 = vweird.f32 %v6573_v43 }
 0x25b   :  { %v1537_v52 = vpop.f32.mrf.mxu2  ;;  %v1637_v44 = vpop.f32.mrf.mxu3 }
 0x25c   :  { %1834 = vmatpush.bf16.msra.mxu1 %v4273_v61  ;;  %v1377_v17 = vor.u32 1.1754944e-38, %v1376_v32  ;;  %vm1375_vm13 = vcmp.eq.f32.partialorder %v1374_v35, 8.507059e+37  ;;  %v5071_v32 = vld [vmem:[%s7576_s2 + $0xf0] sm:$0xf0] }
 0x25e   :  { %v5233_v53 = vpop.eup %5232  ;;  %1737 = vmatpush.bf16.msra.mxu0 %v4236_v10 }
 0x25f   :  { %v5235_v25 = vpop.eup %5234  ;;  %v1543_v30 = vadd.f32 1.0, %v5233_v53 }
 0x260   :  { %v5237_v26 = vpop.eup %5236  ;;  %v1643_v62 = vadd.f32 1.0, %v5235_v25  ;;  %1835 = vmatpush.bf16.msra.mxu1 %v4269_v23 }
 0x261   :  { %v1366_v48 = vmul.f32 %v5237_v26, %v6573_v43  ;;  %5238 = vrcp.f32 %v1543_v30  ;;  %vm1371_vm10 = vweird.f32 %v5237_v26  ;;  %v1555_v41 = vand.u32 2147483648, %v1543_v30 }
 0x262   :  { %5240 = vrcp.f32 %v1643_v62  ;;  %vm1372_vm12 = vmor %vm1370_vm11, %vm1371_vm10  ;;  %v1553_v44 = vand.u32 2147483647, %v1543_v30  ;;  %vm1549_vm15 = vweird.f32 %v1543_v30  ;;  %v1655_v23 = vand.u32 2147483648, %v1643_v62 }
 0x263   :  { %v1367_v38 = vsub.f32 1.0, %v1366_v48  ;;  %5242 = vtanh.f32 %v1458_v31  ;;  %v1556_v43 = vor.u32 1.1754944e-38, %v1555_v41  ;;  %vm1649_vm4 = vweird.f32 %v1643_v62  ;;  %v4427_v31 = vld [vmem:[%s7576_s2 + $0xe8] sm:$0xf]  ;;  %v5063_v48 = vld [vmem:[%s7576_s2 + $0xf4] sm:$0xf0] }
 0x264   :  { %vm1554_vm2 = vcmp.eq.f32.partialorder %v1553_v44, 8.507059e+37  ;;  %v1653_v20 = vand.u32 2147483647, %v1643_v62  ;;  %v1656_v7 = vor.u32 1.1754944e-38, %v1655_v23  ;;  %v5078_v44 = vld [vmem:[%s7576_s2 + $0xd8] sm:$0xf0] }
 0x265   :  { %v1368_v33 = vmul.f32 %v5237_v26, %v1367_v38  ;;  %v4459_v38 = vld [vmem:[%s7576_s2 + $0xe4] sm:$0xf] }
 0x266   :  { %vm1654_vm6 = vcmp.eq.f32.partialorder %v1653_v20, 8.507059e+37  ;;  %v4460_v35 = vor.u32 %v5071_v32, %v4459_v38  ;;  %v4447_v38 = vld [vmem:[%s7576_s2 + $0x84] sm:$0xf]  ;;  %v5068_v32 = vld [vmem:[%s7576_s2 + $0x90] sm:$0xf0] }
 0x267   :  { %v5239_v37 = vpop.eup %5238  ;;  %v1369_v34 = vadd.f32 %v5237_v26, %v1368_v33  ;;  %v4428_v33 = vor.u32 %v5063_v48, %v4427_v31  ;;  %v5052_v31 = vld [vmem:[%s7576_s2 + $0x8c] sm:$0xf0] }
 0x268   :  { %v5241_v1 = vpop.eup %5240  ;;  %v1545_v40 = vmul.f32 %v5239_v37, %v1543_v30  ;;  %vm1550_vm14 = vweird.f32 %v5239_v37  ;;  %v4394_v30 = vld [vmem:[%s7576_s2 + $0xe0] sm:$0xf]  ;;  %2292 = vmatpush.bf16.msrb.mxu2 %v4460_v35 }
 0x269   :  { %v1373_v55 = vsel %vm1372_vm12, %v5237_v26, %v1369_v34  ;;  %v1645_v42 = vmul.f32 %v5241_v1, %v1643_v62  ;;  %v5243_v61 = vpop.eup %5242  ;;  %vm1551_vm1 = vmor %vm1549_vm15, %vm1550_vm14  ;;  %vm1650_vm3 = vweird.f32 %v5241_v1  ;;  %v5055_v26 = vld [vmem:[%s7576_s2 + $0xec] sm:$0xf0]  ;;  %v5079_v34 = vld [vmem:[%s7576_s2 + $0xf8] sm:$0xf0]  ;;  %2211 = vmatpush.bf16.msrb.mxu1 %v4428_v33 }
 0x26a   :  { %v1378_v36 = vsel %vm1375_vm13, %v1377_v17, %v1373_v55  ;;  %v1546_v49 = vsub.f32 1.0, %v1545_v40  ;;  %vm1651_vm5 = vmor %vm1649_vm4, %vm1650_vm3  ;;  %v4395_v62 = vor.u32 %v5055_v26, %v4394_v30  ;;  %v4390_v17 = vld [vmem:[%s7576_s2 + $0xc0] sm:$0xf]  ;;  %v5054_v40 = vld [vmem:[%s7576_s2 + $0xcc] sm:$0xf0] }
 0x26b   :  { %v1460_v27 = vmul.f32 %v5243_v61, %v1378_v36  ;;  %v1646_v39 = vsub.f32 1.0, %v1645_v42  ;;  %v4423_v55 = vld [vmem:[%s7576_s2 + $0xc8] sm:$0xf]  ;;  %v4391_v42 = vor.u32 %v5054_v40, %v4390_v17  ;;  %v5062_v61 = vld [vmem:[%s7576_s2 + $0xd4] sm:$0xf0] }
 0x26c   :  { %v1547_v52 = vmul.f32 %v5239_v37, %v1546_v49  ;;  %2113 = vmatpush.bf16.msrb.mxu0 %v4395_v62  ;;  %v4455_v36 = vld [vmem:[%s7576_s2 + $0xc4] sm:$0xf]  ;;  %v5070_v49 = vld [vmem:[%s7576_s2 + $0xd0] sm:$0xf0]  ;;  %v4382_v26 = vld [vmem:[%s7576_s2 + $0x80] sm:$0xf] }
 0x26d   :  { %v1647_v9 = vmul.f32 %v5241_v1, %v1646_v39  ;;  %v4456_v41 = vor.u32 %v5070_v49, %v4455_v36  ;;  %v4415_v62 = vld [vmem:[%s7576_s2 + $0x88] sm:$0xf]  ;;  %v4383_v48 = vor.u32 %v5052_v31, %v4382_v26  ;;  %v4378_v40 = vld [vmem:[%s7576_s2 + $0x60] sm:$0xf]  ;;  %v5059_v36 = vld [vmem:[%s7576_s2 + $0x74] sm:$0xf0] }
 0x26e   :  { %v1548_v59 = vadd.f32 %v5239_v37, %v1547_v52  ;;  %v4488_v52 = vld [vmem:[%s7576_s2 + $0xcc] sm:$0xf]  ;;  %v4443_v49 = vld [vmem:[%s7576_s2 + $0x64] sm:$0xf] }
 0x26f   :  { %v1648_v45 = vadd.f32 %v5241_v1, %v1647_v9  ;;  %v4489_v39 = vor.u32 %v5078_v44, %v4488_v52  ;;  %2293 = vmatpush.bf16.msrb.mxu2 %v4456_v41  ;;  %v5061_v9 = vld [vmem:[%s7576_s2 + $0xb4] sm:$0xf0] }
 0x270   :  { %v1552_v54 = vsel %vm1551_vm1, %v5239_v37, %v1548_v59  ;;  %v4492_v37 = vld [vmem:[%s7576_s2 + $0xec] sm:$0xf]  ;;  %2114 = vmatpush.bf16.msrb.mxu0 %v4391_v42  ;;  %v4386_v59 = vld [vmem:[%s7576_s2 + $0xa0] sm:$0xf]  ;;  %v4411_v42 = vld [vmem:[%s7576_s2 + $0x68] sm:$0xf] }
 0x271   :  { %v1557_v46 = vsel %vm1554_vm2, %v1556_v43, %v1552_v54  ;;  %v1652_v21 = vsel %vm1651_vm5, %v5241_v1, %v1648_v45  ;;  %v4493_v1 = vor.u32 %v5079_v34, %v4492_v37  ;;  %v5053_v43 = vld [vmem:[%s7576_s2 + $0xac] sm:$0xf0]  ;;  %v4419_v54 = vld [vmem:[%s7576_s2 + $0xa8] sm:$0xf]  ;;  %v5069_v45 = vld [vmem:[%s7576_s2 + $0xb0] sm:$0xf0]  ;;  %v4448_v37 = vor.u32 %v5068_v32, %v4447_v38 }
 0x272   :  { %v1559_v10 = vmul.f32 %v1557_v46, %v6408_v47  ;;  %v1657_v2 = vsel %vm1654_vm6, %v1656_v7, %v1652_v21  ;;  %v4387_v46 = vor.u32 %v5053_v43, %v4386_v59  ;;  %v4420_v23 = vor.u32 %v5061_v9, %v4419_v54  ;;  %v4484_v21 = vld [vmem:[%s7576_s2 + $0xac] sm:$0xf]  ;;  %v5077_v7 = vld [vmem:[%s7576_s2 + $0xb8] sm:$0xf0]  ;;  %v4374_v54 = vld [vmem:[%s7576_s2 + $0x40] sm:$0xf] }
 0x273   :  { %2392 = vmatpush.bf16.msrb.mxu3 %v4493_v1  ;;  %v4480_v34 = vld [vmem:[%s7576_s2 + $0x8c] sm:$0xf]  ;;  %v5076_v1 = vld [vmem:[%s7576_s2 + $0x98] sm:$0xf0]  ;;  %v4412_v44 = vor.u32 %v5059_v36, %v4411_v42  ;;  %v4370_v32 = vld [vmem:[%s7576_s2 + $0x20] sm:$0xf] }
 0x274   :  { %v6622_v13 = vadd.f32 %v1559_v10, %v1460_v27  ;;  %v4424_v27 = vor.u32 %v5062_v61, %v4423_v55  ;;  %v4451_v10 = vld [vmem:[%s7576_s2 + $0xa4] sm:$0xf]  ;;  %2115 = vmatpush.bf16.msrb.mxu0 %v4387_v46  ;;  %v4481_v17 = vor.u32 %v5076_v1, %v4480_v34  ;;  %v5051_v55 = vld [vmem:[%s7576_s2 + $0x6c] sm:$0xf0]  ;;  %v4476_v59 = vld [vmem:[%s7576_s2 + $0x6c] sm:$0xf] }
 0x275   :  { %v4452_v20 = vor.u32 %v5069_v45, %v4451_v10  ;;  %v4379_v61 = vor.u32 %v5051_v55, %v4378_v40  ;;  %v5075_v43 = vld [vmem:[%s7576_s2 + $0x78] sm:$0xf0]  ;;  %v5057_v1 = vld [vmem:[%s7576_s2 + $0x34] sm:$0xf0]  ;;  %v5065_v55 = vld [vmem:[%s7576_s2 + $0x30] sm:$0xf0] }
 0x276   :  { %5244 = vtanh.f32 %v6622_v13  ;;  %2212 = vmatpush.bf16.msrb.mxu1 %v4424_v27  ;;  %v5067_v27 = vld [vmem:[%s7576_s2 + $0x70] sm:$0xf0]  ;;  %v4468_v42 = vld [vmem:[%s7576_s2 + $0x2c] sm:$0xf]  ;;  %v4366_v36 = vld [vmem:[%s7576_s2] sm:$0xf] }
 0x277   :  { %2393 = vmatpush.bf16.msrb.mxu3 %v4489_v39  ;;  %2294 = vmatpush.bf16.msrb.mxu2 %v4452_v20  ;;  %v4444_v39 = vor.u32 %v5067_v27, %v4443_v49  ;;  %v5050_v20 = vld [vmem:[%s7576_s2 + $0x4c] sm:$0xf0] }
 0x278   :  { %2116 = vmatpush.bf16.msrb.mxu0 %v4383_v48  ;;  %v5074_v48 = vld [vmem:[%s7576_s2 + $0x58] sm:$0xf0] }
 0x27a   :  { %2213 = vmatpush.bf16.msrb.mxu1 %v4420_v23  ;;  %v4477_v23 = vor.u32 %v5075_v43, %v4476_v59  ;;  %v5056_v59 = vld [vmem:[%s7576_s2 + $0x14] sm:$0xf0] }
 0x27b   :  { %2295 = vmatpush.bf16.msrb.mxu2 %v4448_v37 }
 0x27c   :  { %v5245_v53 = vpop.eup %5244  ;;  %2117 = vmatpush.bf16.msrb.mxu0 %v4379_v61  ;;  %v5073_v61 = vld [vmem:[%s7576_s2 + $0x38] sm:$0xf0] }
 0x27d   :  { %v6625_v25 = vmul.f32 %v5245_v53, %v1657_v2 }
 0x27f   :  { %v1663_v47 = vpack.c.bf16 %v6625_v25, %v6625_v25  ;;  %2296 = vmatpush.bf16.msrb.mxu2 %v4444_v39  ;;  %v4399_v39 = vld [vmem:[%s7576_s2 + $0x8] sm:$0xf] }
 0x281   :  { %1738 = vmatmul.bf16.vlgmr.msra.gmra.mxu0 %v1663_v47  ;;  %1836 = vmatmul.bf16.vlgmr.msra.gmra.mxu1 %v1663_v47 }
 0x282   :  { %1917 = vmatmul.bf16.vlgmr.msra.gmra.mxu2 %v1663_v47  ;;  %2017 = vmatmul.bf16.vlgmr.msra.gmra.mxu3 %v1663_v47  ;;  %v4485_v47 = vor.u32 %v5077_v7, %v4484_v21  ;;  %v4407_v21 = vld [vmem:[%s7576_s2 + $0x48] sm:$0xf]  ;;  %v5058_v7 = vld [vmem:[%s7576_s2 + $0x54] sm:$0xf0] }
 0x284   :  { %2394 = vmatpush.bf16.msrb.mxu3 %v4485_v47  ;;  %v5066_v47 = vld [vmem:[%s7576_s2 + $0x50] sm:$0xf0] }
 0x288   :  { %2395 = vmatpush.bf16.msrb.mxu3 %v4481_v17  ;;  %v4435_v17 = vld [vmem:[%s7576_s2 + $0x24] sm:$0xf] }
 0x28c   :  { %2396 = vmatpush.bf16.msrb.mxu3 %v4477_v23  ;;  %v5072_v23 = vld [vmem:[%s7576_s2 + $0x18] sm:$0xf0] }
 0x2fe   :  { %v1739_v53 = vpop.f32.mrf.mxu0  ;;  %v6701_v2 = vpop.f32.mrf.mxu1 }
 0x2ff   :  { %v1743_v30 = vadd.f32 %v1739_v53, %v5925_v5  ;;  %v5060_v5 = vld [vmem:[%s7576_s2 + $0x94] sm:$0xf0]  ;;  %v4439_v53 = vld [vmem:[%s7576_s2 + $0x44] sm:$0xf] }
 0x300   :  { %v4416_v35 = vor.u32 %v5060_v5, %v4415_v62  ;;  %v4440_v62 = vor.u32 %v5066_v47, %v4439_v53  ;;  %v1841_v53 = vadd.f32 %v6701_v2, %v5931_v50 }
 0x301   :  { %v4265_v33 = vmul.f32 -1.442695, %v1743_v30  ;;  %v4472_v30 = vld [vmem:[%s7576_s2 + $0x4c] sm:$0xf] }
 0x302   :  { %2214 = vmatpush.bf16.msrb.mxu1 %v4416_v35  ;;  %v4473_v38 = vor.u32 %v5074_v48, %v4472_v30  ;;  %v4403_v35 = vld [vmem:[%s7576_s2 + $0x28] sm:$0xf]  ;;  %2297 = vmatpush.bf16.msrb.mxu2 %v4440_v62 }
 0x303   :  { %5246 = vpow2.f32 %v4265_v33  ;;  %v5049_v33 = vld [vmem:[%s7576_s2 + $0x2c] sm:$0xf0]  ;;  %v4404_v40 = vor.u32 %v5057_v1, %v4403_v35 }
 0x304   :  { %v4371_v34 = vor.u32 %v5049_v33, %v4370_v32  ;;  %2397 = vmatpush.bf16.msrb.mxu3 %v4473_v38 }
 0x305   :  { %v1918_v41 = vpop.f32.mrf.mxu2  ;;  %v2018_v52 = vpop.f32.mrf.mxu3 }
 0x306   :  { %v1922_v46 = vadd.f32 %v1918_v41, %v5928_v6  ;;  %v2022_v9 = vadd.f32 %v2018_v52, %v5934_v8  ;;  %v1741_v10 = vpop.f32.mrf.mxu0  ;;  %v1839_v45 = vpop.f32.mrf.mxu1  ;;  %2215 = vmatpush.bf16.msrb.mxu1 %v4412_v44  ;;  %v4375_v6 = vor.u32 %v5050_v20, %v4374_v54  ;;  %v4408_v8 = vor.u32 %v5058_v7, %v4407_v21  ;;  %v5048_v44 = vld [vmem:[%s7576_s2 + $0xc] sm:$0xf0]  ;;  %v4431_v54 = vld [vmem:[%s7576_s2 + $0x4] sm:$0xf] }
 0x307   :  { %v4436_v41 = vor.u32 %v5065_v55, %v4435_v17  ;;  %v4469_v52 = vor.u32 %v5073_v61, %v4468_v42  ;;  %v4367_v43 = vor.u32 %v5048_v44, %v4366_v36  ;;  %v4464_v45 = vld [vmem:[%s7576_s2 + $0xc] sm:$0xf] }
 0x308   :  { %v4330_v26 = vmul.f32 -1.442695, %v1922_v46  ;;  %v4363_v31 = vmul.f32 -1.442695, %v2022_v9  ;;  %2118 = vmatpush.bf16.msrb.mxu0 %v4375_v6  ;;  %v5064_v46 = vld [vmem:[%s7576_s2 + $0x10] sm:$0xf0]  ;;  %v4400_v9 = vor.u32 %v5056_v59, %v4399_v39  ;;  %v4465_v21 = vor.u32 %v5072_v23, %v4464_v45 }
 0x309   :  { %v5247_v5 = vpop.eup %5246  ;;  %2298 = vmatpush.bf16.msrb.mxu2 %v4436_v41  ;;  %v4432_v10 = vor.u32 %v5064_v46, %v4431_v54  ;;  %2398 = vmatpush.bf16.msrb.mxu3 %v4469_v52  ;;  %v3590_v54 = vrot.slane %v6197_v57, 4  ;;  %v3588_v46 = vrot.slane %v6625_v25, 4 }
 0x30a   :  { %v6787_v37 = vadd.f32 1.0, %v5247_v5  ;;  %5248 = vpow2.f32 %v4330_v26  ;;  %2216 = vmatpush.bf16.msrb.mxu1 %v4408_v8 }
 0x30b   :  { %5250 = vpow2.f32 %v4363_v31 }
 0x30c   :  { %5252 = vrcp.f32 %v6787_v37  ;;  %2119 = vmatpush.bf16.msrb.mxu0 %v4371_v34  ;;  %v1759_v31 = vand.u32 2147483648, %v6787_v37  ;;  %v1757_v48 = vand.u32 2147483647, %v6787_v37  ;;  %vm1753_vm8 = vweird.f32 %v6787_v37 }
 0x30d   :  { %v1920_v49 = vpop.f32.mrf.mxu2  ;;  %v2020_v27 = vpop.f32.mrf.mxu3  ;;  %2299 = vmatpush.bf16.msrb.mxu2 %v4432_v10  ;;  %2399 = vmatpush.bf16.msrb.mxu3 %v4465_v21  ;;  %v3591_v10 = vsel %vm48_vm0, %v6625_v25, %v3590_v54  ;;  %v5102_v54 = vld [vmem:[%s7576_s2 + $0xd0] sm:$0xf0] }
 0x30e   :  { %2217 = vmatpush.bf16.msrb.mxu1 %v4404_v40  ;;  %v1760_v2 = vor.u32 1.1754944e-38, %v1759_v31  ;;  %vm1758_vm10 = vcmp.eq.f32.partialorder %v1757_v48, 8.507059e+37  ;;  %v3599_v21 = vperm.slane %v3591_v10, %v5617_v56  ;;  %v4619_v10 = vld [vmem:[%s7576_s2 + $0xcc] sm:$0xf] }
 0x310   :  { %v5249_v20 = vpop.eup %5248  ;;  %2120 = vmatpush.bf16.msrb.mxu0 %v4367_v43  ;;  %v3650_v25 = vrot.slane %v3599_v21, 4 }
 0x311   :  { %v5251_v7 = vpop.eup %5250  ;;  %v1926_v6 = vadd.f32 1.0, %v5249_v20 }
 0x312   :  { %v5253_v8 = vpop.eup %5252  ;;  %v2026_v47 = vadd.f32 1.0, %v5251_v7  ;;  %2218 = vmatpush.bf16.msrb.mxu1 %v4400_v9 }
 0x313   :  { %v1749_v30 = vmul.f32 %v5253_v8, %v6787_v37  ;;  %5254 = vrcp.f32 %v1926_v6  ;;  %vm1754_vm7 = vweird.f32 %v5253_v8  ;;  %v1938_v55 = vand.u32 2147483648, %v1926_v6 }
 0x314   :  { %5256 = vrcp.f32 %v2026_v47  ;;  %vm1755_vm9 = vmor %vm1753_vm8, %vm1754_vm7  ;;  %v1936_v61 = vand.u32 2147483647, %v1926_v6  ;;  %vm1932_vm12 = vweird.f32 %v1926_v6  ;;  %v2038_v43 = vand.u32 2147483648, %v2026_v47 }
 0x315   :  { %v1750_v26 = vsub.f32 1.0, %v1749_v30  ;;  %5258 = vtanh.f32 %v1841_v53  ;;  %v1939_v37 = vor.u32 1.1754944e-38, %v1938_v55  ;;  %vm2032_vm1 = vweird.f32 %v2026_v47  ;;  %v5103_v55 = vld [vmem:[%s7576_s2 + $0xf0] sm:$0xf0] }
 0x316   :  { %vm1937_vm14 = vcmp.eq.f32.partialorder %v1936_v61, 8.507059e+37  ;;  %v2036_v9 = vand.u32 2147483647, %v2026_v47  ;;  %v2039_v23 = vor.u32 1.1754944e-38, %v2038_v43  ;;  %v4586_v43 = vld [vmem:[%s7576_s2 + $0xc4] sm:$0xf] }
 0x317   :  { %v1751_v62 = vmul.f32 %v5253_v8, %v1750_v26 }
 0x318   :  { %vm2037_vm3 = vcmp.eq.f32.partialorder %v2036_v9, 8.507059e+37  ;;  %v4587_v9 = vor.u32 %v5102_v54, %v4586_v43 }
 0x319   :  { %v5255_v5 = vpop.eup %5254  ;;  %v1752_v38 = vadd.f32 %v5253_v8, %v1751_v62 }
 0x31a   :  { %v5257_v50 = vpop.eup %5256  ;;  %v1928_v32 = vmul.f32 %v5255_v5, %v1926_v6  ;;  %vm1933_vm11 = vweird.f32 %v5255_v5  ;;  %v3602_v6 = vrot.slane %v6411_v16, 4 }
 0x31b   :  { %v1756_v33 = vsel %vm1755_vm9, %v5253_v8, %v1752_v38  ;;  %v2028_v35 = vmul.f32 %v5257_v50, %v2026_v47  ;;  %v5259_v34 = vpop.eup %5258  ;;  %vm1934_vm13 = vmor %vm1932_vm12, %vm1933_vm11  ;;  %vm2033_vm15 = vweird.f32 %v5257_v50 }
 0x31c   :  { %v1761_v1 = vsel %vm1758_vm10, %v1760_v2, %v1756_v33  ;;  %v1929_v17 = vsub.f32 1.0, %v1928_v32  ;;  %vm2034_vm2 = vmor %vm2032_vm1, %vm2033_vm15 }
 0x31d   :  { %v1843_v40 = vmul.f32 %v5259_v34, %v1761_v1  ;;  %v2029_v36 = vsub.f32 1.0, %v2028_v35  ;;  %v5087_v35 = vld [vmem:[%s7576_s2 + $0xec] sm:$0xf0]  ;;  %v4558_v34 = vld [vmem:[%s7576_s2 + $0xe8] sm:$0xf] }
 0x31e   :  { %v1930_v42 = vmul.f32 %v5255_v5, %v1929_v17  ;;  %v5095_v17 = vld [vmem:[%s7576_s2 + $0xf4] sm:$0xf0] }
 0x31f   :  { %v2030_v52 = vmul.f32 %v5257_v50, %v2029_v36  ;;  %v4623_v36 = vld [vmem:[%s7576_s2 + $0xec] sm:$0xf] }
 0x320   :  { %v1931_v49 = vadd.f32 %v5255_v5, %v1930_v42  ;;  %v4559_v42 = vor.u32 %v5095_v17, %v4558_v34  ;;  %v4578_v34 = vld [vmem:[%s7576_s2 + $0x84] sm:$0xf] }
 0x321   :  { %v2031_v59 = vadd.f32 %v5257_v50, %v2030_v52  ;;  %v4554_v52 = vld [vmem:[%s7576_s2 + $0xc8] sm:$0xf] }
 0x322   :  { %v1935_v27 = vsel %vm1934_vm13, %v5255_v5, %v1931_v49  ;;  %v5111_v49 = vld [vmem:[%s7576_s2 + $0xf8] sm:$0xf0]  ;;  %2594 = vmatpush.bf16.msra.mxu1 %v4559_v42  ;;  %v4611_v42 = vld [vmem:[%s7576_s2 + $0x8c] sm:$0xf] }
 0x323   :  { %v1940_v41 = vsel %vm1937_vm14, %v1939_v37, %v1935_v27  ;;  %v2035_v45 = vsel %vm2034_vm2, %v5257_v50, %v2031_v59  ;;  %v4624_v37 = vor.u32 %v5111_v49, %v4623_v36  ;;  %v4521_v27 = vld [vmem:[%s7576_s2 + $0xc0] sm:$0xf]  ;;  %v5094_v59 = vld [vmem:[%s7576_s2 + $0xd4] sm:$0xf0] }
 0x324   :  { %v1942_v44 = vmul.f32 %v1940_v41, %v6622_v13  ;;  %v3589_v13 = vsel %vm48_vm0, %v3588_v46, %v6197_v57  ;;  %v2040_v7 = vsel %vm2037_vm3, %v2039_v23, %v2035_v45  ;;  %v5086_v41 = vld [vmem:[%s7576_s2 + $0xcc] sm:$0xf0]  ;;  %v4555_v46 = vor.u32 %v5094_v59, %v4554_v52  ;;  %v5110_v45 = vld [vmem:[%s7576_s2 + $0xd8] sm:$0xf0]  ;;  %v4509_v49 = vld [vmem:[%s7576_s2 + $0x60] sm:$0xf] }
 0x325   :  { %v3595_v53 = vperm.slane %v3589_v13, %v5617_v56  ;;  %2775 = vmatpush.bf16.msra.mxu3 %v4624_v37  ;;  %v4620_v23 = vor.u32 %v5110_v45, %v4619_v10  ;;  %v4517_v13 = vld [vmem:[%s7576_s2 + $0xa0] sm:$0xf]  ;;  %v5083_v37 = vld [vmem:[%s7576_s2 + $0x6c] sm:$0xf0]  ;;  %v5091_v52 = vld [vmem:[%s7576_s2 + $0x74] sm:$0xf0] }
 0x326   :  { %v6836_v39 = vadd.f32 %v1942_v44, %v1843_v40  ;;  %v4590_v40 = vld [vmem:[%s7576_s2 + $0xe4] sm:$0xf]  ;;  %v4522_v44 = vor.u32 %v5086_v41, %v4521_v27  ;;  %2595 = vmatpush.bf16.msra.mxu1 %v4555_v46  ;;  %v4542_v27 = vld [vmem:[%s7576_s2 + $0x68] sm:$0xf]  ;;  %v4510_v41 = vor.u32 %v5083_v37, %v4509_v49  ;;  %v5099_v59 = vld [vmem:[%s7576_s2 + $0x70] sm:$0xf0] }
 0x327   :  { %v3638_v62 = vrot.slane %v3595_v53, 4  ;;  %v4591_v61 = vor.u32 %v5103_v55, %v4590_v40  ;;  %v4543_v46 = vor.u32 %v5091_v52, %v4542_v27  ;;  %v4607_v10 = vld [vmem:[%s7576_s2 + $0x6c] sm:$0xf]  ;;  %v5107_v45 = vld [vmem:[%s7576_s2 + $0x78] sm:$0xf0] }
 0x328   :  { %5260 = vtanh.f32 %v6836_v39  ;;  %v5105_v49 = vld [vmem:[%s7576_s2 + $0x38] sm:$0xf0]  ;;  %v4497_v37 = vld [vmem:[%s7576_s2] sm:$0xf] }
 0x329   :  { %2675 = vmatpush.bf16.msra.mxu2 %v4591_v61  ;;  %2776 = vmatpush.bf16.msra.mxu3 %v4620_v23  ;;  %v5108_v61 = vld [vmem:[%s7576_s2 + $0x98] sm:$0xf0]  ;;  %v4505_v23 = vld [vmem:[%s7576_s2 + $0x40] sm:$0xf] }
 0x32a   :  { %v4612_v36 = vor.u32 %v5108_v61, %v4611_v42  ;;  %v5097_v61 = vld [vmem:[%s7576_s2 + $0x30] sm:$0xf0] }
 0x32d   :  { %2676 = vmatpush.bf16.msra.mxu2 %v4587_v9 }
 0x32e   :  { %v5261_v20 = vpop.eup %5260 }
 0x32f   :  { %v2043_v8 = vmul.f32 %v5261_v20, %v2040_v7  ;;  %v5085_v20 = vld [vmem:[%s7576_s2 + $0xac] sm:$0xf0] }
 0x330   :  { %v4518_v7 = vor.u32 %v5085_v20, %v4517_v13 }
 0x331   :  { %v2046_v47 = vpack.c.bf16 %v2043_v8, %v2043_v8  ;;  %v3600_v30 = vrot.slane %v2043_v8, 4  ;;  %v3603_v26 = vsel %vm48_vm0, %v2043_v8, %v3602_v6  ;;  %v5093_v6 = vld [vmem:[%s7576_s2 + $0xb4] sm:$0xf0]  ;;  %v4582_v8 = vld [vmem:[%s7576_s2 + $0xa4] sm:$0xf] }
 0x332   :  { %v3611_v31 = vperm.slane %v3603_v26, %v5617_v56  ;;  %v4615_v26 = vld [vmem:[%s7576_s2 + $0xac] sm:$0xf] }
 0x333   :  { %2121 = vmatmul.bf16.vlgmr.msrb.gmra.mxu0 %v2046_v47  ;;  %v3601_v57 = vsel %vm48_vm0, %v3600_v30, %v6411_v16  ;;  %2219 = vmatmul.bf16.vlgmr.msrb.gmra.mxu1 %v2046_v47  ;;  %v4525_v16 = vld [vmem:[%s7576_s2 + $0xe0] sm:$0xf] }
 0x334   :  { %v3607_v48 = vperm.slane %v3601_v57, %v5617_v56  ;;  %v3648_v5 = vrot.slane %v3611_v31, 4  ;;  %v6854_v38 = vsel %vm48_vm0, %v3611_v31, %v3650_v25  ;;  %2300 = vmatmul.bf16.vlgmr.msrb.gmra.mxu2 %v2046_v47  ;;  %2400 = vmatmul.bf16.vlgmr.msrb.gmra.mxu3 %v2046_v47  ;;  %v4526_v1 = vor.u32 %v5087_v35, %v4525_v16  ;;  %v5109_v25 = vld [vmem:[%s7576_s2 + $0xb8] sm:$0xf0]  ;;  %v4546_v16 = vld [vmem:[%s7576_s2 + $0x88] sm:$0xf] }
 0x336   :  { %v3636_v50 = vrot.slane %v3607_v48, 4  ;;  %v6857_v2 = vsel %vm48_vm0, %v3607_v48, %v3638_v62  ;;  %v6860_v32 = vsel %vm48_vm0, %v3648_v5, %v3599_v21  ;;  %2496 = vmatpush.bf16.msra.mxu0 %v4526_v1  ;;  %v4550_v21 = vld [vmem:[%s7576_s2 + $0xa8] sm:$0xf]  ;;  %v4616_v62 = vor.u32 %v5109_v25, %v4615_v26  ;;  %v4513_v5 = vld [vmem:[%s7576_s2 + $0x80] sm:$0xf] }
 0x337   :  { %v4551_v47 = vor.u32 %v5093_v6, %v4550_v21  ;;  %v5100_v1 = vld [vmem:[%s7576_s2 + $0x90] sm:$0xf0]  ;;  %v4608_v6 = vor.u32 %v5107_v45, %v4607_v10  ;;  %v4603_v25 = vld [vmem:[%s7576_s2 + $0x4c] sm:$0xf] }
 0x338   :  { %v6863_v33 = vsel %vm48_vm0, %v3636_v50, %v3595_v53  ;;  %v5101_v53 = vld [vmem:[%s7576_s2 + $0xb0] sm:$0xf0]  ;;  %v5084_v50 = vld [vmem:[%s7576_s2 + $0x8c] sm:$0xf0]  ;;  %2777 = vmatpush.bf16.msra.mxu3 %v4616_v62  ;;  %v4579_v55 = vor.u32 %v5100_v1, %v4578_v34  ;;  %v4534_v34 = vld [vmem:[%s7576_s2 + $0x28] sm:$0xf] }
 0x339   :  { %v4583_v30 = vor.u32 %v5101_v53, %v4582_v8  ;;  %2596 = vmatpush.bf16.msra.mxu1 %v4551_v47  ;;  %v4514_v35 = vor.u32 %v5084_v50, %v4513_v5  ;;  %v5082_v8 = vld [vmem:[%s7576_s2 + $0x4c] sm:$0xf0]  ;;  %v4538_v53 = vld [vmem:[%s7576_s2 + $0x48] sm:$0xf]  ;;  %v5090_v47 = vld [vmem:[%s7576_s2 + $0x54] sm:$0xf0] }
 0x33a   :  { %2497 = vmatpush.bf16.msra.mxu0 %v4522_v44  ;;  %v4574_v44 = vld [vmem:[%s7576_s2 + $0x64] sm:$0xf]  ;;  %v5098_v26 = vld [vmem:[%s7576_s2 + $0x50] sm:$0xf0]  ;;  %v5106_v5 = vld [vmem:[%s7576_s2 + $0x58] sm:$0xf0] }
 0x33b   :  { %2677 = vmatpush.bf16.msra.mxu2 %v4583_v30  ;;  %v4575_v9 = vor.u32 %v5099_v59, %v4574_v44  ;;  %v4570_v30 = vld [vmem:[%s7576_s2 + $0x44] sm:$0xf]  ;;  %v5080_v59 = vld [vmem:[%s7576_s2 + $0xc] sm:$0xf0]  ;;  %v5096_v10 = vld [vmem:[%s7576_s2 + $0x10] sm:$0xf0] }
 0x33c   :  { %2778 = vmatpush.bf16.msra.mxu3 %v4612_v36  ;;  %v4599_v36 = vld [vmem:[%s7576_s2 + $0x2c] sm:$0xf] }
 0x33d   :  { %v4600_v44 = vor.u32 %v5105_v49, %v4599_v36 }
 0x33e   :  { %2498 = vmatpush.bf16.msra.mxu0 %v4518_v7 }
 0x33f   :  { %2678 = vmatpush.bf16.msra.mxu2 %v4579_v55  ;;  %v4566_v55 = vld [vmem:[%s7576_s2 + $0x24] sm:$0xf] }
 0x340   :  { %2779 = vmatpush.bf16.msra.mxu3 %v4608_v6  ;;  %v4567_v52 = vor.u32 %v5097_v61, %v4566_v55 }
 0x342   :  { %2499 = vmatpush.bf16.msra.mxu0 %v4514_v35  ;;  %v4501_v35 = vld [vmem:[%s7576_s2 + $0x20] sm:$0xf] }
 0x343   :  { %2679 = vmatpush.bf16.msra.mxu2 %v4575_v9  ;;  %v4562_v9 = vld [vmem:[%s7576_s2 + $0x4] sm:$0xf] }
 0x346   :  { %2500 = vmatpush.bf16.msra.mxu0 %v4510_v41 }
 0x3b0   :  { %v2122_v31 = vpop.f32.mrf.mxu0  ;;  %v6937_v57 = vpop.f32.mrf.mxu1 }
 0x3b1   :  { %v2126_v48 = vadd.f32 %v2122_v31, %v5937_v11  ;;  %v5092_v11 = vld [vmem:[%s7576_s2 + $0x94] sm:$0xf0] }
 0x3b2   :  { %v4547_v40 = vor.u32 %v5092_v11, %v4546_v16  ;;  %v4604_v16 = vor.u32 %v5106_v5, %v4603_v25  ;;  %v5081_v11 = vld [vmem:[%s7576_s2 + $0x2c] sm:$0xf0] }
 0x3b3   :  { %v4396_v17 = vmul.f32 -1.442695, %v2126_v48  ;;  %v4571_v48 = vor.u32 %v5098_v26, %v4570_v30 }
 0x3b4   :  { %2597 = vmatpush.bf16.msra.mxu1 %v4547_v40  ;;  %v5089_v40 = vld [vmem:[%s7576_s2 + $0x34] sm:$0xf0]  ;;  %2780 = vmatpush.bf16.msra.mxu3 %v4604_v16 }
 0x3b5   :  { %5262 = vpow2.f32 %v4396_v17  ;;  %v4502_v17 = vor.u32 %v5081_v11, %v4501_v35  ;;  %2680 = vmatpush.bf16.msra.mxu2 %v4571_v48  ;;  %v4535_v42 = vor.u32 %v5089_v40, %v4534_v34 }
 0x3b7   :  { %v2301_v43 = vpop.f32.mrf.mxu2  ;;  %v2401_v54 = vpop.f32.mrf.mxu3 }
 0x3b8   :  { %v2305_v13 = vadd.f32 %v2301_v43, %v5940_v12  ;;  %v2405_v20 = vadd.f32 %v2401_v54, %v5946_v15  ;;  %v2124_v21 = vpop.f32.mrf.mxu0  ;;  %v2222_v7 = vpop.f32.mrf.mxu1  ;;  %2598 = vmatpush.bf16.msra.mxu1 %v4543_v46  ;;  %v4506_v12 = vor.u32 %v5082_v8, %v4505_v23  ;;  %v4539_v15 = vor.u32 %v5090_v47, %v4538_v53  ;;  %v4530_v43 = vld [vmem:[%s7576_s2 + $0x8] sm:$0xf]  ;;  %v5088_v54 = vld [vmem:[%s7576_s2 + $0x14] sm:$0xf0] }
 0x3b9   :  { %v4498_v46 = vor.u32 %v5080_v59, %v4497_v37  ;;  %2681 = vmatpush.bf16.msra.mxu2 %v4567_v52  ;;  %v4531_v45 = vor.u32 %v5088_v54, %v4530_v43  ;;  %v4563_v23 = vor.u32 %v5096_v10, %v4562_v9  ;;  %2781 = vmatpush.bf16.msra.mxu3 %v4600_v44 }
 0x3ba   :  { %v4461_v31 = vmul.f32 -1.442695, %v2305_v13  ;;  %v4494_v62 = vmul.f32 -1.442695, %v2405_v20  ;;  %2501 = vmatpush.bf16.msra.mxu0 %v4506_v12  ;;  %v4595_v13 = vld [vmem:[%s7576_s2 + $0xc] sm:$0xf]  ;;  %v2224_v47 = vadd.f32 %v6937_v57, %v5943_v14 }
 0x3bb   :  { %v5263_v50 = vpop.eup %5262  ;;  %v5104_v20 = vld [vmem:[%s7576_s2 + $0x18] sm:$0xf0] }
 0x3bc   :  { %v7023_v1 = vadd.f32 1.0, %v5263_v50  ;;  %5264 = vpow2.f32 %v4461_v31  ;;  %2599 = vmatpush.bf16.msra.mxu1 %v4539_v15  ;;  %v4596_v7 = vor.u32 %v5104_v20, %v4595_v13  ;;  %v5119_v13 = vld [vmem:[%s7576_s2 + $0xec] sm:$0xf0]  ;;  %v4689_v20 = vld [vmem:[%s7576_s2 + $0xe8] sm:$0xf] }
 0x3bd   :  { %5266 = vpow2.f32 %v4494_v62  ;;  %2682 = vmatpush.bf16.msra.mxu2 %v4563_v23  ;;  %v4656_v23 = vld [vmem:[%s7576_s2 + $0xe0] sm:$0xf] }
 0x3be   :  { %5268 = vrcp.f32 %v7023_v1  ;;  %2502 = vmatpush.bf16.msra.mxu0 %v4502_v17  ;;  %2782 = vmatpush.bf16.msra.mxu3 %v4596_v7  ;;  %v2142_v26 = vand.u32 2147483648, %v7023_v1  ;;  %v2140_v31 = vand.u32 2147483647, %v7023_v1  ;;  %vm2136_vm5 = vweird.f32 %v7023_v1  ;;  %v5127_v7 = vld [vmem:[%s7576_s2 + $0xf4] sm:$0xf0] }
 0x3bf   :  { %v2303_v27 = vpop.f32.mrf.mxu2  ;;  %v2403_v41 = vpop.f32.mrf.mxu3 }
 0x3c0   :  { %2600 = vmatpush.bf16.msra.mxu1 %v4535_v42  ;;  %v2143_v57 = vor.u32 1.1754944e-38, %v2142_v26  ;;  %vm2141_vm7 = vcmp.eq.f32.partialorder %v2140_v31, 8.507059e+37  ;;  %v4652_v26 = vld [vmem:[%s7576_s2 + $0xc0] sm:$0xf]  ;;  %v4685_v31 = vld [vmem:[%s7576_s2 + $0xc8] sm:$0xf] }
 0x3c2   :  { %v5265_v21 = vpop.eup %5264  ;;  %2503 = vmatpush.bf16.msra.mxu0 %v4498_v46 }
 0x3c3   :  { %v5267_v6 = vpop.eup %5266  ;;  %v2309_v8 = vadd.f32 1.0, %v5265_v21  ;;  %v4657_v21 = vor.u32 %v5119_v13, %v4656_v23  ;;  %v5132_v23 = vld [vmem:[%s7576_s2 + $0x90] sm:$0xf0] }
 0x3c4   :  { %v5269_v53 = vpop.eup %5268  ;;  %v2409_v12 = vadd.f32 1.0, %v5267_v6  ;;  %2601 = vmatpush.bf16.msra.mxu1 %v4531_v45  ;;  %v4721_v6 = vld [vmem:[%s7576_s2 + $0xe4] sm:$0xf] }
 0x3c5   :  { %v2132_v15 = vmul.f32 %v5269_v53, %v7023_v1  ;;  %5270 = vrcp.f32 %v2309_v8  ;;  %vm2137_vm4 = vweird.f32 %v5269_v53  ;;  %v2321_v40 = vand.u32 2147483648, %v2309_v8 }
 0x3c6   :  { %5272 = vrcp.f32 %v2409_v12  ;;  %vm2138_vm6 = vmor %vm2136_vm5, %vm2137_vm4  ;;  %v2319_v42 = vand.u32 2147483647, %v2309_v8  ;;  %vm2315_vm9 = vweird.f32 %v2309_v8  ;;  %v2421_v59 = vand.u32 2147483648, %v2409_v12  ;;  %2879 = vmatpush.bf16.msrb.mxu0 %v4657_v21 }
 0x3c7   :  { %v2133_v30 = vsub.f32 1.0, %v2132_v15  ;;  %5274 = vtanh.f32 %v2224_v47  ;;  %v2322_v1 = vor.u32 1.1754944e-38, %v2321_v40  ;;  %vm2415_vm13 = vweird.f32 %v2409_v12  ;;  %v5143_v15 = vld [vmem:[%s7576_s2 + $0xf8] sm:$0xf0]  ;;  %v4681_v40 = vld [vmem:[%s7576_s2 + $0xa8] sm:$0xf] }
 0x3c8   :  { %vm2320_vm11 = vcmp.eq.f32.partialorder %v2319_v42, 8.507059e+37  ;;  %v2419_v43 = vand.u32 2147483647, %v2409_v12  ;;  %v2422_v46 = vor.u32 1.1754944e-38, %v2421_v59  ;;  %v5125_v42 = vld [vmem:[%s7576_s2 + $0xb4] sm:$0xf0] }
 0x3c9   :  { %v2134_v25 = vmul.f32 %v5269_v53, %v2133_v30 }
 0x3ca   :  { %vm2420_vm15 = vcmp.eq.f32.partialorder %v2419_v43, 8.507059e+37 }
 0x3cb   :  { %v5271_v62 = vpop.eup %5270  ;;  %v2135_v48 = vadd.f32 %v5269_v53, %v2134_v25  ;;  %v5118_v25 = vld [vmem:[%s7576_s2 + $0xcc] sm:$0xf0] }
 0x3cc   :  { %v5273_v14 = vpop.eup %5272  ;;  %v2311_v5 = vmul.f32 %v5271_v62, %v2309_v8  ;;  %vm2316_vm8 = vweird.f32 %v5271_v62  ;;  %v5135_v8 = vld [vmem:[%s7576_s2 + $0xf0] sm:$0xf0] }
 0x3cd   :  { %v2139_v50 = vsel %vm2138_vm6, %v5269_v53, %v2135_v48  ;;  %v2411_v16 = vmul.f32 %v5273_v14, %v2409_v12  ;;  %v5275_v35 = vpop.eup %5274  ;;  %vm2317_vm10 = vmor %vm2315_vm9, %vm2316_vm8  ;;  %vm2416_vm12 = vweird.f32 %v5273_v14  ;;  %v4690_v53 = vor.u32 %v5127_v7, %v4689_v20  ;;  %v4754_v12 = vld [vmem:[%s7576_s2 + $0xec] sm:$0xf]  ;;  %v5126_v48 = vld [vmem:[%s7576_s2 + $0xd4] sm:$0xf0] }
 0x3ce   :  { %v2144_v11 = vsel %vm2141_vm7, %v2143_v57, %v2139_v50  ;;  %v2312_v34 = vsub.f32 1.0, %v2311_v5  ;;  %vm2417_vm14 = vmor %vm2415_vm13, %vm2416_vm12  ;;  %v4722_v47 = vor.u32 %v5135_v8, %v4721_v6  ;;  %v4755_v30 = vor.u32 %v5143_v15, %v4754_v12  ;;  %v5134_v57 = vld [vmem:[%s7576_s2 + $0xd0] sm:$0xf0]  ;;  %v4742_v7 = vld [vmem:[%s7576_s2 + $0x8c] sm:$0xf] }
 0x3cf   :  { %v2226_v17 = vmul.f32 %v5275_v35, %v2144_v11  ;;  %v2412_v61 = vsub.f32 1.0, %v2411_v16  ;;  %2977 = vmatpush.bf16.msrb.mxu1 %v4690_v53  ;;  %v4686_v5 = vor.u32 %v5126_v48, %v4685_v31  ;;  %v4750_v16 = vld [vmem:[%s7576_s2 + $0xcc] sm:$0xf]  ;;  %v5142_v35 = vld [vmem:[%s7576_s2 + $0xd8] sm:$0xf0] }
 0x3d0   :  { %v2313_v55 = vmul.f32 %v5271_v62, %v2312_v34  ;;  %3058 = vmatpush.bf16.msrb.mxu2 %v4722_v47  ;;  %3158 = vmatpush.bf16.msrb.mxu3 %v4755_v30  ;;  %v4751_v11 = vor.u32 %v5142_v35, %v4750_v16  ;;  %v4648_v34 = vld [vmem:[%s7576_s2 + $0xa0] sm:$0xf]  ;;  %v5140_v6 = vld [vmem:[%s7576_s2 + $0x98] sm:$0xf0]  ;;  %v5115_v47 = vld [vmem:[%s7576_s2 + $0x6c] sm:$0xf0] }
 0x3d1   :  { %v2413_v27 = vmul.f32 %v5273_v14, %v2412_v61  ;;  %v4713_v61 = vld [vmem:[%s7576_s2 + $0xa4] sm:$0xf]  ;;  %v4743_v8 = vor.u32 %v5140_v6, %v4742_v7  ;;  %v4640_v53 = vld [vmem:[%s7576_s2 + $0x60] sm:$0xf]  ;;  %v4673_v12 = vld [vmem:[%s7576_s2 + $0x68] sm:$0xf] }
 0x3d2   :  { %v2314_v36 = vadd.f32 %v5271_v62, %v2313_v55  ;;  %v4641_v15 = vor.u32 %v5115_v47, %v4640_v53  ;;  %v5123_v30 = vld [vmem:[%s7576_s2 + $0x74] sm:$0xf0]  ;;  %v5137_v7 = vld [vmem:[%s7576_s2 + $0x38] sm:$0xf0]  ;;  %v4628_v6 = vld [vmem:[%s7576_s2] sm:$0xf] }
 0x3d3   :  { %v2414_v44 = vadd.f32 %v5273_v14, %v2413_v27  ;;  %2978 = vmatpush.bf16.msrb.mxu1 %v4686_v5  ;;  %v5141_v27 = vld [vmem:[%s7576_s2 + $0xb8] sm:$0xf0]  ;;  %v4674_v48 = vor.u32 %v5123_v30, %v4673_v12  ;;  %v4661_v30 = vld [vmem:[%s7576_s2 + $0x8] sm:$0xf] }
 0x3d4   :  { %v2318_v49 = vsel %vm2317_vm10, %v5271_v62, %v2314_v36  ;;  %v4653_v62 = vor.u32 %v5118_v25, %v4652_v26  ;;  %3159 = vmatpush.bf16.msrb.mxu3 %v4751_v11  ;;  %v5133_v36 = vld [vmem:[%s7576_s2 + $0xb0] sm:$0xf0]  ;;  %v4705_v26 = vld [vmem:[%s7576_s2 + $0x64] sm:$0xf]  ;;  %v5139_v5 = vld [vmem:[%s7576_s2 + $0x78] sm:$0xf0] }
 0x3d5   :  { %v2323_v37 = vsel %vm2320_vm11, %v2322_v1, %v2318_v49  ;;  %v2418_v54 = vsel %vm2417_vm14, %v5273_v14, %v2414_v44  ;;  %v4717_v14 = vld [vmem:[%s7576_s2 + $0xc4] sm:$0xf]  ;;  %v4682_v1 = vor.u32 %v5125_v42, %v4681_v40  ;;  %v4714_v49 = vor.u32 %v5133_v36, %v4713_v61  ;;  %v5131_v25 = vld [vmem:[%s7576_s2 + $0x70] sm:$0xf0]  ;;  %v5114_v40 = vld [vmem:[%s7576_s2 + $0x4c] sm:$0xf0] }
 0x3d6   :  { %v2325_v41 = vmul.f32 %v2323_v37, %v6836_v39  ;;  %v2423_v10 = vsel %vm2420_vm15, %v2422_v46, %v2418_v54  ;;  %v4718_v50 = vor.u32 %v5134_v57, %v4717_v14  ;;  %2880 = vmatpush.bf16.msrb.mxu0 %v4653_v62  ;;  %v4746_v37 = vld [vmem:[%s7576_s2 + $0xac] sm:$0xf]  ;;  %v4644_v54 = vld [vmem:[%s7576_s2 + $0x80] sm:$0xf]  ;;  %v5116_v46 = vld [vmem:[%s7576_s2 + $0x8c] sm:$0xf0]  ;;  %v4706_v14 = vor.u32 %v5131_v25, %v4705_v26 }
 0x3d7   :  { %v4747_v59 = vor.u32 %v5141_v27, %v4746_v37  ;;  %2979 = vmatpush.bf16.msrb.mxu1 %v4682_v1  ;;  %v4738_v57 = vld [vmem:[%s7576_s2 + $0x6c] sm:$0xf]  ;;  %v5122_v42 = vld [vmem:[%s7576_s2 + $0x54] sm:$0xf0]  ;;  %v4701_v61 = vld [vmem:[%s7576_s2 + $0x44] sm:$0xf] }
 0x3d8   :  { %v7072_v52 = vadd.f32 %v2325_v41, %v2226_v17  ;;  %3059 = vmatpush.bf16.msrb.mxu2 %v4718_v50  ;;  %v5117_v17 = vld [vmem:[%s7576_s2 + $0xac] sm:$0xf0]  ;;  %v4636_v50 = vld [vmem:[%s7576_s2 + $0x40] sm:$0xf]  ;;  %v5130_v36 = vld [vmem:[%s7576_s2 + $0x50] sm:$0xf0] }
 0x3d9   :  { %v4649_v55 = vor.u32 %v5117_v17, %v4648_v34  ;;  %3160 = vmatpush.bf16.msrb.mxu3 %v4747_v59  ;;  %v4739_v17 = vor.u32 %v5139_v5, %v4738_v57  ;;  %v4734_v1 = vld [vmem:[%s7576_s2 + $0x4c] sm:$0xf]  ;;  %v4702_v27 = vor.u32 %v5130_v36, %v4701_v61  ;;  %v5120_v26 = vld [vmem:[%s7576_s2 + $0x14] sm:$0xf0]  ;;  %v5136_v5 = vld [vmem:[%s7576_s2 + $0x18] sm:$0xf0] }
 0x3da   :  { %5276 = vtanh.f32 %v7072_v52  ;;  %v4726_v57 = vld [vmem:[%s7576_s2 + $0xc] sm:$0xf] }
 0x3db   :  { %2881 = vmatpush.bf16.msrb.mxu0 %v4649_v55  ;;  %v4669_v55 = vld [vmem:[%s7576_s2 + $0x48] sm:$0xf] }
 0x3dc   :  { %3060 = vmatpush.bf16.msrb.mxu2 %v4714_v49 }
 0x3dd   :  { %3161 = vmatpush.bf16.msrb.mxu3 %v4743_v8 }
 0x3e0   :  { %v5277_v9 = vpop.eup %5276 }
 0x3e1   :  { %v7075_v45 = vmul.f32 %v5277_v9, %v2423_v10  ;;  %v4677_v9 = vld [vmem:[%s7576_s2 + $0x88] sm:$0xf]  ;;  %v4645_v10 = vor.u32 %v5116_v46, %v4644_v54  ;;  %3162 = vmatpush.bf16.msrb.mxu3 %v4739_v17  ;;  %v4632_v54 = vld [vmem:[%s7576_s2 + $0x20] sm:$0xf]  ;;  %v5113_v46 = vld [vmem:[%s7576_s2 + $0x2c] sm:$0xf0] }
 0x3e3   :  { %v2429_v39 = vpack.c.bf16 %v7075_v45, %v7075_v45  ;;  %2882 = vmatpush.bf16.msrb.mxu0 %v4645_v10 }
 0x3e5   :  { %2504 = vmatmul.bf16.vlgmr.msra.gmra.mxu0 %v2429_v39  ;;  %2602 = vmatmul.bf16.vlgmr.msra.gmra.mxu1 %v2429_v39 }
 0x3e6   :  { %2683 = vmatmul.bf16.vlgmr.msra.gmra.mxu2 %v2429_v39  ;;  %2783 = vmatmul.bf16.vlgmr.msra.gmra.mxu3 %v2429_v39  ;;  %v4709_v39 = vld [vmem:[%s7576_s2 + $0x84] sm:$0xf] }
 0x3e7   :  { %v4710_v21 = vor.u32 %v5132_v23, %v4709_v39  ;;  %2883 = vmatpush.bf16.msrb.mxu0 %v4641_v15  ;;  %v5121_v39 = vld [vmem:[%s7576_s2 + $0x34] sm:$0xf0]  ;;  %v4697_v23 = vld [vmem:[%s7576_s2 + $0x24] sm:$0xf]  ;;  %v5112_v15 = vld [vmem:[%s7576_s2 + $0xc] sm:$0xf0] }
 0x3e8   :  { %v4629_v25 = vor.u32 %v5112_v15, %v4628_v6 }
 0x3e9   :  { %3061 = vmatpush.bf16.msrb.mxu2 %v4710_v21  ;;  %v4730_v21 = vld [vmem:[%s7576_s2 + $0x2c] sm:$0xf] }
 0x3ea   :  { %v4731_v12 = vor.u32 %v5137_v7, %v4730_v21 }
 0x3ed   :  { %3062 = vmatpush.bf16.msrb.mxu2 %v4706_v14 }
 0x3f1   :  { %3063 = vmatpush.bf16.msrb.mxu2 %v4702_v27 }
 0x462   :  { %v2505_v41 = vpop.f32.mrf.mxu0  ;;  %v7151_v44 = vpop.f32.mrf.mxu1 }
 0x463   :  { %v2509_v43 = vadd.f32 %v2505_v41, %v5949_v51  ;;  %v5124_v51 = vld [vmem:[%s7576_s2 + $0x94] sm:$0xf0]  ;;  %v5138_v41 = vld [vmem:[%s7576_s2 + $0x58] sm:$0xf0]  ;;  %v2607_v17 = vadd.f32 %v7151_v44, %v5955_v22 }
 0x464   :  { %v4678_v20 = vor.u32 %v5124_v51, %v4677_v9  ;;  %v4665_v9 = vld [vmem:[%s7576_s2 + $0x28] sm:$0xf]  ;;  %v4633_v51 = vor.u32 %v5113_v46, %v4632_v54 }
 0x465   :  { %v4527_v13 = vmul.f32 -1.442695, %v2509_v43  ;;  %v4735_v43 = vor.u32 %v5138_v41, %v4734_v1 }
 0x466   :  { %2980 = vmatpush.bf16.msrb.mxu1 %v4678_v20  ;;  %v5129_v20 = vld [vmem:[%s7576_s2 + $0x30] sm:$0xf0] }
 0x467   :  { %5278 = vpow2.f32 %v4527_v13  ;;  %v4666_v13 = vor.u32 %v5121_v39, %v4665_v9  ;;  %3163 = vmatpush.bf16.msrb.mxu3 %v4735_v43  ;;  %v4698_v47 = vor.u32 %v5129_v20, %v4697_v23 }
 0x469   :  { %v2684_v31 = vpop.f32.mrf.mxu2  ;;  %v2784_v62 = vpop.f32.mrf.mxu3  ;;  %3064 = vmatpush.bf16.msrb.mxu2 %v4698_v47 }
 0x46a   :  { %v2688_v16 = vadd.f32 %v2684_v31, %v5952_v18  ;;  %v2788_v35 = vadd.f32 %v2784_v62, %v5958_v24  ;;  %v2507_v11 = vpop.f32.mrf.mxu0  ;;  %v2605_v34 = vpop.f32.mrf.mxu1  ;;  %2981 = vmatpush.bf16.msrb.mxu1 %v4674_v48  ;;  %v4637_v18 = vor.u32 %v5114_v40, %v4636_v50  ;;  %v4670_v24 = vor.u32 %v5122_v42, %v4669_v55  ;;  %v4693_v31 = vld [vmem:[%s7576_s2 + $0x4] sm:$0xf]  ;;  %v5128_v62 = vld [vmem:[%s7576_s2 + $0x10] sm:$0xf0] }
 0x46b   :  { %v4662_v48 = vor.u32 %v5120_v26, %v4661_v30  ;;  %v4694_v14 = vor.u32 %v5128_v62, %v4693_v31  ;;  %3164 = vmatpush.bf16.msrb.mxu3 %v4731_v12  ;;  %v4787_v31 = vld [vmem:[%s7576_s2 + $0xe0] sm:$0xf]  ;;  %v5151_v62 = vld [vmem:[%s7576_s2 + $0xec] sm:$0xf0] }
 0x46c   :  { %v4592_v49 = vmul.f32 -1.442695, %v2688_v16  ;;  %v4625_v37 = vmul.f32 -1.442695, %v2788_v35  ;;  %2884 = vmatpush.bf16.msrb.mxu0 %v4637_v18  ;;  %v4727_v16 = vor.u32 %v5136_v5, %v4726_v57  ;;  %v5159_v57 = vld [vmem:[%s7576_s2 + $0xf4] sm:$0xf0] }
 0x46d   :  { %v5279_v59 = vpop.eup %5278  ;;  %3065 = vmatpush.bf16.msrb.mxu2 %v4694_v14  ;;  %v4788_v14 = vor.u32 %v5151_v62, %v4787_v31  ;;  %v4852_v5 = vld [vmem:[%s7576_s2 + $0xe4] sm:$0xf]  ;;  %v4873_v62 = vld [vmem:[%s7576_s2 + $0x8c] sm:$0xf] }
 0x46e   :  { %v7237_v10 = vadd.f32 1.0, %v5279_v59  ;;  %5280 = vpow2.f32 %v4592_v49  ;;  %2982 = vmatpush.bf16.msrb.mxu1 %v4670_v24 }
 0x46f   :  { %5282 = vpow2.f32 %v4625_v37  ;;  %3165 = vmatpush.bf16.msrb.mxu3 %v4727_v16 }
 0x470   :  { %5284 = vrcp.f32 %v7237_v10  ;;  %2885 = vmatpush.bf16.msrb.mxu0 %v4633_v51  ;;  %v2525_v18 = vand.u32 2147483648, %v7237_v10  ;;  %v2523_v61 = vand.u32 2147483647, %v7237_v10  ;;  %vm2519_vm2 = vweird.f32 %v7237_v10 }
 0x471   :  { %v2686_v8 = vpop.f32.mrf.mxu2  ;;  %v2786_v53 = vpop.f32.mrf.mxu3 }
 0x472   :  { %2983 = vmatpush.bf16.msrb.mxu1 %v4666_v13  ;;  %v2526_v44 = vor.u32 1.1754944e-38, %v2525_v18  ;;  %vm2524_vm4 = vcmp.eq.f32.partialorder %v2523_v61, 8.507059e+37  ;;  %v4848_v61 = vld [vmem:[%s7576_s2 + $0xc4] sm:$0xf] }
 0x474   :  { %v5281_v50 = vpop.eup %5280  ;;  %2886 = vmatpush.bf16.msrb.mxu0 %v4629_v25 }
 0x475   :  { %v5283_v35 = vpop.eup %5282  ;;  %v2692_v11 = vadd.f32 1.0, %v5281_v50  ;;  %v5167_v50 = vld [vmem:[%s7576_s2 + $0xf0] sm:$0xf0] }
 0x476   :  { %v5285_v34 = vpop.eup %5284  ;;  %v2792_v40 = vadd.f32 1.0, %v5283_v35  ;;  %2984 = vmatpush.bf16.msrb.mxu1 %v4662_v48  ;;  %v4820_v48 = vld [vmem:[%s7576_s2 + $0xe8] sm:$0xf]  ;;  %v4853_v35 = vor.u32 %v5167_v50, %v4852_v5  ;;  %v5147_v5 = vld [vmem:[%s7576_s2 + $0x6c] sm:$0xf0] }
 0x477   :  { %v2515_v55 = vmul.f32 %v5285_v34, %v7237_v10  ;;  %5286 = vrcp.f32 %v2692_v11  ;;  %vm2520_vm1 = vweird.f32 %v5285_v34  ;;  %v2704_v46 = vand.u32 2147483648, %v2692_v11  ;;  %v4804_v50 = vld [vmem:[%s7576_s2 + $0x68] sm:$0xf] }
 0x478   :  { %5288 = vrcp.f32 %v2792_v40  ;;  %vm2521_vm3 = vmor %vm2519_vm2, %vm2520_vm1  ;;  %v2702_v51 = vand.u32 2147483647, %v2692_v11  ;;  %vm2698_vm6 = vweird.f32 %v2692_v11  ;;  %v2804_v53 = vand.u32 2147483648, %v2792_v40  ;;  %3262 = vmatpush.bf16.msra.mxu0 %v4788_v14  ;;  %3441 = vmatpush.bf16.msra.mxu2 %v4853_v35  ;;  %v5155_v35 = vld [vmem:[%s7576_s2 + $0x74] sm:$0xf0] }
 0x479   :  { %v2516_v42 = vsub.f32 1.0, %v2515_v55  ;;  %5290 = vtanh.f32 %v2607_v17  ;;  %v2705_v10 = vor.u32 1.1754944e-38, %v2704_v46  ;;  %vm2798_vm10 = vweird.f32 %v2792_v40  ;;  %v5150_v55 = vld [vmem:[%s7576_s2 + $0xcc] sm:$0xf0]  ;;  %v4844_v46 = vld [vmem:[%s7576_s2 + $0xa4] sm:$0xf] }
 0x47a   :  { %vm2703_vm8 = vcmp.eq.f32.partialorder %v2702_v51, 8.507059e+37  ;;  %v2802_v47 = vand.u32 2147483647, %v2792_v40  ;;  %v2805_v15 = vor.u32 1.1754944e-38, %v2804_v53  ;;  %v4821_v16 = vor.u32 %v5159_v57, %v4820_v48  ;;  %v5148_v53 = vld [vmem:[%s7576_s2 + $0x8c] sm:$0xf0] }
 0x47b   :  { %v2517_v24 = vmul.f32 %v5285_v34, %v2516_v42  ;;  %v4816_v42 = vld [vmem:[%s7576_s2 + $0xc8] sm:$0xf]  ;;  %v5172_v48 = vld [vmem:[%s7576_s2 + $0x98] sm:$0xf0]  ;;  %v4771_v57 = vld [vmem:[%s7576_s2 + $0x60] sm:$0xf] }
 0x47c   :  { %vm2803_vm12 = vcmp.eq.f32.partialorder %v2802_v47, 8.507059e+37  ;;  %3360 = vmatpush.bf16.msra.mxu1 %v4821_v16  ;;  %v4808_v47 = vld [vmem:[%s7576_s2 + $0x88] sm:$0xf]  ;;  %v4874_v14 = vor.u32 %v5172_v48, %v4873_v62  ;;  %v4772_v16 = vor.u32 %v5147_v5, %v4771_v57  ;;  %v5144_v57 = vld [vmem:[%s7576_s2 + $0xc] sm:$0xf0] }
 0x47d   :  { %v5287_v36 = vpop.eup %5286  ;;  %v2518_v1 = vadd.f32 %v5285_v34, %v2517_v24  ;;  %v5158_v24 = vld [vmem:[%s7576_s2 + $0xd4] sm:$0xf0]  ;;  %v4792_v5 = vld [vmem:[%s7576_s2 + $0x8] sm:$0xf] }
 0x47e   :  { %v5289_v22 = vpop.eup %5288  ;;  %v2694_v49 = vmul.f32 %v5287_v36, %v2692_v11  ;;  %vm2699_vm5 = vweird.f32 %v5287_v36  ;;  %v4885_v11 = vld [vmem:[%s7576_s2 + $0xec] sm:$0xf] }
 0x47f   :  { %v2522_v37 = vsel %vm2521_vm3, %v5285_v34, %v2518_v1  ;;  %v2794_v27 = vmul.f32 %v5289_v22, %v2792_v40  ;;  %v5291_v41 = vpop.eup %5290  ;;  %vm2700_vm7 = vmor %vm2698_vm6, %vm2699_vm5  ;;  %vm2799_vm9 = vweird.f32 %v5289_v22  ;;  %v5175_v34 = vld [vmem:[%s7576_s2 + $0xf8] sm:$0xf0]  ;;  %v4783_v40 = vld [vmem:[%s7576_s2 + $0xc0] sm:$0xf]  ;;  %v4817_v1 = vor.u32 %v5158_v24, %v4816_v42 }
 0x480   :  { %v2527_v59 = vsel %vm2524_vm4, %v2526_v44, %v2522_v37  ;;  %v2695_v43 = vsub.f32 1.0, %v2694_v49  ;;  %vm2800_vm11 = vmor %vm2798_vm10, %vm2799_vm9  ;;  %v4886_v17 = vor.u32 %v5175_v34, %v4885_v11  ;;  %v4784_v18 = vor.u32 %v5150_v55, %v4783_v40  ;;  %v4881_v44 = vld [vmem:[%s7576_s2 + $0xcc] sm:$0xf]  ;;  %v5174_v49 = vld [vmem:[%s7576_s2 + $0xd8] sm:$0xf0] }
 0x481   :  { %v2609_v54 = vmul.f32 %v5291_v41, %v2527_v59  ;;  %v2795_v39 = vsub.f32 1.0, %v2794_v27  ;;  %v4882_v37 = vor.u32 %v5174_v49, %v4881_v44  ;;  %3361 = vmatpush.bf16.msra.mxu1 %v4817_v1  ;;  %v4779_v27 = vld [vmem:[%s7576_s2 + $0xa0] sm:$0xf]  ;;  %v5149_v41 = vld [vmem:[%s7576_s2 + $0xac] sm:$0xf0]  ;;  %v4805_v55 = vor.u32 %v5155_v35, %v4804_v50 }
 0x482   :  { %v2696_v9 = vmul.f32 %v5287_v36, %v2695_v43  ;;  %3541 = vmatpush.bf16.msra.mxu3 %v4886_v17  ;;  %3263 = vmatpush.bf16.msra.mxu0 %v4784_v18  ;;  %v4812_v59 = vld [vmem:[%s7576_s2 + $0xa8] sm:$0xf]  ;;  %v4780_v43 = vor.u32 %v5149_v41, %v4779_v27  ;;  %v4836_v11 = vld [vmem:[%s7576_s2 + $0x64] sm:$0xf]  ;;  %v5163_v34 = vld [vmem:[%s7576_s2 + $0x70] sm:$0xf0] }
 0x483   :  { %v2796_v21 = vmul.f32 %v5289_v22, %v2795_v39  ;;  %v4837_v42 = vor.u32 %v5163_v34, %v4836_v11  ;;  %v4869_v18 = vld [vmem:[%s7576_s2 + $0x6c] sm:$0xf]  ;;  %v5171_v24 = vld [vmem:[%s7576_s2 + $0x78] sm:$0xf0]  ;;  %v4800_v27 = vld [vmem:[%s7576_s2 + $0x48] sm:$0xf] }
 0x484   :  { %v2697_v23 = vadd.f32 %v5287_v36, %v2696_v9  ;;  %v5165_v9 = vld [vmem:[%s7576_s2 + $0xb0] sm:$0xf0]  ;;  %v4870_v49 = vor.u32 %v5171_v24, %v4869_v18  ;;  %v5154_v41 = vld [vmem:[%s7576_s2 + $0x54] sm:$0xf0]  ;;  %v4824_v35 = vld [vmem:[%s7576_s2 + $0x4] sm:$0xf] }
 0x485   :  { %v2797_v8 = vadd.f32 %v5289_v22, %v2796_v21  ;;  %v4845_v39 = vor.u32 %v5165_v9, %v4844_v46  ;;  %v5152_v50 = vld [vmem:[%s7576_s2 + $0x14] sm:$0xf0]  ;;  %v5160_v11 = vld [vmem:[%s7576_s2 + $0x10] sm:$0xf0] }
 0x486   :  { %v2701_v13 = vsel %vm2700_vm7, %v5287_v36, %v2697_v23  ;;  %v5166_v36 = vld [vmem:[%s7576_s2 + $0xd0] sm:$0xf0]  ;;  %3542 = vmatpush.bf16.msra.mxu3 %v4882_v37  ;;  %v4877_v23 = vld [vmem:[%s7576_s2 + $0xac] sm:$0xf]  ;;  %3264 = vmatpush.bf16.msra.mxu0 %v4780_v43  ;;  %v5146_v37 = vld [vmem:[%s7576_s2 + $0x4c] sm:$0xf0]  ;;  %v4793_v34 = vor.u32 %v5152_v50, %v4792_v5 }
 0x487   :  { %v2706_v20 = vsel %vm2703_vm8, %v2705_v10, %v2701_v13  ;;  %v2801_v12 = vsel %vm2800_vm11, %v5289_v22, %v2797_v8  ;;  %v4849_v22 = vor.u32 %v5166_v36, %v4848_v61  ;;  %v5173_v10 = vld [vmem:[%s7576_s2 + $0xb8] sm:$0xf0]  ;;  %v4775_v8 = vld [vmem:[%s7576_s2 + $0x80] sm:$0xf]  ;;  %v5162_v43 = vld [vmem:[%s7576_s2 + $0x50] sm:$0xf0] }
 0x488   :  { %v2708_v7 = vmul.f32 %v2706_v20, %v7072_v52  ;;  %v2806_v26 = vsel %vm2803_vm12, %v2805_v15, %v2801_v12  ;;  %v4878_v21 = vor.u32 %v5173_v10, %v4877_v23  ;;  %v4776_v12 = vor.u32 %v5148_v53, %v4775_v8  ;;  %v4840_v15 = vld [vmem:[%s7576_s2 + $0x84] sm:$0xf]  ;;  %v4767_v61 = vld [vmem:[%s7576_s2 + $0x40] sm:$0xf] }
 0x489   :  { %3442 = vmatpush.bf16.msra.mxu2 %v4849_v22 }
 0x48a   :  { %v7286_v6 = vadd.f32 %v2708_v7, %v2609_v54  ;;  %v5157_v54 = vld [vmem:[%s7576_s2 + $0xb4] sm:$0xf0]  ;;  %3543 = vmatpush.bf16.msra.mxu3 %v4878_v21  ;;  %3265 = vmatpush.bf16.msra.mxu0 %v4776_v12  ;;  %v5145_v21 = vld [vmem:[%s7576_s2 + $0x2c] sm:$0xf0]  ;;  %v4828_v12 = vld [vmem:[%s7576_s2 + $0x24] sm:$0xf] }
 0x48b   :  { %v4813_v51 = vor.u32 %v5157_v54, %v4812_v59  ;;  %v4832_v59 = vld [vmem:[%s7576_s2 + $0x44] sm:$0xf]  ;;  %v4865_v54 = vld [vmem:[%s7576_s2 + $0x4c] sm:$0xf] }
 0x48c   :  { %5292 = vtanh.f32 %v7286_v6 }
 0x48d   :  { %3362 = vmatpush.bf16.msra.mxu1 %v4813_v51  ;;  %3443 = vmatpush.bf16.msra.mxu2 %v4845_v39  ;;  %v4833_v51 = vor.u32 %v5162_v43, %v4832_v59  ;;  %v5170_v39 = vld [vmem:[%s7576_s2 + $0x58] sm:$0xf0] }
 0x48e   :  { %3544 = vmatpush.bf16.msra.mxu3 %v4874_v14  ;;  %3266 = vmatpush.bf16.msra.mxu0 %v4772_v16  ;;  %v4866_v10 = vor.u32 %v5170_v39, %v4865_v54 }
 0x492   :  { %v5293_v30 = vpop.eup %5292  ;;  %3545 = vmatpush.bf16.msra.mxu3 %v4870_v49 }
 0x493   :  { %v7289_v25 = vmul.f32 %v5293_v30, %v2806_v26  ;;  %v5164_v30 = vld [vmem:[%s7576_s2 + $0x90] sm:$0xf0] }
 0x494   :  { %v4841_v31 = vor.u32 %v5164_v30, %v4840_v15  ;;  %v5161_v15 = vld [vmem:[%s7576_s2 + $0x30] sm:$0xf0]  ;;  %v4861_v30 = vld [vmem:[%s7576_s2 + $0x2c] sm:$0xf] }
 0x495   :  { %v2812_v52 = vpack.c.bf16 %v7289_v25, %v7289_v25  ;;  %v4829_v48 = vor.u32 %v5161_v15, %v4828_v12 }
 0x496   :  { %3444 = vmatpush.bf16.msra.mxu2 %v4841_v31  ;;  %3546 = vmatpush.bf16.msra.mxu3 %v4866_v10 }
 0x497   :  { %2887 = vmatmul.bf16.vlgmr.msrb.gmra.mxu0 %v2812_v52  ;;  %2985 = vmatmul.bf16.vlgmr.msrb.gmra.mxu1 %v2812_v52 }
 0x498   :  { %3066 = vmatmul.bf16.vlgmr.msrb.gmra.mxu2 %v2812_v52  ;;  %3166 = vmatmul.bf16.vlgmr.msrb.gmra.mxu3 %v2812_v52 }
 0x49a   :  { %3445 = vmatpush.bf16.msra.mxu2 %v4837_v42 }
 0x49e   :  { %3446 = vmatpush.bf16.msra.mxu2 %v4833_v51 }
 0x4a2   :  { %3447 = vmatpush.bf16.msra.mxu2 %v4829_v48 }
 0x514   :  { %v2888_v13 = vpop.f32.mrf.mxu0  ;;  %v7365_v20 = vpop.f32.mrf.mxu1 }
 0x515   :  { %v2892_v7 = vadd.f32 %v2888_v13, %v5961_v28  ;;  %v5156_v28 = vld [vmem:[%s7576_s2 + $0x94] sm:$0xf0]  ;;  %v4763_v13 = vld [vmem:[%s7576_s2 + $0x20] sm:$0xf] }
 0x516   :  { %v4809_v52 = vor.u32 %v5156_v28, %v4808_v47  ;;  %v4764_v53 = vor.u32 %v5145_v21, %v4763_v13  ;;  %v5153_v47 = vld [vmem:[%s7576_s2 + $0x34] sm:$0xf0] }
 0x517   :  { %v4658_v26 = vmul.f32 -1.442695, %v2892_v7  ;;  %v4796_v7 = vld [vmem:[%s7576_s2 + $0x28] sm:$0xf] }
 0x518   :  { %3363 = vmatpush.bf16.msra.mxu1 %v4809_v52  ;;  %v4797_v28 = vor.u32 %v5153_v47, %v4796_v7  ;;  %v4759_v52 = vld [vmem:[%s7576_s2] sm:$0xf] }
 0x519   :  { %5294 = vpow2.f32 %v4658_v26  ;;  %v5169_v26 = vld [vmem:[%s7576_s2 + $0x38] sm:$0xf0]  ;;  %v4760_v16 = vor.u32 %v5144_v57, %v4759_v52 }
 0x51a   :  { %v4862_v14 = vor.u32 %v5169_v26, %v4861_v30 }
 0x51b   :  { %v3067_v17 = vpop.f32.mrf.mxu2  ;;  %v3167_v40 = vpop.f32.mrf.mxu3 }
 0x51c   :  { %v3071_v36 = vadd.f32 %v3067_v17, %v5964_v29  ;;  %v3171_v1 = vadd.f32 %v3167_v40, %v5994_v60  ;;  %v2890_v22 = vpop.f32.mrf.mxu0  ;;  %v2988_v44 = vpop.f32.mrf.mxu1  ;;  %3364 = vmatpush.bf16.msra.mxu1 %v4805_v55  ;;  %v4768_v29 = vor.u32 %v5146_v37, %v4767_v61  ;;  %v4801_v60 = vor.u32 %v5154_v41, %v4800_v27  ;;  %v4857_v40 = vld [vmem:[%s7576_s2 + $0xc] sm:$0xf]  ;;  %v5168_v55 = vld [vmem:[%s7576_s2 + $0x18] sm:$0xf0] }
 0x51d   :  { %v4825_v17 = vor.u32 %v5160_v11, %v4824_v35  ;;  %3547 = vmatpush.bf16.msra.mxu3 %v4862_v14  ;;  %v4858_v18 = vor.u32 %v5168_v55, %v4857_v40 }
 0x51e   :  { %v4723_v46 = vmul.f32 -1.442695, %v3071_v36  ;;  %v4756_v9 = vmul.f32 -1.442695, %v3171_v1  ;;  %3267 = vmatpush.bf16.msra.mxu0 %v4768_v29  ;;  %v2990_v1 = vadd.f32 %v7365_v20, %v5991_v58 }
 0x51f   :  { %v5295_v23 = vpop.eup %5294  ;;  %3448 = vmatpush.bf16.msra.mxu2 %v4825_v17 }
 0x520   :  { %v7451_v8 = vadd.f32 1.0, %v5295_v23  ;;  %5296 = vpow2.f32 %v4723_v46  ;;  %3365 = vmatpush.bf16.msra.mxu1 %v4801_v60 }
 0x521   :  { %5298 = vpow2.f32 %v4756_v9  ;;  %3548 = vmatpush.bf16.msra.mxu3 %v4858_v18 }
 0x522   :  { %5300 = vrcp.f32 %v7451_v8  ;;  %3268 = vmatpush.bf16.msra.mxu0 %v4764_v53  ;;  %v2908_v37 = vand.u32 2147483648, %v7451_v8  ;;  %v2906_v41 = vand.u32 2147483647, %v7451_v8  ;;  %vm2902_vm14 = vweird.f32 %v7451_v8 }
 0x523   :  { %v3069_v31 = vpop.f32.mrf.mxu2  ;;  %v3169_v62 = vpop.f32.mrf.mxu3 }
 0x524   :  { %3366 = vmatpush.bf16.msra.mxu1 %v4797_v28  ;;  %v2909_v20 = vor.u32 1.1754944e-38, %v2908_v37  ;;  %vm2907_vm1 = vcmp.eq.f32.partialorder %v2906_v41, 8.507059e+37 }
 0x526   :  { %v5297_v42 = vpop.eup %5296  ;;  %3269 = vmatpush.bf16.msra.mxu0 %v4760_v16 }
 0x527   :  { %v5299_v24 = vpop.eup %5298  ;;  %v3075_v61 = vadd.f32 1.0, %v5297_v42 }
 0x528   :  { %v5301_v36 = vpop.eup %5300  ;;  %v3175_v22 = vadd.f32 1.0, %v5299_v24  ;;  %3367 = vmatpush.bf16.msra.mxu1 %v4793_v34 }
 0x529   :  { %v2898_v44 = vmul.f32 %v5301_v36, %v7451_v8  ;;  %5302 = vrcp.f32 %v3075_v61  ;;  %vm2903_vm13 = vweird.f32 %v5301_v36  ;;  %v3087_v23 = vand.u32 2147483648, %v3075_v61 }
 0x52a   :  { %5304 = vrcp.f32 %v3175_v22  ;;  %vm2904_vm15 = vmor %vm2902_vm14, %vm2903_vm13  ;;  %v3085_v13 = vand.u32 2147483647, %v3075_v61  ;;  %vm3081_vm3 = vweird.f32 %v3075_v61  ;;  %v3187_v26 = vand.u32 2147483648, %v3175_v22 }
 0x52b   :  { %v2899_v49 = vsub.f32 1.0, %v2898_v44  ;;  %5306 = vtanh.f32 %v2990_v1  ;;  %v3088_v8 = vor.u32 1.1754944e-38, %v3087_v23  ;;  %vm3181_vm7 = vweird.f32 %v3175_v22 }
 0x52c   :  { %vm3086_vm5 = vcmp.eq.f32.partialorder %v3085_v13, 8.507059e+37  ;;  %v3185_v52 = vand.u32 2147483647, %v3175_v22  ;;  %v3188_v62 = vor.u32 1.1754944e-38, %v3187_v26 }
 0x52d   :  { %v2900_v27 = vmul.f32 %v5301_v36, %v2899_v49 }
 0x52e   :  { %vm3186_vm9 = vcmp.eq.f32.partialorder %v3185_v52, 8.507059e+37 }
 0x52f   :  { %v5303_v29 = vpop.eup %5302  ;;  %v2901_v60 = vadd.f32 %v5301_v36, %v2900_v27 }
 0x530   :  { %v5305_v58 = vpop.eup %5304  ;;  %v3077_v59 = vmul.f32 %v5303_v29, %v3075_v61  ;;  %vm3082_vm2 = vweird.f32 %v5303_v29 }
 0x531   :  { %v2905_v43 = vsel %vm2904_vm15, %v5301_v36, %v2901_v60  ;;  %v3177_v54 = vmul.f32 %v5305_v58, %v3175_v22  ;;  %v5307_v46 = vpop.eup %5306  ;;  %vm3083_vm4 = vmor %vm3081_vm3, %vm3082_vm2  ;;  %vm3182_vm6 = vweird.f32 %v5305_v58 }
 0x532   :  { %v2910_v9 = vsel %vm2907_vm1, %v2909_v20, %v2905_v43  ;;  %v3078_v51 = vsub.f32 1.0, %v3077_v59  ;;  %vm3183_vm8 = vmor %vm3181_vm7, %vm3182_vm6 }
 0x533   :  { %v2992_v39 = vmul.f32 %v5307_v46, %v2910_v9  ;;  %v3178_v21 = vsub.f32 1.0, %v3177_v54 }
 0x534   :  { %v3079_v10 = vmul.f32 %v5303_v29, %v3078_v51 }
 0x535   :  { %v3179_v12 = vmul.f32 %v5305_v58, %v3178_v21 }
 0x536   :  { %v3080_v7 = vadd.f32 %v5303_v29, %v3079_v10 }
 0x537   :  { %v3180_v30 = vadd.f32 %v5305_v58, %v3179_v12 }
 0x538   :  { %v3084_v53 = vsel %vm3083_vm4, %v5303_v29, %v3080_v7 }
 0x539   :  { %v3089_v47 = vsel %vm3086_vm5, %v3088_v8, %v3084_v53  ;;  %v3184_v31 = vsel %vm3183_vm8, %v5305_v58, %v3180_v30 }
 0x53a   :  { %v3091_v28 = vmul.f32 %v3089_v47, %v7286_v6  ;;  %v3189_v14 = vsel %vm3186_vm9, %v3188_v62, %v3184_v31 }
 0x53c   :  { %v7500_v15 = vadd.f32 %v3091_v28, %v2992_v39 }
 0x53e   :  { %5308 = vtanh.f32 %v7500_v15 }
 0x544   :  { %v5309_v48 = vpop.eup %5308 }
 0x545   :  { %v7503_v57 = vmul.f32 %v5309_v48, %v3189_v14  ;;  %v3614_v48 = vrot.slane %v7075_v45, 4 }
 0x547   :  { %v3195_v6 = vpack.c.bf16 %v7503_v57, %v7503_v57  ;;  %v3612_v14 = vrot.slane %v7503_v57, 4 }
 0x549   :  { %3270 = vmatmul.bf16.vlgmr.msra.gmra.mxu0 %v3195_v6  ;;  %3368 = vmatmul.bf16.vlgmr.msra.gmra.mxu1 %v3195_v6 }
 0x54a   :  { %3449 = vmatmul.bf16.vlgmr.msra.gmra.mxu2 %v3195_v6  ;;  %3549 = vmatmul.bf16.vlgmr.msra.gmra.mxu3 %v3195_v6 }
 0x5c6   :  { %v3271_v5 = vpop.f32.mrf.mxu0  ;;  %v3369_v50 = vpop.f32.mrf.mxu1 }
 0x5c7   :  { %v3275_v16 = vadd.f32 %v3271_v5, %v5997_v3  ;;  %v3373_v27 = vadd.f32 %v3369_v50, %v6053_v63  ;;  %v3615_v5 = vsel %vm48_vm0, %v7503_v57, %v3614_v48 }
 0x5c9   :  { %v4789_v35 = vmul.f32 -1.442695, %v3275_v16 }
 0x5cb   :  { %5310 = vpow2.f32 %v4789_v35 }
 0x5cd   :  { %v3450_v11 = vpop.f32.mrf.mxu2  ;;  %v3550_v34 = vpop.f32.mrf.mxu3 }
 0x5ce   :  { %v3454_v17 = vadd.f32 %v3450_v11, %v6000_v4  ;;  %v3554_v40 = vadd.f32 %v3550_v34, %v6056_v0  ;;  %v3273_v55 = vpop.f32.mrf.mxu0  ;;  %v3371_v42 = vpop.f32.mrf.mxu1  ;;  %v3623_v11 = vperm.slane %v3615_v5, %v5617_v56 }
 0x5cf   :  { %v3659_v42 = vperm.slane %v6854_v38, %v5664_v19 }
 0x5d0   :  { %v4854_v18 = vmul.f32 -1.442695, %v3454_v17  ;;  %v4887_v24 = vmul.f32 -1.442695, %v3554_v40  ;;  %v3626_v17 = vrot.slane %v7289_v25, 4 }
 0x5d1   :  { %v5311_v61 = vpop.eup %5310 }
 0x5d2   :  { %v3279_v36 = vadd.f32 1.0, %v5311_v61  ;;  %5312 = vpow2.f32 %v4854_v18 }
 0x5d3   :  { %5314 = vpow2.f32 %v4887_v24  ;;  %v3647_v24 = vperm.slane %v6857_v2, %v5664_v19 }
 0x5d4   :  { %5316 = vrcp.f32 %v3279_v36  ;;  %v3291_v29 = vand.u32 2147483648, %v3279_v36  ;;  %v3289_v58 = vand.u32 2147483647, %v3279_v36  ;;  %vm3285_vm11 = vweird.f32 %v3279_v36 }
 0x5d5   :  { %v3452_v1 = vpop.f32.mrf.mxu2  ;;  %v3552_v22 = vpop.f32.mrf.mxu3 }
 0x5d6   :  { %v3292_v54 = vor.u32 1.1754944e-38, %v3291_v29  ;;  %vm3290_vm13 = vcmp.eq.f32.partialorder %v3289_v58, 8.507059e+37  ;;  %v3655_v1 = vperm.slane %v6860_v32, %v5664_v19 }
 0x5d8   :  { %v5313_v3 = vpop.eup %5312 }
 0x5d9   :  { %v5315_v44 = vpop.eup %5314  ;;  %v3458_v49 = vadd.f32 1.0, %v5313_v3 }
 0x5da   :  { %v5317_v37 = vpop.eup %5316  ;;  %v3558_v4 = vadd.f32 1.0, %v5315_v44 }
 0x5db   :  { %v3281_v41 = vmul.f32 %v5317_v37, %v3279_v36  ;;  %5318 = vrcp.f32 %v3458_v49  ;;  %vm3286_vm10 = vweird.f32 %v5317_v37  ;;  %v3470_v13 = vand.u32 2147483648, %v3458_v49 }
 0x5dc   :  { %5320 = vrcp.f32 %v3558_v4  ;;  %vm3287_vm12 = vmor %vm3285_vm11, %vm3286_vm10  ;;  %v3468_v7 = vand.u32 2147483647, %v3458_v49  ;;  %vm3464_vm15 = vweird.f32 %v3458_v49  ;;  %v3570_v62 = vand.u32 2147483648, %v3558_v4 }
 0x5dd   :  { %v3282_v0 = vsub.f32 1.0, %v3281_v41  ;;  %5322 = vtanh.f32 %v3373_v27  ;;  %v3471_v47 = vor.u32 1.1754944e-38, %v3470_v13  ;;  %vm3564_vm4 = vweird.f32 %v3558_v4 }
 0x5de   :  { %vm3469_vm2 = vcmp.eq.f32.partialorder %v3468_v7, 8.507059e+37  ;;  %v3568_v6 = vand.u32 2147483647, %v3558_v4  ;;  %v3571_v16 = vor.u32 1.1754944e-38, %v3570_v62  ;;  %v3643_v36 = vperm.slane %v6863_v33, %v5664_v19 }
 0x5df   :  { %v3283_v60 = vmul.f32 %v5317_v37, %v3282_v0  ;;  %v3690_v27 = vrot.slane %v3647_v24, 4 }
 0x5e0   :  { %vm3569_vm6 = vcmp.eq.f32.partialorder %v3568_v6, 8.507059e+37 }
 0x5e1   :  { %v5319_v20 = vpop.eup %5318  ;;  %v3284_v59 = vadd.f32 %v5317_v37, %v3283_v60  ;;  %v3694_v60 = vrot.slane %v3655_v1, 4 }
 0x5e2   :  { %v5321_v43 = vpop.eup %5320  ;;  %v3460_v46 = vmul.f32 %v5319_v20, %v3458_v49  ;;  %vm3465_vm14 = vweird.f32 %v5319_v20 }
 0x5e3   :  { %v3288_v9 = vsel %vm3287_vm12, %v5317_v37, %v3284_v59  ;;  %v3560_v63 = vmul.f32 %v5321_v43, %v3558_v4  ;;  %v5323_v51 = vpop.eup %5322  ;;  %vm3466_vm1 = vmor %vm3464_vm15, %vm3465_vm14  ;;  %vm3565_vm3 = vweird.f32 %v5321_v43  ;;  %v3698_v37 = vrot.slane %v3659_v42, 4 }
 0x5e4   :  { %v3293_v39 = vsel %vm3290_vm13, %v3292_v54, %v3288_v9  ;;  %v3461_v23 = vsub.f32 1.0, %v3460_v46  ;;  %vm3566_vm5 = vmor %vm3564_vm4, %vm3565_vm3 }
 0x5e5   :  { %v3375_v10 = vmul.f32 %v5323_v51, %v3293_v39  ;;  %v3561_v8 = vsub.f32 1.0, %v3560_v63 }
 0x5e6   :  { %v3462_v21 = vmul.f32 %v5319_v20, %v3461_v23 }
 0x5e7   :  { %v3562_v30 = vmul.f32 %v5321_v43, %v3561_v8 }
 0x5e8   :  { %v3463_v53 = vadd.f32 %v5319_v20, %v3462_v21 }
 0x5e9   :  { %v3563_v31 = vadd.f32 %v5321_v43, %v3562_v30 }
 0x5ea   :  { %v3467_v12 = vsel %vm3466_vm1, %v5319_v20, %v3463_v53 }
 0x5eb   :  { %v3472_v28 = vsel %vm3469_vm2, %v3471_v47, %v3467_v12  ;;  %v3567_v50 = vsel %vm3566_vm5, %v5321_v43, %v3563_v31 }
 0x5ec   :  { %v3474_v26 = vmul.f32 %v3472_v28, %v7500_v15  ;;  %v3613_v15 = vsel %vm48_vm0, %v3612_v14, %v7075_v45  ;;  %v3572_v34 = vsel %vm3569_vm6, %v3571_v16, %v3567_v50  ;;  %v3674_v45 = vrot.slane %v3623_v11, 4 }
 0x5ed   :  { %v3619_v55 = vperm.slane %v3613_v15, %v5617_v56 }
 0x5ee   :  { %v3475_v52 = vadd.f32 %v3474_v26, %v3375_v10 }
 0x5ef   :  { %v3662_v3 = vrot.slane %v3619_v55, 4 }
 0x5f0   :  { %5324 = vtanh.f32 %v3475_v52 }
 0x5f6   :  { %v5325_v35 = vpop.eup %5324 }
 0x5f7   :  { %v3575_v40 = vmul.f32 %v5325_v35, %v3572_v34 }
 0x5f9   :  { %v3624_v18 = vrot.slane %v3575_v40, 4  ;;  %v3627_v57 = vsel %vm48_vm0, %v3575_v40, %v3626_v17 }
 0x5fa   :  { %v3635_v61 = vperm.slane %v3627_v57, %v5617_v56 }
 0x5fb   :  { %v3625_v22 = vsel %vm48_vm0, %v3624_v18, %v7289_v25 }
 0x5fc   :  { %v3631_v38 = vperm.slane %v3625_v22, %v5617_v56  ;;  %v3672_v44 = vrot.slane %v3635_v61, 4  ;;  %v3675_v49 = vsel %vm48_vm0, %v3635_v61, %v3674_v45  ;;  %v3686_v56 = vrot.slane %v3643_v36, 4 }
 0x5fd   :  { %v3683_v2 = vperm.slane %v3675_v49, %v5664_v19 }
 0x5fe   :  { %v3660_v4 = vrot.slane %v3631_v38, 4  ;;  %v3663_v41 = vsel %vm48_vm0, %v3631_v38, %v3662_v3  ;;  %v3673_v33 = vsel %vm48_vm0, %v3672_v44, %v3623_v11 }
 0x5ff   :  { %v3671_v32 = vperm.slane %v3663_v41, %v5664_v19  ;;  %v3679_v0 = vperm.slane %v3673_v33, %v5664_v19  ;;  %v3696_v25 = vrot.slane %v3683_v2, 4  ;;  %v3699_v29 = vsel %vm48_vm0, %v3683_v2, %v3698_v37 }
 0x600   :  { %v3661_v58 = vsel %vm48_vm0, %v3660_v4, %v3619_v55  ;;  %3707 = vst [vmem:[%s7578_s4 + $0x38] sm:$0xff] %v3699_v29 }
 0x601   :  { %v3667_v20 = vperm.slane %v3661_v58, %v5664_v19  ;;  %v3688_v59 = vrot.slane %v3671_v32, 4  ;;  %v3691_v43 = vsel %vm48_vm0, %v3671_v32, %v3690_v27  ;;  %v3692_v54 = vrot.slane %v3679_v0, 4 }
 0x602   :  { %v3695_v46 = vsel %vm48_vm0, %v3679_v0, %v3694_v60  ;;  %v3697_v9 = vsel %vm48_vm0, %v3696_v25, %v3659_v42  ;;  %3703 = vst [vmem:[%s7578_s4 + $0x18] sm:$0xff] %v3691_v43 }
 0x603   :  { %v3684_v63 = vrot.slane %v3667_v20, 4  ;;  %v3687_v51 = vsel %vm48_vm0, %v3667_v20, %v3686_v56  ;;  %v3689_v39 = vsel %vm48_vm0, %v3688_v59, %v3647_v24  ;;  %v3693_v23 = vsel %vm48_vm0, %v3692_v54, %v3655_v1  ;;  %3705 = vst [vmem:[%s7578_s4 + $0x28] sm:$0xff] %v3695_v46 }
 0x604   :  { %3701 = vst [vmem:[%s7578_s4 + $0x8] sm:$0xff] %v3687_v51 }
 0x605   :  { %v3685_v19 = vsel %vm48_vm0, %v3684_v63, %v3643_v36  ;;  %3702 = vst [vmem:[%s7578_s4 + $0x10] sm:$0xff] %v3689_v39 }
 0x606   :  { %3700 = vst [vmem:[%s7578_s4] sm:$0xff] %v3685_v19 }
 0x607   :  { %3704 = vst [vmem:[%s7578_s4 + $0x20] sm:$0xff] %v3693_v23 }
 0x608   :  { %3706 = vst [vmem:[%s7578_s4 + $0x30] sm:$0xff] %v3697_v9 }

</bundles_post_ra>
